<compile_context>
chip_gen: v7x
topology: tpu7x:2x2x1
jax: 0.10.0
libtpu: 0.0.40
codegen_flags: <defaults>
</compile_context>

<pallas_src>
import math

import jax
import jax.numpy as jnp
from jax.experimental import pallas as pl
from jax.experimental.pallas import tpu as pltpu

# ----------------------------- configuration --------------------------------
LAYERS = 2
PAD_IDX = 0
WORDS = 64           # vocabulary size
SEQ_LEN = 8          # max positions (== example sequence length here)
HEADS = 4
DIMS = 32
RATE = 4
BIDIRECTIONAL = False    # GPT-2 style: causal (future) masking enabled
LN_EPS = 1e-5
VOCAB_PAD = 128          # pad vocab 64 -> 128 for lane-dense logits stores


# ------------------------------ fused kernel ---------------------------------
def _layer_norm(x, g, b):
    mu = jnp.mean(x, axis=-1, keepdims=True)
    var = jnp.mean((x - mu) ** 2, axis=-1, keepdims=True)
    return (x - mu) * jax.lax.rsqrt(var + LN_EPS) * g + b


def _fused_transformer_kernel(
    tok_ref, x_ref,
    ln1g_ref, ln1b_ref, wqkv_ref, bqkv_ref, wo_ref, bo_ref,
    ln2g_ref, ln2b_ref, w1_ref, b1_ref, w2_ref, b2_ref,
    lnhg_ref, lnhb_ref, wvocab_ref,
    logits_ref, kv_ref,
):
    B, S = tok_ref.shape
    D = x_ref.shape[1]
    H = HEADS
    hd = D // H
    f32 = jnp.float32
    bf16 = jnp.bfloat16

    x = x_ref[...].astype(f32)                            # [B*S, D]

    # Additive attention bias per batch element, built entirely in-kernel
    # from the raw tokens (pad columns + causal future mask).
    is_pad = (tok_ref[...] == PAD_IDX).astype(f32)        # [B, S]
    r = jax.lax.broadcasted_iota(jnp.int32, (S, S), 0)
    c = jax.lax.broadcasted_iota(jnp.int32, (S, S), 1)
    causal = (c > r).astype(f32)                          # [S, S]
    bias = []
    for b in range(B):
        m = jnp.broadcast_to(is_pad[b:b + 1, :], (S, S))
        if not BIDIRECTIONAL:
            m = jnp.maximum(m, causal)
        bias.append(m * (-10000.0))                       # [S, S] per batch

    kv_parts = []                                         # [k0, v0, k1, v1, ...]
    for l in range(LAYERS):                               # static unroll (L=2)
        # ---- LN1 + q/k/v projections (bf16 weights, f32 accumulation) ----
        a = _layer_norm(x, ln1g_ref[l], ln1b_ref[l])
        ab = a.astype(bf16)
        # 1/sqrt(hd) is folded into the q weights/bias at pack time.
        q = jnp.dot(ab, wqkv_ref[l, 0], preferred_element_type=f32) + bqkv_ref[l, 0]
        k = jnp.dot(ab, wqkv_ref[l, 1], preferred_element_type=f32) + bqkv_ref[l, 1]
        v = jnp.dot(ab, wqkv_ref[l, 2], preferred_element_type=f32) + bqkv_ref[l, 2]
        kv_parts += [k, v]                                # present (k, v), [B*S, D]

        # ---- multi-head attention: one k/v/q transpose per batch element,
        #      per-head views via sublane slices only (no lane slices) ----
        attn_rows = []
        for b in range(B):                                # static unroll (B=2)
            rs = slice(b * S, (b + 1) * S)
            qT = q[rs, :].T                               # [D, S]
            kT = k[rs, :].T                               # [D, S]
            vT = v[rs, :].T                               # [D, S]
            acc = jnp.zeros((S, D), f32)
            for h in range(H):                            # static unroll (H=4)
                hs = slice(h * hd, (h + 1) * hd)
                q_h = qT[hs, :].T                         # [S, hd] (8x8 transpose)
                k_hT = kT[hs, :]                          # [hd, S] sublane slice
                v_hT = vT[hs, :]                          # [hd, S] sublane slice
                s = jnp.dot(q_h, k_hT,
                            preferred_element_type=f32) + bias[b]        # [S, S]
                s = s - jnp.max(s, axis=-1, keepdims=True)
                p = jnp.exp(s)
                p = p * pl.reciprocal(jnp.sum(p, axis=-1, keepdims=True),
                                      approx=False)
                oh = jax.lax.dot_general(                  # [S, hd]  (rhs-transposed)
                    p, v_hT, (((1,), (1,)), ((), ())),
                    preferred_element_type=f32)
                # head-merge folded into the output projection rows
                acc = acc + jnp.dot(oh.astype(bf16), wo_ref[l, h],
                                    preferred_element_type=f32)          # [S, D]
            attn_rows.append(acc)
        x = x + jnp.concatenate(attn_rows, axis=0) + bo_ref[l]           # residual

        # ---- LN2 + FFN (Swish) + residual ----
        hid = _layer_norm(x, ln2g_ref[l], ln2b_ref[l])
        f = jnp.dot(hid.astype(bf16), w1_ref[l],
                    preferred_element_type=f32) + b1_ref[l]
        f = f * jax.nn.sigmoid(f)                         # Swish
        f = jnp.dot(f.astype(bf16), w2_ref[l],
                    preferred_element_type=f32) + b2_ref[l]
        x = x + f

    # ---- final LN + tied-embedding logits (lane-dense, vocab padded) ----
    xf = _layer_norm(x, lnhg_ref[...], lnhb_ref[...])
    logits_ref[...] = jnp.dot(xf.astype(bf16), wvocab_ref[...],
                              preferred_element_type=f32).astype(logits_ref.dtype)

    # Single lane-dense store of all present k/v: [B*S, L*2*D] = [16, 128].
    kv_ref[...] = jnp.concatenate(kv_parts, axis=1).astype(kv_ref.dtype)


# ------------------------------ parameters -----------------------------------
def init_params(key):
    """Module-faithful f32 parameters (torch-layer equivalents)."""
    def nrm(k, shape, std=0.02):
        return jax.random.normal(k, shape, jnp.float32) * std

    keys = jax.random.split(key, 2 + LAYERS)
    params = {
        "tok_emb": nrm(keys[0], (WORDS, DIMS)),
        "pos_emb": nrm(keys[1], (SEQ_LEN, DIMS)),
        "lnh_g": jnp.ones((DIMS,), jnp.float32),
        "lnh_b": jnp.zeros((DIMS,), jnp.float32),
    }
    per = {n: [] for n in ["wq", "wk", "wv", "wo", "w1", "w2"]}
    for li in range(LAYERS):
        lk = jax.random.split(keys[2 + li], 6)
        per["wq"].append(nrm(lk[0], (DIMS, DIMS)))
        per["wk"].append(nrm(lk[1], (DIMS, DIMS)))
        per["wv"].append(nrm(lk[2], (DIMS, DIMS)))
        per["wo"].append(nrm(lk[3], (DIMS, DIMS)))
        per["w1"].append(nrm(lk[4], (DIMS, DIMS * RATE)))
        per["w2"].append(nrm(lk[5], (DIMS * RATE, DIMS)))
    for n, vals in per.items():
        params[n] = jnp.stack(vals)
    L = LAYERS
    params.update({
        "bq": jnp.zeros((L, DIMS), jnp.float32),
        "bk": jnp.zeros((L, DIMS), jnp.float32),
        "bv": jnp.zeros((L, DIMS), jnp.float32),
        "bo": jnp.zeros((L, DIMS), jnp.float32),
        "b1": jnp.zeros((L, DIMS * RATE), jnp.float32),
        "b2": jnp.zeros((L, DIMS), jnp.float32),
        "ln1_g": jnp.ones((L, DIMS), jnp.float32),
        "ln1_b": jnp.zeros((L, DIMS), jnp.float32),
        "ln2_g": jnp.ones((L, DIMS), jnp.float32),
        "ln2_b": jnp.zeros((L, DIMS), jnp.float32),
    })
    return params


def pack_params(p):
    """One-time kernel layout prep (done OUTSIDE the forward):
    bf16 weights for the MXU, q-scale folding, per-head wo layout,
    padded + transposed tied-embedding logits weight."""
    bf16 = jnp.bfloat16
    L, D, H = LAYERS, DIMS, HEADS
    hd = D // H
    scale = 1.0 / math.sqrt(hd)
    wq = p["wq"] * scale                                   # fold 1/sqrt(hd) into q
    bq = p["bq"] * scale
    return {
        "tok_emb": p["tok_emb"],                           # f32 (wrapper gather)
        "pos_emb": p["pos_emb"],
        "ln1_g": p["ln1_g"][:, None, :],                   # [L, 1, D] f32
        "ln1_b": p["ln1_b"][:, None, :],
        "ln2_g": p["ln2_g"][:, None, :],
        "ln2_b": p["ln2_b"][:, None, :],
        "lnh_g": p["lnh_g"][None, :],                      # [1, D] f32
        "lnh_b": p["lnh_b"][None, :],
        "wqkv": jnp.stack([wq, p["wk"], p["wv"]], axis=1).astype(bf16),    # [L,3,D,D]
        "bqkv": jnp.stack([bq, p["bk"], p["bv"]], axis=1)[:, :, None, :],  # [L,3,1,D]
        "wo": p["wo"].reshape(L, H, hd, D).astype(bf16),                   # [L,H,hd,D]
        "bo": p["bo"][:, None, :],                                         # [L,1,D]
        "w1": p["w1"].astype(bf16),                                        # [L,D,4D]
        "b1": p["b1"][:, None, :],                                         # [L,1,4D]
        "w2": p["w2"].astype(bf16),                                        # [L,4D,D]
        "b2": p["b2"][:, None, :],                                         # [L,1,D]
        "w_vocab": jnp.zeros((D, VOCAB_PAD), bf16).at[:, :WORDS].set(
            p["tok_emb"].T.astype(bf16)),                                  # [D,128]
    }


# ------------------------------- forward pass ---------------------------------
def transformer_forward(packed, tokens):
    B, S = tokens.shape
    D, L = DIMS, LAYERS

    # TODO(synk): token/positional embedding gather and eval-mode dropout
    # (identity) remain in plain JAX outside the kernel.
    x = packed["tok_emb"][tokens] + packed["pos_emb"][:S][None, :, :]
    x2d = x.reshape(B * S, D)                              # fold batch into rows

    inputs = (
        tokens, x2d,
        packed["ln1_g"], packed["ln1_b"], packed["wqkv"], packed["bqkv"],
        packed["wo"], packed["bo"],
        packed["ln2_g"], packed["ln2_b"], packed["w1"], packed["b1"],
        packed["w2"], packed["b2"],
        packed["lnh_g"], packed["lnh_b"], packed["w_vocab"],
    )
    vmem = lambda: pl.BlockSpec(memory_space=pltpu.MemorySpace.VMEM)

    # No grid: single kernel invocation, everything resident in VMEM,
    # no pipelining / double-buffering of the (constant) weights.
    logits_p, kv = pl.pallas_call(
        _fused_transformer_kernel,
        out_shape=(
            jax.ShapeDtypeStruct((B * S, VOCAB_PAD), jnp.float32),   # padded logits
            jax.ShapeDtypeStruct((B * S, L * 2 * D), jnp.float32),   # packed k/v
        ),
        in_specs=[vmem() for _ in inputs],
        out_specs=(vmem(), vmem()),
    )(*inputs)

    logits = logits_p.reshape(B, S, VOCAB_PAD)[:, :, :WORDS]
    kv_r = kv.reshape(B, S, L, 2, D)
    presents = [(kv_r[:, :, l, 0], kv_r[:, :, l, 1]) for l in range(L)]
    return logits, presents


# ----------------------------------- main -------------------------------------
if __name__ == "__main__":
    key = jax.random.PRNGKey(0)
    pkey, tkey = jax.random.split(key)

    params = init_params(pkey)
    packed = pack_params(params)          # one-time layout prep, outside forward

    B, S = 2, SEQ_LEN
    tokens = jax.random.randint(tkey, (B, S), 0, WORDS, dtype=jnp.int32)

    fwd = jax.jit(transformer_forward)
    logits, presents = fwd(packed, tokens)
    logits = jax.block_until_ready(logits)
    for kv in presents:
        jax.block_until_ready(kv[0])
        jax.block_until_ready(kv[1])

    assert logits.shape == (B, S, WORDS)
    assert logits.dtype == jnp.float32
    assert len(presents) == LAYERS
    assert presents[0][0].shape == (B, S, DIMS)
    assert bool(jnp.all(jnp.isfinite(logits)))
    print("KERNEL_OK")
</pallas_src>

<mosaic_0001>
module attributes {stable_mosaic.version = 11 : i64} {
  func.func @_fused_transformer_kernel(%arg0: memref<2x8xi32, #tpu.memory_space<vmem>>, %arg1: memref<16x32xf32, #tpu.memory_space<vmem>>, %arg2: memref<2x1x32xf32, #tpu.memory_space<vmem>>, %arg3: memref<2x1x32xf32, #tpu.memory_space<vmem>>, %arg4: memref<2x3x32x32xbf16, #tpu.memory_space<vmem>>, %arg5: memref<2x3x1x32xf32, #tpu.memory_space<vmem>>, %arg6: memref<2x4x8x32xbf16, #tpu.memory_space<vmem>>, %arg7: memref<2x1x32xf32, #tpu.memory_space<vmem>>, %arg8: memref<2x1x32xf32, #tpu.memory_space<vmem>>, %arg9: memref<2x1x32xf32, #tpu.memory_space<vmem>>, %arg10: memref<2x32x128xbf16, #tpu.memory_space<vmem>>, %arg11: memref<2x1x128xf32, #tpu.memory_space<vmem>>, %arg12: memref<2x128x32xbf16, #tpu.memory_space<vmem>>, %arg13: memref<2x1x32xf32, #tpu.memory_space<vmem>>, %arg14: memref<1x32xf32, #tpu.memory_space<vmem>>, %arg15: memref<1x32xf32, #tpu.memory_space<vmem>>, %arg16: memref<32x128xbf16, #tpu.memory_space<vmem>>, %arg17: memref<16x128xf32, #tpu.memory_space<vmem>>, %arg18: memref<16x128xf32, #tpu.memory_space<vmem>>) attributes {dimension_semantics = [], scalar_prefetch = 0 : i64, scratch_operands = 0 : i64, tpu.core_type = #tpu.core_type<tc>} {
    %c0 = arith.constant 0 : index
    %c0_0 = arith.constant 0 : index
    %0 = vector.load %arg1[%c0, %c0_0] : memref<16x32xf32, #tpu.memory_space<vmem>>, vector<16x32xf32>
    %c0_1 = arith.constant 0 : index
    %c0_2 = arith.constant 0 : index
    %1 = vector.load %arg0[%c0_1, %c0_2] : memref<2x8xi32, #tpu.memory_space<vmem>>, vector<2x8xi32>
    %c0_i32 = arith.constant 0 : i32
    %2 = vector.broadcast %c0_i32 : i32 to vector<2x8xi32>
    %3 = arith.cmpi eq, %1, %2 : vector<2x8xi32>
    %4 = arith.extui %3 : vector<2x8xi1> to vector<2x8xi32>
    %5 = arith.sitofp %4 : vector<2x8xi32> to vector<2x8xf32>
    %6 = tpu.iota {dimensions = array<i32: 0>} : vector<8x8xi32>
    %7 = tpu.iota {dimensions = array<i32: 1>} : vector<8x8xi32>
    %8 = arith.cmpi sgt, %7, %6 : vector<8x8xi32>
    %9 = arith.extui %8 : vector<8x8xi1> to vector<8x8xi32>
    %10 = arith.sitofp %9 : vector<8x8xi32> to vector<8x8xf32>
    %11 = vector.extract_strided_slice %5 {offsets = [0, 0], sizes = [1, 8], strides = [1, 1]} : vector<2x8xf32> to vector<1x8xf32>
    %12 = vector.shape_cast %11 : vector<1x8xf32> to vector<1x8xf32>
    %13 = vector.broadcast %12 : vector<1x8xf32> to vector<8x8xf32>
    %14 = arith.maximumf %13, %10 : vector<8x8xf32>
    %cst = arith.constant -1.000000e+04 : f32
    %15 = vector.broadcast %cst : f32 to vector<8x8xf32>
    %16 = arith.mulf %14, %15 : vector<8x8xf32>
    %17 = vector.extract_strided_slice %5 {offsets = [1, 0], sizes = [1, 8], strides = [1, 1]} : vector<2x8xf32> to vector<1x8xf32>
    %18 = vector.shape_cast %17 : vector<1x8xf32> to vector<1x8xf32>
    %19 = vector.broadcast %18 : vector<1x8xf32> to vector<8x8xf32>
    %20 = arith.maximumf %19, %10 : vector<8x8xf32>
    %cst_3 = arith.constant -1.000000e+04 : f32
    %21 = vector.broadcast %cst_3 : f32 to vector<8x8xf32>
    %22 = arith.mulf %20, %21 : vector<8x8xf32>
    %c0_4 = arith.constant 0 : index
    %c0_5 = arith.constant 0 : index
    %c0_6 = arith.constant 0 : index
    %23 = vector.load %arg2[%c0_4, %c0_5, %c0_6] : memref<2x1x32xf32, #tpu.memory_space<vmem>>, vector<1x1x32xf32>
    %24 = vector.shape_cast %23 : vector<1x1x32xf32> to vector<1x32xf32>
    %c0_7 = arith.constant 0 : index
    %c0_8 = arith.constant 0 : index
    %c0_9 = arith.constant 0 : index
    %25 = vector.load %arg3[%c0_7, %c0_8, %c0_9] : memref<2x1x32xf32, #tpu.memory_space<vmem>>, vector<1x1x32xf32>
    %26 = vector.shape_cast %25 : vector<1x1x32xf32> to vector<1x32xf32>
    %cst_10 = arith.constant dense<0.000000e+00> : vector<16xf32>
    %27 = vector.multi_reduction <add>, %0, %cst_10 [1] : vector<16x32xf32> to vector<16xf32>
    %28 = vector.shape_cast %27 : vector<16xf32> to vector<16x1xf32>
    %cst_11 = arith.constant 3.200000e+01 : f32
    %29 = vector.broadcast %cst_11 : f32 to vector<16x1xf32>
    %30 = arith.divf %28, %29 : vector<16x1xf32>
    %31 = vector.broadcast %30 : vector<16x1xf32> to vector<16x32xf32>
    %32 = arith.subf %0, %31 : vector<16x32xf32>
    %33 = arith.mulf %32, %32 : vector<16x32xf32>
    %cst_12 = arith.constant dense<0.000000e+00> : vector<16xf32>
    %34 = vector.multi_reduction <add>, %33, %cst_12 [1] : vector<16x32xf32> to vector<16xf32>
    %35 = vector.shape_cast %34 : vector<16xf32> to vector<16x1xf32>
    %cst_13 = arith.constant 3.200000e+01 : f32
    %36 = vector.broadcast %cst_13 : f32 to vector<16x1xf32>
    %37 = arith.divf %35, %36 : vector<16x1xf32>
    %38 = vector.broadcast %30 : vector<16x1xf32> to vector<16x32xf32>
    %39 = arith.subf %0, %38 : vector<16x32xf32>
    %cst_14 = arith.constant 9.99999974E-6 : f32
    %40 = vector.broadcast %cst_14 : f32 to vector<16x1xf32>
    %41 = arith.addf %37, %40 : vector<16x1xf32>
    %42 = math.rsqrt %41 : vector<16x1xf32>
    %43 = vector.broadcast %42 : vector<16x1xf32> to vector<16x32xf32>
    %44 = arith.mulf %39, %43 : vector<16x32xf32>
    %45 = vector.broadcast %24 : vector<1x32xf32> to vector<16x32xf32>
    %46 = arith.mulf %44, %45 : vector<16x32xf32>
    %47 = vector.broadcast %26 : vector<1x32xf32> to vector<16x32xf32>
    %48 = arith.addf %46, %47 : vector<16x32xf32>
    %49 = arith.truncf %48 : vector<16x32xf32> to vector<16x32xbf16>
    %c0_15 = arith.constant 0 : index
    %c0_16 = arith.constant 0 : index
    %c0_17 = arith.constant 0 : index
    %c0_18 = arith.constant 0 : index
    %50 = vector.load %arg4[%c0_15, %c0_16, %c0_17, %c0_18] : memref<2x3x32x32xbf16, #tpu.memory_space<vmem>>, vector<1x1x32x32xbf16>
    %51 = vector.shape_cast %50 : vector<1x1x32x32xbf16> to vector<32x32xbf16>
    %cst_19 = arith.constant dense<0.000000e+00> : vector<16x32xf32>
    %52 = tpu.matmul %49, %51, %cst_19 {dimension_numbers = #tpu.dot_dimension_numbers<[1], [0], [0], [1], [0, 0, 1, 1], [], []>} : vector<16x32xbf16>, vector<32x32xbf16>, vector<16x32xf32> -> vector<16x32xf32>
    %c0_20 = arith.constant 0 : index
    %c0_21 = arith.constant 0 : index
    %c0_22 = arith.constant 0 : index
    %c0_23 = arith.constant 0 : index
    %53 = vector.load %arg5[%c0_20, %c0_21, %c0_22, %c0_23] : memref<2x3x1x32xf32, #tpu.memory_space<vmem>>, vector<1x1x1x32xf32>
    %54 = vector.shape_cast %53 : vector<1x1x1x32xf32> to vector<1x32xf32>
    %55 = vector.broadcast %54 : vector<1x32xf32> to vector<16x32xf32>
    %56 = arith.addf %52, %55 : vector<16x32xf32>
    %c0_24 = arith.constant 0 : index
    %c1 = arith.constant 1 : index
    %c0_25 = arith.constant 0 : index
    %c0_26 = arith.constant 0 : index
    %57 = vector.load %arg4[%c0_24, %c1, %c0_25, %c0_26] : memref<2x3x32x32xbf16, #tpu.memory_space<vmem>>, vector<1x1x32x32xbf16>
    %58 = vector.shape_cast %57 : vector<1x1x32x32xbf16> to vector<32x32xbf16>
    %cst_27 = arith.constant dense<0.000000e+00> : vector<16x32xf32>
    %59 = tpu.matmul %49, %58, %cst_27 {dimension_numbers = #tpu.dot_dimension_numbers<[1], [0], [0], [1], [0, 0, 1, 1], [], []>} : vector<16x32xbf16>, vector<32x32xbf16>, vector<16x32xf32> -> vector<16x32xf32>
    %c0_28 = arith.constant 0 : index
    %c1_29 = arith.constant 1 : index
    %c0_30 = arith.constant 0 : index
    %c0_31 = arith.constant 0 : index
    %60 = vector.load %arg5[%c0_28, %c1_29, %c0_30, %c0_31] : memref<2x3x1x32xf32, #tpu.memory_space<vmem>>, vector<1x1x1x32xf32>
    %61 = vector.shape_cast %60 : vector<1x1x1x32xf32> to vector<1x32xf32>
    %62 = vector.broadcast %61 : vector<1x32xf32> to vector<16x32xf32>
    %63 = arith.addf %59, %62 : vector<16x32xf32>
    %c0_32 = arith.constant 0 : index
    %c2 = arith.constant 2 : index
    %c0_33 = arith.constant 0 : index
    %c0_34 = arith.constant 0 : index
    %64 = vector.load %arg4[%c0_32, %c2, %c0_33, %c0_34] : memref<2x3x32x32xbf16, #tpu.memory_space<vmem>>, vector<1x1x32x32xbf16>
    %65 = vector.shape_cast %64 : vector<1x1x32x32xbf16> to vector<32x32xbf16>
    %cst_35 = arith.constant dense<0.000000e+00> : vector<16x32xf32>
    %66 = tpu.matmul %49, %65, %cst_35 {dimension_numbers = #tpu.dot_dimension_numbers<[1], [0], [0], [1], [0, 0, 1, 1], [], []>} : vector<16x32xbf16>, vector<32x32xbf16>, vector<16x32xf32> -> vector<16x32xf32>
    %c0_36 = arith.constant 0 : index
    %c2_37 = arith.constant 2 : index
    %c0_38 = arith.constant 0 : index
    %c0_39 = arith.constant 0 : index
    %67 = vector.load %arg5[%c0_36, %c2_37, %c0_38, %c0_39] : memref<2x3x1x32xf32, #tpu.memory_space<vmem>>, vector<1x1x1x32xf32>
    %68 = vector.shape_cast %67 : vector<1x1x1x32xf32> to vector<1x32xf32>
    %69 = vector.broadcast %68 : vector<1x32xf32> to vector<16x32xf32>
    %70 = arith.addf %66, %69 : vector<16x32xf32>
    %71 = vector.extract_strided_slice %56 {offsets = [0, 0], sizes = [8, 32], strides = [1, 1]} : vector<16x32xf32> to vector<8x32xf32>
    %72 = tpu.transpose %71, [1, 0] : vector<8x32xf32> -> vector<32x8xf32>
    %73 = vector.extract_strided_slice %63 {offsets = [0, 0], sizes = [8, 32], strides = [1, 1]} : vector<16x32xf32> to vector<8x32xf32>
    %74 = tpu.transpose %73, [1, 0] : vector<8x32xf32> -> vector<32x8xf32>
    %75 = vector.extract_strided_slice %70 {offsets = [0, 0], sizes = [8, 32], strides = [1, 1]} : vector<16x32xf32> to vector<8x32xf32>
    %76 = tpu.transpose %75, [1, 0] : vector<8x32xf32> -> vector<32x8xf32>
    %cst_40 = arith.constant 0.000000e+00 : f32
    %77 = vector.broadcast %cst_40 : f32 to vector<8x32xf32>
    %78 = vector.extract_strided_slice %72 {offsets = [0, 0], sizes = [8, 8], strides = [1, 1]} : vector<32x8xf32> to vector<8x8xf32>
    %79 = tpu.transpose %78, [1, 0] : vector<8x8xf32> -> vector<8x8xf32>
    %80 = vector.extract_strided_slice %74 {offsets = [0, 0], sizes = [8, 8], strides = [1, 1]} : vector<32x8xf32> to vector<8x8xf32>
    %81 = vector.extract_strided_slice %76 {offsets = [0, 0], sizes = [8, 8], strides = [1, 1]} : vector<32x8xf32> to vector<8x8xf32>
    %cst_41 = arith.constant dense<0.000000e+00> : vector<8x8xf32>
    %82 = tpu.matmul %79, %80, %cst_41 {dimension_numbers = #tpu.dot_dimension_numbers<[1], [0], [0], [1], [0, 0, 1, 1], [], []>} : vector<8x8xf32>, vector<8x8xf32>, vector<8x8xf32> -> vector<8x8xf32>
    %83 = arith.addf %82, %16 : vector<8x8xf32>
    %cst_42 = arith.constant dense<0xFF800000> : vector<8xf32>
    %84 = vector.multi_reduction <maximumf>, %83, %cst_42 [1] : vector<8x8xf32> to vector<8xf32>
    %85 = vector.shape_cast %84 : vector<8xf32> to vector<8x1xf32>
    %86 = vector.broadcast %85 : vector<8x1xf32> to vector<8x8xf32>
    %87 = arith.subf %83, %86 : vector<8x8xf32>
    %88 = math.exp %87 : vector<8x8xf32>
    %cst_43 = arith.constant dense<0.000000e+00> : vector<8xf32>
    %89 = vector.multi_reduction <add>, %88, %cst_43 [1] : vector<8x8xf32> to vector<8xf32>
    %90 = vector.shape_cast %89 : vector<8xf32> to vector<8x1xf32>
    %91 = tpu.reciprocal %90 : vector<8x1xf32> -> vector<8x1xf32>
    %92 = vector.broadcast %91 : vector<8x1xf32> to vector<8x8xf32>
    %93 = arith.mulf %88, %92 : vector<8x8xf32>
    %cst_44 = arith.constant dense<0.000000e+00> : vector<8x8xf32>
    %94 = tpu.matmul %93, %81, %cst_44 {dimension_numbers = #tpu.dot_dimension_numbers<[1], [1], [0], [0], [0, 0, 1, 0], [], []>} : vector<8x8xf32>, vector<8x8xf32>, vector<8x8xf32> -> vector<8x8xf32>
    %95 = arith.truncf %94 : vector<8x8xf32> to vector<8x8xbf16>
    %c0_45 = arith.constant 0 : index
    %c0_46 = arith.constant 0 : index
    %c0_47 = arith.constant 0 : index
    %c0_48 = arith.constant 0 : index
    %96 = vector.load %arg6[%c0_45, %c0_46, %c0_47, %c0_48] : memref<2x4x8x32xbf16, #tpu.memory_space<vmem>>, vector<1x1x8x32xbf16>
    %97 = vector.shape_cast %96 : vector<1x1x8x32xbf16> to vector<8x32xbf16>
    %cst_49 = arith.constant dense<0.000000e+00> : vector<8x32xf32>
    %98 = tpu.matmul %95, %97, %cst_49 {dimension_numbers = #tpu.dot_dimension_numbers<[1], [0], [0], [1], [0, 0, 1, 1], [], []>} : vector<8x8xbf16>, vector<8x32xbf16>, vector<8x32xf32> -> vector<8x32xf32>
    %99 = arith.addf %77, %98 : vector<8x32xf32>
    %100 = vector.extract_strided_slice %72 {offsets = [8, 0], sizes = [8, 8], strides = [1, 1]} : vector<32x8xf32> to vector<8x8xf32>
    %101 = tpu.transpose %100, [1, 0] : vector<8x8xf32> -> vector<8x8xf32>
    %102 = vector.extract_strided_slice %74 {offsets = [8, 0], sizes = [8, 8], strides = [1, 1]} : vector<32x8xf32> to vector<8x8xf32>
    %103 = vector.extract_strided_slice %76 {offsets = [8, 0], sizes = [8, 8], strides = [1, 1]} : vector<32x8xf32> to vector<8x8xf32>
    %cst_50 = arith.constant dense<0.000000e+00> : vector<8x8xf32>
    %104 = tpu.matmul %101, %102, %cst_50 {dimension_numbers = #tpu.dot_dimension_numbers<[1], [0], [0], [1], [0, 0, 1, 1], [], []>} : vector<8x8xf32>, vector<8x8xf32>, vector<8x8xf32> -> vector<8x8xf32>
    %105 = arith.addf %104, %16 : vector<8x8xf32>
    %cst_51 = arith.constant dense<0xFF800000> : vector<8xf32>
    %106 = vector.multi_reduction <maximumf>, %105, %cst_51 [1] : vector<8x8xf32> to vector<8xf32>
    %107 = vector.shape_cast %106 : vector<8xf32> to vector<8x1xf32>
    %108 = vector.broadcast %107 : vector<8x1xf32> to vector<8x8xf32>
    %109 = arith.subf %105, %108 : vector<8x8xf32>
    %110 = math.exp %109 : vector<8x8xf32>
    %cst_52 = arith.constant dense<0.000000e+00> : vector<8xf32>
    %111 = vector.multi_reduction <add>, %110, %cst_52 [1] : vector<8x8xf32> to vector<8xf32>
    %112 = vector.shape_cast %111 : vector<8xf32> to vector<8x1xf32>
    %113 = tpu.reciprocal %112 : vector<8x1xf32> -> vector<8x1xf32>
    %114 = vector.broadcast %113 : vector<8x1xf32> to vector<8x8xf32>
    %115 = arith.mulf %110, %114 : vector<8x8xf32>
    %cst_53 = arith.constant dense<0.000000e+00> : vector<8x8xf32>
    %116 = tpu.matmul %115, %103, %cst_53 {dimension_numbers = #tpu.dot_dimension_numbers<[1], [1], [0], [0], [0, 0, 1, 0], [], []>} : vector<8x8xf32>, vector<8x8xf32>, vector<8x8xf32> -> vector<8x8xf32>
    %117 = arith.truncf %116 : vector<8x8xf32> to vector<8x8xbf16>
    %c0_54 = arith.constant 0 : index
    %c1_55 = arith.constant 1 : index
    %c0_56 = arith.constant 0 : index
    %c0_57 = arith.constant 0 : index
    %118 = vector.load %arg6[%c0_54, %c1_55, %c0_56, %c0_57] : memref<2x4x8x32xbf16, #tpu.memory_space<vmem>>, vector<1x1x8x32xbf16>
    %119 = vector.shape_cast %118 : vector<1x1x8x32xbf16> to vector<8x32xbf16>
    %cst_58 = arith.constant dense<0.000000e+00> : vector<8x32xf32>
    %120 = tpu.matmul %117, %119, %cst_58 {dimension_numbers = #tpu.dot_dimension_numbers<[1], [0], [0], [1], [0, 0, 1, 1], [], []>} : vector<8x8xbf16>, vector<8x32xbf16>, vector<8x32xf32> -> vector<8x32xf32>
    %121 = arith.addf %99, %120 : vector<8x32xf32>
    %122 = vector.extract_strided_slice %72 {offsets = [16, 0], sizes = [8, 8], strides = [1, 1]} : vector<32x8xf32> to vector<8x8xf32>
    %123 = tpu.transpose %122, [1, 0] : vector<8x8xf32> -> vector<8x8xf32>
    %124 = vector.extract_strided_slice %74 {offsets = [16, 0], sizes = [8, 8], strides = [1, 1]} : vector<32x8xf32> to vector<8x8xf32>
    %125 = vector.extract_strided_slice %76 {offsets = [16, 0], sizes = [8, 8], strides = [1, 1]} : vector<32x8xf32> to vector<8x8xf32>
    %cst_59 = arith.constant dense<0.000000e+00> : vector<8x8xf32>
    %126 = tpu.matmul %123, %124, %cst_59 {dimension_numbers = #tpu.dot_dimension_numbers<[1], [0], [0], [1], [0, 0, 1, 1], [], []>} : vector<8x8xf32>, vector<8x8xf32>, vector<8x8xf32> -> vector<8x8xf32>
    %127 = arith.addf %126, %16 : vector<8x8xf32>
    %cst_60 = arith.constant dense<0xFF800000> : vector<8xf32>
    %128 = vector.multi_reduction <maximumf>, %127, %cst_60 [1] : vector<8x8xf32> to vector<8xf32>
    %129 = vector.shape_cast %128 : vector<8xf32> to vector<8x1xf32>
    %130 = vector.broadcast %129 : vector<8x1xf32> to vector<8x8xf32>
    %131 = arith.subf %127, %130 : vector<8x8xf32>
    %132 = math.exp %131 : vector<8x8xf32>
    %cst_61 = arith.constant dense<0.000000e+00> : vector<8xf32>
    %133 = vector.multi_reduction <add>, %132, %cst_61 [1] : vector<8x8xf32> to vector<8xf32>
    %134 = vector.shape_cast %133 : vector<8xf32> to vector<8x1xf32>
    %135 = tpu.reciprocal %134 : vector<8x1xf32> -> vector<8x1xf32>
    %136 = vector.broadcast %135 : vector<8x1xf32> to vector<8x8xf32>
    %137 = arith.mulf %132, %136 : vector<8x8xf32>
    %cst_62 = arith.constant dense<0.000000e+00> : vector<8x8xf32>
    %138 = tpu.matmul %137, %125, %cst_62 {dimension_numbers = #tpu.dot_dimension_numbers<[1], [1], [0], [0], [0, 0, 1, 0], [], []>} : vector<8x8xf32>, vector<8x8xf32>, vector<8x8xf32> -> vector<8x8xf32>
    %139 = arith.truncf %138 : vector<8x8xf32> to vector<8x8xbf16>
    %c0_63 = arith.constant 0 : index
    %c2_64 = arith.constant 2 : index
    %c0_65 = arith.constant 0 : index
    %c0_66 = arith.constant 0 : index
    %140 = vector.load %arg6[%c0_63, %c2_64, %c0_65, %c0_66] : memref<2x4x8x32xbf16, #tpu.memory_space<vmem>>, vector<1x1x8x32xbf16>
    %141 = vector.shape_cast %140 : vector<1x1x8x32xbf16> to vector<8x32xbf16>
    %cst_67 = arith.constant dense<0.000000e+00> : vector<8x32xf32>
    %142 = tpu.matmul %139, %141, %cst_67 {dimension_numbers = #tpu.dot_dimension_numbers<[1], [0], [0], [1], [0, 0, 1, 1], [], []>} : vector<8x8xbf16>, vector<8x32xbf16>, vector<8x32xf32> -> vector<8x32xf32>
    %143 = arith.addf %121, %142 : vector<8x32xf32>
    %144 = vector.extract_strided_slice %72 {offsets = [24, 0], sizes = [8, 8], strides = [1, 1]} : vector<32x8xf32> to vector<8x8xf32>
    %145 = tpu.transpose %144, [1, 0] : vector<8x8xf32> -> vector<8x8xf32>
    %146 = vector.extract_strided_slice %74 {offsets = [24, 0], sizes = [8, 8], strides = [1, 1]} : vector<32x8xf32> to vector<8x8xf32>
    %147 = vector.extract_strided_slice %76 {offsets = [24, 0], sizes = [8, 8], strides = [1, 1]} : vector<32x8xf32> to vector<8x8xf32>
    %cst_68 = arith.constant dense<0.000000e+00> : vector<8x8xf32>
    %148 = tpu.matmul %145, %146, %cst_68 {dimension_numbers = #tpu.dot_dimension_numbers<[1], [0], [0], [1], [0, 0, 1, 1], [], []>} : vector<8x8xf32>, vector<8x8xf32>, vector<8x8xf32> -> vector<8x8xf32>
    %149 = arith.addf %148, %16 : vector<8x8xf32>
    %cst_69 = arith.constant dense<0xFF800000> : vector<8xf32>
    %150 = vector.multi_reduction <maximumf>, %149, %cst_69 [1] : vector<8x8xf32> to vector<8xf32>
    %151 = vector.shape_cast %150 : vector<8xf32> to vector<8x1xf32>
    %152 = vector.broadcast %151 : vector<8x1xf32> to vector<8x8xf32>
    %153 = arith.subf %149, %152 : vector<8x8xf32>
    %154 = math.exp %153 : vector<8x8xf32>
    %cst_70 = arith.constant dense<0.000000e+00> : vector<8xf32>
    %155 = vector.multi_reduction <add>, %154, %cst_70 [1] : vector<8x8xf32> to vector<8xf32>
    %156 = vector.shape_cast %155 : vector<8xf32> to vector<8x1xf32>
    %157 = tpu.reciprocal %156 : vector<8x1xf32> -> vector<8x1xf32>
    %158 = vector.broadcast %157 : vector<8x1xf32> to vector<8x8xf32>
    %159 = arith.mulf %154, %158 : vector<8x8xf32>
    %cst_71 = arith.constant dense<0.000000e+00> : vector<8x8xf32>
    %160 = tpu.matmul %159, %147, %cst_71 {dimension_numbers = #tpu.dot_dimension_numbers<[1], [1], [0], [0], [0, 0, 1, 0], [], []>} : vector<8x8xf32>, vector<8x8xf32>, vector<8x8xf32> -> vector<8x8xf32>
    %161 = arith.truncf %160 : vector<8x8xf32> to vector<8x8xbf16>
    %c0_72 = arith.constant 0 : index
    %c3 = arith.constant 3 : index
    %c0_73 = arith.constant 0 : index
    %c0_74 = arith.constant 0 : index
    %162 = vector.load %arg6[%c0_72, %c3, %c0_73, %c0_74] : memref<2x4x8x32xbf16, #tpu.memory_space<vmem>>, vector<1x1x8x32xbf16>
    %163 = vector.shape_cast %162 : vector<1x1x8x32xbf16> to vector<8x32xbf16>
    %cst_75 = arith.constant dense<0.000000e+00> : vector<8x32xf32>
    %164 = tpu.matmul %161, %163, %cst_75 {dimension_numbers = #tpu.dot_dimension_numbers<[1], [0], [0], [1], [0, 0, 1, 1], [], []>} : vector<8x8xbf16>, vector<8x32xbf16>, vector<8x32xf32> -> vector<8x32xf32>
    %165 = arith.addf %143, %164 : vector<8x32xf32>
    %166 = vector.extract_strided_slice %56 {offsets = [8, 0], sizes = [8, 32], strides = [1, 1]} : vector<16x32xf32> to vector<8x32xf32>
    %167 = tpu.transpose %166, [1, 0] : vector<8x32xf32> -> vector<32x8xf32>
    %168 = vector.extract_strided_slice %63 {offsets = [8, 0], sizes = [8, 32], strides = [1, 1]} : vector<16x32xf32> to vector<8x32xf32>
    %169 = tpu.transpose %168, [1, 0] : vector<8x32xf32> -> vector<32x8xf32>
    %170 = vector.extract_strided_slice %70 {offsets = [8, 0], sizes = [8, 32], strides = [1, 1]} : vector<16x32xf32> to vector<8x32xf32>
    %171 = tpu.transpose %170, [1, 0] : vector<8x32xf32> -> vector<32x8xf32>
    %cst_76 = arith.constant 0.000000e+00 : f32
    %172 = vector.broadcast %cst_76 : f32 to vector<8x32xf32>
    %173 = vector.extract_strided_slice %167 {offsets = [0, 0], sizes = [8, 8], strides = [1, 1]} : vector<32x8xf32> to vector<8x8xf32>
    %174 = tpu.transpose %173, [1, 0] : vector<8x8xf32> -> vector<8x8xf32>
    %175 = vector.extract_strided_slice %169 {offsets = [0, 0], sizes = [8, 8], strides = [1, 1]} : vector<32x8xf32> to vector<8x8xf32>
    %176 = vector.extract_strided_slice %171 {offsets = [0, 0], sizes = [8, 8], strides = [1, 1]} : vector<32x8xf32> to vector<8x8xf32>
    %cst_77 = arith.constant dense<0.000000e+00> : vector<8x8xf32>
    %177 = tpu.matmul %174, %175, %cst_77 {dimension_numbers = #tpu.dot_dimension_numbers<[1], [0], [0], [1], [0, 0, 1, 1], [], []>} : vector<8x8xf32>, vector<8x8xf32>, vector<8x8xf32> -> vector<8x8xf32>
    %178 = arith.addf %177, %22 : vector<8x8xf32>
    %cst_78 = arith.constant dense<0xFF800000> : vector<8xf32>
    %179 = vector.multi_reduction <maximumf>, %178, %cst_78 [1] : vector<8x8xf32> to vector<8xf32>
    %180 = vector.shape_cast %179 : vector<8xf32> to vector<8x1xf32>
    %181 = vector.broadcast %180 : vector<8x1xf32> to vector<8x8xf32>
    %182 = arith.subf %178, %181 : vector<8x8xf32>
    %183 = math.exp %182 : vector<8x8xf32>
    %cst_79 = arith.constant dense<0.000000e+00> : vector<8xf32>
    %184 = vector.multi_reduction <add>, %183, %cst_79 [1] : vector<8x8xf32> to vector<8xf32>
    %185 = vector.shape_cast %184 : vector<8xf32> to vector<8x1xf32>
    %186 = tpu.reciprocal %185 : vector<8x1xf32> -> vector<8x1xf32>
    %187 = vector.broadcast %186 : vector<8x1xf32> to vector<8x8xf32>
    %188 = arith.mulf %183, %187 : vector<8x8xf32>
    %cst_80 = arith.constant dense<0.000000e+00> : vector<8x8xf32>
    %189 = tpu.matmul %188, %176, %cst_80 {dimension_numbers = #tpu.dot_dimension_numbers<[1], [1], [0], [0], [0, 0, 1, 0], [], []>} : vector<8x8xf32>, vector<8x8xf32>, vector<8x8xf32> -> vector<8x8xf32>
    %190 = arith.truncf %189 : vector<8x8xf32> to vector<8x8xbf16>
    %c0_81 = arith.constant 0 : index
    %c0_82 = arith.constant 0 : index
    %c0_83 = arith.constant 0 : index
    %c0_84 = arith.constant 0 : index
    %191 = vector.load %arg6[%c0_81, %c0_82, %c0_83, %c0_84] : memref<2x4x8x32xbf16, #tpu.memory_space<vmem>>, vector<1x1x8x32xbf16>
    %192 = vector.shape_cast %191 : vector<1x1x8x32xbf16> to vector<8x32xbf16>
    %cst_85 = arith.constant dense<0.000000e+00> : vector<8x32xf32>
    %193 = tpu.matmul %190, %192, %cst_85 {dimension_numbers = #tpu.dot_dimension_numbers<[1], [0], [0], [1], [0, 0, 1, 1], [], []>} : vector<8x8xbf16>, vector<8x32xbf16>, vector<8x32xf32> -> vector<8x32xf32>
    %194 = arith.addf %172, %193 : vector<8x32xf32>
    %195 = vector.extract_strided_slice %167 {offsets = [8, 0], sizes = [8, 8], strides = [1, 1]} : vector<32x8xf32> to vector<8x8xf32>
    %196 = tpu.transpose %195, [1, 0] : vector<8x8xf32> -> vector<8x8xf32>
    %197 = vector.extract_strided_slice %169 {offsets = [8, 0], sizes = [8, 8], strides = [1, 1]} : vector<32x8xf32> to vector<8x8xf32>
    %198 = vector.extract_strided_slice %171 {offsets = [8, 0], sizes = [8, 8], strides = [1, 1]} : vector<32x8xf32> to vector<8x8xf32>
    %cst_86 = arith.constant dense<0.000000e+00> : vector<8x8xf32>
    %199 = tpu.matmul %196, %197, %cst_86 {dimension_numbers = #tpu.dot_dimension_numbers<[1], [0], [0], [1], [0, 0, 1, 1], [], []>} : vector<8x8xf32>, vector<8x8xf32>, vector<8x8xf32> -> vector<8x8xf32>
    %200 = arith.addf %199, %22 : vector<8x8xf32>
    %cst_87 = arith.constant dense<0xFF800000> : vector<8xf32>
    %201 = vector.multi_reduction <maximumf>, %200, %cst_87 [1] : vector<8x8xf32> to vector<8xf32>
    %202 = vector.shape_cast %201 : vector<8xf32> to vector<8x1xf32>
    %203 = vector.broadcast %202 : vector<8x1xf32> to vector<8x8xf32>
    %204 = arith.subf %200, %203 : vector<8x8xf32>
    %205 = math.exp %204 : vector<8x8xf32>
    %cst_88 = arith.constant dense<0.000000e+00> : vector<8xf32>
    %206 = vector.multi_reduction <add>, %205, %cst_88 [1] : vector<8x8xf32> to vector<8xf32>
    %207 = vector.shape_cast %206 : vector<8xf32> to vector<8x1xf32>
    %208 = tpu.reciprocal %207 : vector<8x1xf32> -> vector<8x1xf32>
    %209 = vector.broadcast %208 : vector<8x1xf32> to vector<8x8xf32>
    %210 = arith.mulf %205, %209 : vector<8x8xf32>
    %cst_89 = arith.constant dense<0.000000e+00> : vector<8x8xf32>
    %211 = tpu.matmul %210, %198, %cst_89 {dimension_numbers = #tpu.dot_dimension_numbers<[1], [1], [0], [0], [0, 0, 1, 0], [], []>} : vector<8x8xf32>, vector<8x8xf32>, vector<8x8xf32> -> vector<8x8xf32>
    %212 = arith.truncf %211 : vector<8x8xf32> to vector<8x8xbf16>
    %c0_90 = arith.constant 0 : index
    %c1_91 = arith.constant 1 : index
    %c0_92 = arith.constant 0 : index
    %c0_93 = arith.constant 0 : index
    %213 = vector.load %arg6[%c0_90, %c1_91, %c0_92, %c0_93] : memref<2x4x8x32xbf16, #tpu.memory_space<vmem>>, vector<1x1x8x32xbf16>
    %214 = vector.shape_cast %213 : vector<1x1x8x32xbf16> to vector<8x32xbf16>
    %cst_94 = arith.constant dense<0.000000e+00> : vector<8x32xf32>
    %215 = tpu.matmul %212, %214, %cst_94 {dimension_numbers = #tpu.dot_dimension_numbers<[1], [0], [0], [1], [0, 0, 1, 1], [], []>} : vector<8x8xbf16>, vector<8x32xbf16>, vector<8x32xf32> -> vector<8x32xf32>
    %216 = arith.addf %194, %215 : vector<8x32xf32>
    %217 = vector.extract_strided_slice %167 {offsets = [16, 0], sizes = [8, 8], strides = [1, 1]} : vector<32x8xf32> to vector<8x8xf32>
    %218 = tpu.transpose %217, [1, 0] : vector<8x8xf32> -> vector<8x8xf32>
    %219 = vector.extract_strided_slice %169 {offsets = [16, 0], sizes = [8, 8], strides = [1, 1]} : vector<32x8xf32> to vector<8x8xf32>
    %220 = vector.extract_strided_slice %171 {offsets = [16, 0], sizes = [8, 8], strides = [1, 1]} : vector<32x8xf32> to vector<8x8xf32>
    %cst_95 = arith.constant dense<0.000000e+00> : vector<8x8xf32>
    %221 = tpu.matmul %218, %219, %cst_95 {dimension_numbers = #tpu.dot_dimension_numbers<[1], [0], [0], [1], [0, 0, 1, 1], [], []>} : vector<8x8xf32>, vector<8x8xf32>, vector<8x8xf32> -> vector<8x8xf32>
    %222 = arith.addf %221, %22 : vector<8x8xf32>
    %cst_96 = arith.constant dense<0xFF800000> : vector<8xf32>
    %223 = vector.multi_reduction <maximumf>, %222, %cst_96 [1] : vector<8x8xf32> to vector<8xf32>
    %224 = vector.shape_cast %223 : vector<8xf32> to vector<8x1xf32>
    %225 = vector.broadcast %224 : vector<8x1xf32> to vector<8x8xf32>
    %226 = arith.subf %222, %225 : vector<8x8xf32>
    %227 = math.exp %226 : vector<8x8xf32>
    %cst_97 = arith.constant dense<0.000000e+00> : vector<8xf32>
    %228 = vector.multi_reduction <add>, %227, %cst_97 [1] : vector<8x8xf32> to vector<8xf32>
    %229 = vector.shape_cast %228 : vector<8xf32> to vector<8x1xf32>
    %230 = tpu.reciprocal %229 : vector<8x1xf32> -> vector<8x1xf32>
    %231 = vector.broadcast %230 : vector<8x1xf32> to vector<8x8xf32>
    %232 = arith.mulf %227, %231 : vector<8x8xf32>
    %cst_98 = arith.constant dense<0.000000e+00> : vector<8x8xf32>
    %233 = tpu.matmul %232, %220, %cst_98 {dimension_numbers = #tpu.dot_dimension_numbers<[1], [1], [0], [0], [0, 0, 1, 0], [], []>} : vector<8x8xf32>, vector<8x8xf32>, vector<8x8xf32> -> vector<8x8xf32>
    %234 = arith.truncf %233 : vector<8x8xf32> to vector<8x8xbf16>
    %c0_99 = arith.constant 0 : index
    %c2_100 = arith.constant 2 : index
    %c0_101 = arith.constant 0 : index
    %c0_102 = arith.constant 0 : index
    %235 = vector.load %arg6[%c0_99, %c2_100, %c0_101, %c0_102] : memref<2x4x8x32xbf16, #tpu.memory_space<vmem>>, vector<1x1x8x32xbf16>
    %236 = vector.shape_cast %235 : vector<1x1x8x32xbf16> to vector<8x32xbf16>
    %cst_103 = arith.constant dense<0.000000e+00> : vector<8x32xf32>
    %237 = tpu.matmul %234, %236, %cst_103 {dimension_numbers = #tpu.dot_dimension_numbers<[1], [0], [0], [1], [0, 0, 1, 1], [], []>} : vector<8x8xbf16>, vector<8x32xbf16>, vector<8x32xf32> -> vector<8x32xf32>
    %238 = arith.addf %216, %237 : vector<8x32xf32>
    %239 = vector.extract_strided_slice %167 {offsets = [24, 0], sizes = [8, 8], strides = [1, 1]} : vector<32x8xf32> to vector<8x8xf32>
    %240 = tpu.transpose %239, [1, 0] : vector<8x8xf32> -> vector<8x8xf32>
    %241 = vector.extract_strided_slice %169 {offsets = [24, 0], sizes = [8, 8], strides = [1, 1]} : vector<32x8xf32> to vector<8x8xf32>
    %242 = vector.extract_strided_slice %171 {offsets = [24, 0], sizes = [8, 8], strides = [1, 1]} : vector<32x8xf32> to vector<8x8xf32>
    %cst_104 = arith.constant dense<0.000000e+00> : vector<8x8xf32>
    %243 = tpu.matmul %240, %241, %cst_104 {dimension_numbers = #tpu.dot_dimension_numbers<[1], [0], [0], [1], [0, 0, 1, 1], [], []>} : vector<8x8xf32>, vector<8x8xf32>, vector<8x8xf32> -> vector<8x8xf32>
    %244 = arith.addf %243, %22 : vector<8x8xf32>
    %cst_105 = arith.constant dense<0xFF800000> : vector<8xf32>
    %245 = vector.multi_reduction <maximumf>, %244, %cst_105 [1] : vector<8x8xf32> to vector<8xf32>
    %246 = vector.shape_cast %245 : vector<8xf32> to vector<8x1xf32>
    %247 = vector.broadcast %246 : vector<8x1xf32> to vector<8x8xf32>
    %248 = arith.subf %244, %247 : vector<8x8xf32>
    %249 = math.exp %248 : vector<8x8xf32>
    %cst_106 = arith.constant dense<0.000000e+00> : vector<8xf32>
    %250 = vector.multi_reduction <add>, %249, %cst_106 [1] : vector<8x8xf32> to vector<8xf32>
    %251 = vector.shape_cast %250 : vector<8xf32> to vector<8x1xf32>
    %252 = tpu.reciprocal %251 : vector<8x1xf32> -> vector<8x1xf32>
    %253 = vector.broadcast %252 : vector<8x1xf32> to vector<8x8xf32>
    %254 = arith.mulf %249, %253 : vector<8x8xf32>
    %cst_107 = arith.constant dense<0.000000e+00> : vector<8x8xf32>
    %255 = tpu.matmul %254, %242, %cst_107 {dimension_numbers = #tpu.dot_dimension_numbers<[1], [1], [0], [0], [0, 0, 1, 0], [], []>} : vector<8x8xf32>, vector<8x8xf32>, vector<8x8xf32> -> vector<8x8xf32>
    %256 = arith.truncf %255 : vector<8x8xf32> to vector<8x8xbf16>
    %c0_108 = arith.constant 0 : index
    %c3_109 = arith.constant 3 : index
    %c0_110 = arith.constant 0 : index
    %c0_111 = arith.constant 0 : index
    %257 = vector.load %arg6[%c0_108, %c3_109, %c0_110, %c0_111] : memref<2x4x8x32xbf16, #tpu.memory_space<vmem>>, vector<1x1x8x32xbf16>
    %258 = vector.shape_cast %257 : vector<1x1x8x32xbf16> to vector<8x32xbf16>
    %cst_112 = arith.constant dense<0.000000e+00> : vector<8x32xf32>
    %259 = tpu.matmul %256, %258, %cst_112 {dimension_numbers = #tpu.dot_dimension_numbers<[1], [0], [0], [1], [0, 0, 1, 1], [], []>} : vector<8x8xbf16>, vector<8x32xbf16>, vector<8x32xf32> -> vector<8x32xf32>
    %260 = arith.addf %238, %259 : vector<8x32xf32>
    %261 = tpu.concatenate %165, %260 in 0 : vector<8x32xf32>, vector<8x32xf32> -> vector<16x32xf32>
    %262 = arith.addf %0, %261 : vector<16x32xf32>
    %c0_113 = arith.constant 0 : index
    %c0_114 = arith.constant 0 : index
    %c0_115 = arith.constant 0 : index
    %263 = vector.load %arg7[%c0_113, %c0_114, %c0_115] : memref<2x1x32xf32, #tpu.memory_space<vmem>>, vector<1x1x32xf32>
    %264 = vector.shape_cast %263 : vector<1x1x32xf32> to vector<1x32xf32>
    %265 = vector.broadcast %264 : vector<1x32xf32> to vector<16x32xf32>
    %266 = arith.addf %262, %265 : vector<16x32xf32>
    %c0_116 = arith.constant 0 : index
    %c0_117 = arith.constant 0 : index
    %c0_118 = arith.constant 0 : index
    %267 = vector.load %arg8[%c0_116, %c0_117, %c0_118] : memref<2x1x32xf32, #tpu.memory_space<vmem>>, vector<1x1x32xf32>
    %268 = vector.shape_cast %267 : vector<1x1x32xf32> to vector<1x32xf32>
    %c0_119 = arith.constant 0 : index
    %c0_120 = arith.constant 0 : index
    %c0_121 = arith.constant 0 : index
    %269 = vector.load %arg9[%c0_119, %c0_120, %c0_121] : memref<2x1x32xf32, #tpu.memory_space<vmem>>, vector<1x1x32xf32>
    %270 = vector.shape_cast %269 : vector<1x1x32xf32> to vector<1x32xf32>
    %cst_122 = arith.constant dense<0.000000e+00> : vector<16xf32>
    %271 = vector.multi_reduction <add>, %266, %cst_122 [1] : vector<16x32xf32> to vector<16xf32>
    %272 = vector.shape_cast %271 : vector<16xf32> to vector<16x1xf32>
    %cst_123 = arith.constant 3.200000e+01 : f32
    %273 = vector.broadcast %cst_123 : f32 to vector<16x1xf32>
    %274 = arith.divf %272, %273 : vector<16x1xf32>
    %275 = vector.broadcast %274 : vector<16x1xf32> to vector<16x32xf32>
    %276 = arith.subf %266, %275 : vector<16x32xf32>
    %277 = arith.mulf %276, %276 : vector<16x32xf32>
    %cst_124 = arith.constant dense<0.000000e+00> : vector<16xf32>
    %278 = vector.multi_reduction <add>, %277, %cst_124 [1] : vector<16x32xf32> to vector<16xf32>
    %279 = vector.shape_cast %278 : vector<16xf32> to vector<16x1xf32>
    %cst_125 = arith.constant 3.200000e+01 : f32
    %280 = vector.broadcast %cst_125 : f32 to vector<16x1xf32>
    %281 = arith.divf %279, %280 : vector<16x1xf32>
    %282 = vector.broadcast %274 : vector<16x1xf32> to vector<16x32xf32>
    %283 = arith.subf %266, %282 : vector<16x32xf32>
    %cst_126 = arith.constant 9.99999974E-6 : f32
    %284 = vector.broadcast %cst_126 : f32 to vector<16x1xf32>
    %285 = arith.addf %281, %284 : vector<16x1xf32>
    %286 = math.rsqrt %285 : vector<16x1xf32>
    %287 = vector.broadcast %286 : vector<16x1xf32> to vector<16x32xf32>
    %288 = arith.mulf %283, %287 : vector<16x32xf32>
    %289 = vector.broadcast %268 : vector<1x32xf32> to vector<16x32xf32>
    %290 = arith.mulf %288, %289 : vector<16x32xf32>
    %291 = vector.broadcast %270 : vector<1x32xf32> to vector<16x32xf32>
    %292 = arith.addf %290, %291 : vector<16x32xf32>
    %293 = arith.truncf %292 : vector<16x32xf32> to vector<16x32xbf16>
    %c0_127 = arith.constant 0 : index
    %c0_128 = arith.constant 0 : index
    %c0_129 = arith.constant 0 : index
    %294 = vector.load %arg10[%c0_127, %c0_128, %c0_129] : memref<2x32x128xbf16, #tpu.memory_space<vmem>>, vector<1x32x128xbf16>
    %295 = vector.shape_cast %294 : vector<1x32x128xbf16> to vector<32x128xbf16>
    %cst_130 = arith.constant dense<0.000000e+00> : vector<16x128xf32>
    %296 = tpu.matmul %293, %295, %cst_130 {dimension_numbers = #tpu.dot_dimension_numbers<[1], [0], [0], [1], [0, 0, 1, 1], [], []>} : vector<16x32xbf16>, vector<32x128xbf16>, vector<16x128xf32> -> vector<16x128xf32>
    %c0_131 = arith.constant 0 : index
    %c0_132 = arith.constant 0 : index
    %c0_133 = arith.constant 0 : index
    %297 = vector.load %arg11[%c0_131, %c0_132, %c0_133] : memref<2x1x128xf32, #tpu.memory_space<vmem>>, vector<1x1x128xf32>
    %298 = vector.shape_cast %297 : vector<1x1x128xf32> to vector<1x128xf32>
    %299 = vector.broadcast %298 : vector<1x128xf32> to vector<16x128xf32>
    %300 = arith.addf %296, %299 : vector<16x128xf32>
    %301 = arith.negf %300 : vector<16x128xf32>
    %302 = math.exp %301 : vector<16x128xf32>
    %cst_134 = arith.constant 1.000000e+00 : f32
    %303 = vector.broadcast %cst_134 : f32 to vector<16x128xf32>
    %304 = arith.addf %303, %302 : vector<16x128xf32>
    %305 = arith.divf %303, %304 : vector<16x128xf32>
    %306 = arith.mulf %300, %305 : vector<16x128xf32>
    %307 = arith.truncf %306 : vector<16x128xf32> to vector<16x128xbf16>
    %c0_135 = arith.constant 0 : index
    %c0_136 = arith.constant 0 : index
    %c0_137 = arith.constant 0 : index
    %308 = vector.load %arg12[%c0_135, %c0_136, %c0_137] : memref<2x128x32xbf16, #tpu.memory_space<vmem>>, vector<1x128x32xbf16>
    %309 = vector.shape_cast %308 : vector<1x128x32xbf16> to vector<128x32xbf16>
    %cst_138 = arith.constant dense<0.000000e+00> : vector<16x32xf32>
    %310 = tpu.matmul %307, %309, %cst_138 {dimension_numbers = #tpu.dot_dimension_numbers<[1], [0], [0], [1], [0, 0, 1, 1], [], []>} : vector<16x128xbf16>, vector<128x32xbf16>, vector<16x32xf32> -> vector<16x32xf32>
    %c0_139 = arith.constant 0 : index
    %c0_140 = arith.constant 0 : index
    %c0_141 = arith.constant 0 : index
    %311 = vector.load %arg13[%c0_139, %c0_140, %c0_141] : memref<2x1x32xf32, #tpu.memory_space<vmem>>, vector<1x1x32xf32>
    %312 = vector.shape_cast %311 : vector<1x1x32xf32> to vector<1x32xf32>
    %313 = vector.broadcast %312 : vector<1x32xf32> to vector<16x32xf32>
    %314 = arith.addf %310, %313 : vector<16x32xf32>
    %315 = arith.addf %266, %314 : vector<16x32xf32>
    %c1_142 = arith.constant 1 : index
    %c0_143 = arith.constant 0 : index
    %c0_144 = arith.constant 0 : index
    %316 = vector.load %arg2[%c1_142, %c0_143, %c0_144] : memref<2x1x32xf32, #tpu.memory_space<vmem>>, vector<1x1x32xf32>
    %317 = vector.shape_cast %316 : vector<1x1x32xf32> to vector<1x32xf32>
    %c1_145 = arith.constant 1 : index
    %c0_146 = arith.constant 0 : index
    %c0_147 = arith.constant 0 : index
    %318 = vector.load %arg3[%c1_145, %c0_146, %c0_147] : memref<2x1x32xf32, #tpu.memory_space<vmem>>, vector<1x1x32xf32>
    %319 = vector.shape_cast %318 : vector<1x1x32xf32> to vector<1x32xf32>
    %cst_148 = arith.constant dense<0.000000e+00> : vector<16xf32>
    %320 = vector.multi_reduction <add>, %315, %cst_148 [1] : vector<16x32xf32> to vector<16xf32>
    %321 = vector.shape_cast %320 : vector<16xf32> to vector<16x1xf32>
    %cst_149 = arith.constant 3.200000e+01 : f32
    %322 = vector.broadcast %cst_149 : f32 to vector<16x1xf32>
    %323 = arith.divf %321, %322 : vector<16x1xf32>
    %324 = vector.broadcast %323 : vector<16x1xf32> to vector<16x32xf32>
    %325 = arith.subf %315, %324 : vector<16x32xf32>
    %326 = arith.mulf %325, %325 : vector<16x32xf32>
    %cst_150 = arith.constant dense<0.000000e+00> : vector<16xf32>
    %327 = vector.multi_reduction <add>, %326, %cst_150 [1] : vector<16x32xf32> to vector<16xf32>
    %328 = vector.shape_cast %327 : vector<16xf32> to vector<16x1xf32>
    %cst_151 = arith.constant 3.200000e+01 : f32
    %329 = vector.broadcast %cst_151 : f32 to vector<16x1xf32>
    %330 = arith.divf %328, %329 : vector<16x1xf32>
    %331 = vector.broadcast %323 : vector<16x1xf32> to vector<16x32xf32>
    %332 = arith.subf %315, %331 : vector<16x32xf32>
    %cst_152 = arith.constant 9.99999974E-6 : f32
    %333 = vector.broadcast %cst_152 : f32 to vector<16x1xf32>
    %334 = arith.addf %330, %333 : vector<16x1xf32>
    %335 = math.rsqrt %334 : vector<16x1xf32>
    %336 = vector.broadcast %335 : vector<16x1xf32> to vector<16x32xf32>
    %337 = arith.mulf %332, %336 : vector<16x32xf32>
    %338 = vector.broadcast %317 : vector<1x32xf32> to vector<16x32xf32>
    %339 = arith.mulf %337, %338 : vector<16x32xf32>
    %340 = vector.broadcast %319 : vector<1x32xf32> to vector<16x32xf32>
    %341 = arith.addf %339, %340 : vector<16x32xf32>
    %342 = arith.truncf %341 : vector<16x32xf32> to vector<16x32xbf16>
    %c1_153 = arith.constant 1 : index
    %c0_154 = arith.constant 0 : index
    %c0_155 = arith.constant 0 : index
    %c0_156 = arith.constant 0 : index
    %343 = vector.load %arg4[%c1_153, %c0_154, %c0_155, %c0_156] : memref<2x3x32x32xbf16, #tpu.memory_space<vmem>>, vector<1x1x32x32xbf16>
    %344 = vector.shape_cast %343 : vector<1x1x32x32xbf16> to vector<32x32xbf16>
    %cst_157 = arith.constant dense<0.000000e+00> : vector<16x32xf32>
    %345 = tpu.matmul %342, %344, %cst_157 {dimension_numbers = #tpu.dot_dimension_numbers<[1], [0], [0], [1], [0, 0, 1, 1], [], []>} : vector<16x32xbf16>, vector<32x32xbf16>, vector<16x32xf32> -> vector<16x32xf32>
    %c1_158 = arith.constant 1 : index
    %c0_159 = arith.constant 0 : index
    %c0_160 = arith.constant 0 : index
    %c0_161 = arith.constant 0 : index
    %346 = vector.load %arg5[%c1_158, %c0_159, %c0_160, %c0_161] : memref<2x3x1x32xf32, #tpu.memory_space<vmem>>, vector<1x1x1x32xf32>
    %347 = vector.shape_cast %346 : vector<1x1x1x32xf32> to vector<1x32xf32>
    %348 = vector.broadcast %347 : vector<1x32xf32> to vector<16x32xf32>
    %349 = arith.addf %345, %348 : vector<16x32xf32>
    %c1_162 = arith.constant 1 : index
    %c1_163 = arith.constant 1 : index
    %c0_164 = arith.constant 0 : index
    %c0_165 = arith.constant 0 : index
    %350 = vector.load %arg4[%c1_162, %c1_163, %c0_164, %c0_165] : memref<2x3x32x32xbf16, #tpu.memory_space<vmem>>, vector<1x1x32x32xbf16>
    %351 = vector.shape_cast %350 : vector<1x1x32x32xbf16> to vector<32x32xbf16>
    %cst_166 = arith.constant dense<0.000000e+00> : vector<16x32xf32>
    %352 = tpu.matmul %342, %351, %cst_166 {dimension_numbers = #tpu.dot_dimension_numbers<[1], [0], [0], [1], [0, 0, 1, 1], [], []>} : vector<16x32xbf16>, vector<32x32xbf16>, vector<16x32xf32> -> vector<16x32xf32>
    %c1_167 = arith.constant 1 : index
    %c1_168 = arith.constant 1 : index
    %c0_169 = arith.constant 0 : index
    %c0_170 = arith.constant 0 : index
    %353 = vector.load %arg5[%c1_167, %c1_168, %c0_169, %c0_170] : memref<2x3x1x32xf32, #tpu.memory_space<vmem>>, vector<1x1x1x32xf32>
    %354 = vector.shape_cast %353 : vector<1x1x1x32xf32> to vector<1x32xf32>
    %355 = vector.broadcast %354 : vector<1x32xf32> to vector<16x32xf32>
    %356 = arith.addf %352, %355 : vector<16x32xf32>
    %c1_171 = arith.constant 1 : index
    %c2_172 = arith.constant 2 : index
    %c0_173 = arith.constant 0 : index
    %c0_174 = arith.constant 0 : index
    %357 = vector.load %arg4[%c1_171, %c2_172, %c0_173, %c0_174] : memref<2x3x32x32xbf16, #tpu.memory_space<vmem>>, vector<1x1x32x32xbf16>
    %358 = vector.shape_cast %357 : vector<1x1x32x32xbf16> to vector<32x32xbf16>
    %cst_175 = arith.constant dense<0.000000e+00> : vector<16x32xf32>
    %359 = tpu.matmul %342, %358, %cst_175 {dimension_numbers = #tpu.dot_dimension_numbers<[1], [0], [0], [1], [0, 0, 1, 1], [], []>} : vector<16x32xbf16>, vector<32x32xbf16>, vector<16x32xf32> -> vector<16x32xf32>
    %c1_176 = arith.constant 1 : index
    %c2_177 = arith.constant 2 : index
    %c0_178 = arith.constant 0 : index
    %c0_179 = arith.constant 0 : index
    %360 = vector.load %arg5[%c1_176, %c2_177, %c0_178, %c0_179] : memref<2x3x1x32xf32, #tpu.memory_space<vmem>>, vector<1x1x1x32xf32>
    %361 = vector.shape_cast %360 : vector<1x1x1x32xf32> to vector<1x32xf32>
    %362 = vector.broadcast %361 : vector<1x32xf32> to vector<16x32xf32>
    %363 = arith.addf %359, %362 : vector<16x32xf32>
    %364 = vector.extract_strided_slice %349 {offsets = [0, 0], sizes = [8, 32], strides = [1, 1]} : vector<16x32xf32> to vector<8x32xf32>
    %365 = tpu.transpose %364, [1, 0] : vector<8x32xf32> -> vector<32x8xf32>
    %366 = vector.extract_strided_slice %356 {offsets = [0, 0], sizes = [8, 32], strides = [1, 1]} : vector<16x32xf32> to vector<8x32xf32>
    %367 = tpu.transpose %366, [1, 0] : vector<8x32xf32> -> vector<32x8xf32>
    %368 = vector.extract_strided_slice %363 {offsets = [0, 0], sizes = [8, 32], strides = [1, 1]} : vector<16x32xf32> to vector<8x32xf32>
    %369 = tpu.transpose %368, [1, 0] : vector<8x32xf32> -> vector<32x8xf32>
    %cst_180 = arith.constant 0.000000e+00 : f32
    %370 = vector.broadcast %cst_180 : f32 to vector<8x32xf32>
    %371 = vector.extract_strided_slice %365 {offsets = [0, 0], sizes = [8, 8], strides = [1, 1]} : vector<32x8xf32> to vector<8x8xf32>
    %372 = tpu.transpose %371, [1, 0] : vector<8x8xf32> -> vector<8x8xf32>
    %373 = vector.extract_strided_slice %367 {offsets = [0, 0], sizes = [8, 8], strides = [1, 1]} : vector<32x8xf32> to vector<8x8xf32>
    %374 = vector.extract_strided_slice %369 {offsets = [0, 0], sizes = [8, 8], strides = [1, 1]} : vector<32x8xf32> to vector<8x8xf32>
    %cst_181 = arith.constant dense<0.000000e+00> : vector<8x8xf32>
    %375 = tpu.matmul %372, %373, %cst_181 {dimension_numbers = #tpu.dot_dimension_numbers<[1], [0], [0], [1], [0, 0, 1, 1], [], []>} : vector<8x8xf32>, vector<8x8xf32>, vector<8x8xf32> -> vector<8x8xf32>
    %376 = arith.addf %375, %16 : vector<8x8xf32>
    %cst_182 = arith.constant dense<0xFF800000> : vector<8xf32>
    %377 = vector.multi_reduction <maximumf>, %376, %cst_182 [1] : vector<8x8xf32> to vector<8xf32>
    %378 = vector.shape_cast %377 : vector<8xf32> to vector<8x1xf32>
    %379 = vector.broadcast %378 : vector<8x1xf32> to vector<8x8xf32>
    %380 = arith.subf %376, %379 : vector<8x8xf32>
    %381 = math.exp %380 : vector<8x8xf32>
    %cst_183 = arith.constant dense<0.000000e+00> : vector<8xf32>
    %382 = vector.multi_reduction <add>, %381, %cst_183 [1] : vector<8x8xf32> to vector<8xf32>
    %383 = vector.shape_cast %382 : vector<8xf32> to vector<8x1xf32>
    %384 = tpu.reciprocal %383 : vector<8x1xf32> -> vector<8x1xf32>
    %385 = vector.broadcast %384 : vector<8x1xf32> to vector<8x8xf32>
    %386 = arith.mulf %381, %385 : vector<8x8xf32>
    %cst_184 = arith.constant dense<0.000000e+00> : vector<8x8xf32>
    %387 = tpu.matmul %386, %374, %cst_184 {dimension_numbers = #tpu.dot_dimension_numbers<[1], [1], [0], [0], [0, 0, 1, 0], [], []>} : vector<8x8xf32>, vector<8x8xf32>, vector<8x8xf32> -> vector<8x8xf32>
    %388 = arith.truncf %387 : vector<8x8xf32> to vector<8x8xbf16>
    %c1_185 = arith.constant 1 : index
    %c0_186 = arith.constant 0 : index
    %c0_187 = arith.constant 0 : index
    %c0_188 = arith.constant 0 : index
    %389 = vector.load %arg6[%c1_185, %c0_186, %c0_187, %c0_188] : memref<2x4x8x32xbf16, #tpu.memory_space<vmem>>, vector<1x1x8x32xbf16>
    %390 = vector.shape_cast %389 : vector<1x1x8x32xbf16> to vector<8x32xbf16>
    %cst_189 = arith.constant dense<0.000000e+00> : vector<8x32xf32>
    %391 = tpu.matmul %388, %390, %cst_189 {dimension_numbers = #tpu.dot_dimension_numbers<[1], [0], [0], [1], [0, 0, 1, 1], [], []>} : vector<8x8xbf16>, vector<8x32xbf16>, vector<8x32xf32> -> vector<8x32xf32>
    %392 = arith.addf %370, %391 : vector<8x32xf32>
    %393 = vector.extract_strided_slice %365 {offsets = [8, 0], sizes = [8, 8], strides = [1, 1]} : vector<32x8xf32> to vector<8x8xf32>
    %394 = tpu.transpose %393, [1, 0] : vector<8x8xf32> -> vector<8x8xf32>
    %395 = vector.extract_strided_slice %367 {offsets = [8, 0], sizes = [8, 8], strides = [1, 1]} : vector<32x8xf32> to vector<8x8xf32>
    %396 = vector.extract_strided_slice %369 {offsets = [8, 0], sizes = [8, 8], strides = [1, 1]} : vector<32x8xf32> to vector<8x8xf32>
    %cst_190 = arith.constant dense<0.000000e+00> : vector<8x8xf32>
    %397 = tpu.matmul %394, %395, %cst_190 {dimension_numbers = #tpu.dot_dimension_numbers<[1], [0], [0], [1], [0, 0, 1, 1], [], []>} : vector<8x8xf32>, vector<8x8xf32>, vector<8x8xf32> -> vector<8x8xf32>
    %398 = arith.addf %397, %16 : vector<8x8xf32>
    %cst_191 = arith.constant dense<0xFF800000> : vector<8xf32>
    %399 = vector.multi_reduction <maximumf>, %398, %cst_191 [1] : vector<8x8xf32> to vector<8xf32>
    %400 = vector.shape_cast %399 : vector<8xf32> to vector<8x1xf32>
    %401 = vector.broadcast %400 : vector<8x1xf32> to vector<8x8xf32>
    %402 = arith.subf %398, %401 : vector<8x8xf32>
    %403 = math.exp %402 : vector<8x8xf32>
    %cst_192 = arith.constant dense<0.000000e+00> : vector<8xf32>
    %404 = vector.multi_reduction <add>, %403, %cst_192 [1] : vector<8x8xf32> to vector<8xf32>
    %405 = vector.shape_cast %404 : vector<8xf32> to vector<8x1xf32>
    %406 = tpu.reciprocal %405 : vector<8x1xf32> -> vector<8x1xf32>
    %407 = vector.broadcast %406 : vector<8x1xf32> to vector<8x8xf32>
    %408 = arith.mulf %403, %407 : vector<8x8xf32>
    %cst_193 = arith.constant dense<0.000000e+00> : vector<8x8xf32>
    %409 = tpu.matmul %408, %396, %cst_193 {dimension_numbers = #tpu.dot_dimension_numbers<[1], [1], [0], [0], [0, 0, 1, 0], [], []>} : vector<8x8xf32>, vector<8x8xf32>, vector<8x8xf32> -> vector<8x8xf32>
    %410 = arith.truncf %409 : vector<8x8xf32> to vector<8x8xbf16>
    %c1_194 = arith.constant 1 : index
    %c1_195 = arith.constant 1 : index
    %c0_196 = arith.constant 0 : index
    %c0_197 = arith.constant 0 : index
    %411 = vector.load %arg6[%c1_194, %c1_195, %c0_196, %c0_197] : memref<2x4x8x32xbf16, #tpu.memory_space<vmem>>, vector<1x1x8x32xbf16>
    %412 = vector.shape_cast %411 : vector<1x1x8x32xbf16> to vector<8x32xbf16>
    %cst_198 = arith.constant dense<0.000000e+00> : vector<8x32xf32>
    %413 = tpu.matmul %410, %412, %cst_198 {dimension_numbers = #tpu.dot_dimension_numbers<[1], [0], [0], [1], [0, 0, 1, 1], [], []>} : vector<8x8xbf16>, vector<8x32xbf16>, vector<8x32xf32> -> vector<8x32xf32>
    %414 = arith.addf %392, %413 : vector<8x32xf32>
    %415 = vector.extract_strided_slice %365 {offsets = [16, 0], sizes = [8, 8], strides = [1, 1]} : vector<32x8xf32> to vector<8x8xf32>
    %416 = tpu.transpose %415, [1, 0] : vector<8x8xf32> -> vector<8x8xf32>
    %417 = vector.extract_strided_slice %367 {offsets = [16, 0], sizes = [8, 8], strides = [1, 1]} : vector<32x8xf32> to vector<8x8xf32>
    %418 = vector.extract_strided_slice %369 {offsets = [16, 0], sizes = [8, 8], strides = [1, 1]} : vector<32x8xf32> to vector<8x8xf32>
    %cst_199 = arith.constant dense<0.000000e+00> : vector<8x8xf32>
    %419 = tpu.matmul %416, %417, %cst_199 {dimension_numbers = #tpu.dot_dimension_numbers<[1], [0], [0], [1], [0, 0, 1, 1], [], []>} : vector<8x8xf32>, vector<8x8xf32>, vector<8x8xf32> -> vector<8x8xf32>
    %420 = arith.addf %419, %16 : vector<8x8xf32>
    %cst_200 = arith.constant dense<0xFF800000> : vector<8xf32>
    %421 = vector.multi_reduction <maximumf>, %420, %cst_200 [1] : vector<8x8xf32> to vector<8xf32>
    %422 = vector.shape_cast %421 : vector<8xf32> to vector<8x1xf32>
    %423 = vector.broadcast %422 : vector<8x1xf32> to vector<8x8xf32>
    %424 = arith.subf %420, %423 : vector<8x8xf32>
    %425 = math.exp %424 : vector<8x8xf32>
    %cst_201 = arith.constant dense<0.000000e+00> : vector<8xf32>
    %426 = vector.multi_reduction <add>, %425, %cst_201 [1] : vector<8x8xf32> to vector<8xf32>
    %427 = vector.shape_cast %426 : vector<8xf32> to vector<8x1xf32>
    %428 = tpu.reciprocal %427 : vector<8x1xf32> -> vector<8x1xf32>
    %429 = vector.broadcast %428 : vector<8x1xf32> to vector<8x8xf32>
    %430 = arith.mulf %425, %429 : vector<8x8xf32>
    %cst_202 = arith.constant dense<0.000000e+00> : vector<8x8xf32>
    %431 = tpu.matmul %430, %418, %cst_202 {dimension_numbers = #tpu.dot_dimension_numbers<[1], [1], [0], [0], [0, 0, 1, 0], [], []>} : vector<8x8xf32>, vector<8x8xf32>, vector<8x8xf32> -> vector<8x8xf32>
    %432 = arith.truncf %431 : vector<8x8xf32> to vector<8x8xbf16>
    %c1_203 = arith.constant 1 : index
    %c2_204 = arith.constant 2 : index
    %c0_205 = arith.constant 0 : index
    %c0_206 = arith.constant 0 : index
    %433 = vector.load %arg6[%c1_203, %c2_204, %c0_205, %c0_206] : memref<2x4x8x32xbf16, #tpu.memory_space<vmem>>, vector<1x1x8x32xbf16>
    %434 = vector.shape_cast %433 : vector<1x1x8x32xbf16> to vector<8x32xbf16>
    %cst_207 = arith.constant dense<0.000000e+00> : vector<8x32xf32>
    %435 = tpu.matmul %432, %434, %cst_207 {dimension_numbers = #tpu.dot_dimension_numbers<[1], [0], [0], [1], [0, 0, 1, 1], [], []>} : vector<8x8xbf16>, vector<8x32xbf16>, vector<8x32xf32> -> vector<8x32xf32>
    %436 = arith.addf %414, %435 : vector<8x32xf32>
    %437 = vector.extract_strided_slice %365 {offsets = [24, 0], sizes = [8, 8], strides = [1, 1]} : vector<32x8xf32> to vector<8x8xf32>
    %438 = tpu.transpose %437, [1, 0] : vector<8x8xf32> -> vector<8x8xf32>
    %439 = vector.extract_strided_slice %367 {offsets = [24, 0], sizes = [8, 8], strides = [1, 1]} : vector<32x8xf32> to vector<8x8xf32>
    %440 = vector.extract_strided_slice %369 {offsets = [24, 0], sizes = [8, 8], strides = [1, 1]} : vector<32x8xf32> to vector<8x8xf32>
    %cst_208 = arith.constant dense<0.000000e+00> : vector<8x8xf32>
    %441 = tpu.matmul %438, %439, %cst_208 {dimension_numbers = #tpu.dot_dimension_numbers<[1], [0], [0], [1], [0, 0, 1, 1], [], []>} : vector<8x8xf32>, vector<8x8xf32>, vector<8x8xf32> -> vector<8x8xf32>
    %442 = arith.addf %441, %16 : vector<8x8xf32>
    %cst_209 = arith.constant dense<0xFF800000> : vector<8xf32>
    %443 = vector.multi_reduction <maximumf>, %442, %cst_209 [1] : vector<8x8xf32> to vector<8xf32>
    %444 = vector.shape_cast %443 : vector<8xf32> to vector<8x1xf32>
    %445 = vector.broadcast %444 : vector<8x1xf32> to vector<8x8xf32>
    %446 = arith.subf %442, %445 : vector<8x8xf32>
    %447 = math.exp %446 : vector<8x8xf32>
    %cst_210 = arith.constant dense<0.000000e+00> : vector<8xf32>
    %448 = vector.multi_reduction <add>, %447, %cst_210 [1] : vector<8x8xf32> to vector<8xf32>
    %449 = vector.shape_cast %448 : vector<8xf32> to vector<8x1xf32>
    %450 = tpu.reciprocal %449 : vector<8x1xf32> -> vector<8x1xf32>
    %451 = vector.broadcast %450 : vector<8x1xf32> to vector<8x8xf32>
    %452 = arith.mulf %447, %451 : vector<8x8xf32>
    %cst_211 = arith.constant dense<0.000000e+00> : vector<8x8xf32>
    %453 = tpu.matmul %452, %440, %cst_211 {dimension_numbers = #tpu.dot_dimension_numbers<[1], [1], [0], [0], [0, 0, 1, 0], [], []>} : vector<8x8xf32>, vector<8x8xf32>, vector<8x8xf32> -> vector<8x8xf32>
    %454 = arith.truncf %453 : vector<8x8xf32> to vector<8x8xbf16>
    %c1_212 = arith.constant 1 : index
    %c3_213 = arith.constant 3 : index
    %c0_214 = arith.constant 0 : index
    %c0_215 = arith.constant 0 : index
    %455 = vector.load %arg6[%c1_212, %c3_213, %c0_214, %c0_215] : memref<2x4x8x32xbf16, #tpu.memory_space<vmem>>, vector<1x1x8x32xbf16>
    %456 = vector.shape_cast %455 : vector<1x1x8x32xbf16> to vector<8x32xbf16>
    %cst_216 = arith.constant dense<0.000000e+00> : vector<8x32xf32>
    %457 = tpu.matmul %454, %456, %cst_216 {dimension_numbers = #tpu.dot_dimension_numbers<[1], [0], [0], [1], [0, 0, 1, 1], [], []>} : vector<8x8xbf16>, vector<8x32xbf16>, vector<8x32xf32> -> vector<8x32xf32>
    %458 = arith.addf %436, %457 : vector<8x32xf32>
    %459 = vector.extract_strided_slice %349 {offsets = [8, 0], sizes = [8, 32], strides = [1, 1]} : vector<16x32xf32> to vector<8x32xf32>
    %460 = tpu.transpose %459, [1, 0] : vector<8x32xf32> -> vector<32x8xf32>
    %461 = vector.extract_strided_slice %356 {offsets = [8, 0], sizes = [8, 32], strides = [1, 1]} : vector<16x32xf32> to vector<8x32xf32>
    %462 = tpu.transpose %461, [1, 0] : vector<8x32xf32> -> vector<32x8xf32>
    %463 = vector.extract_strided_slice %363 {offsets = [8, 0], sizes = [8, 32], strides = [1, 1]} : vector<16x32xf32> to vector<8x32xf32>
    %464 = tpu.transpose %463, [1, 0] : vector<8x32xf32> -> vector<32x8xf32>
    %cst_217 = arith.constant 0.000000e+00 : f32
    %465 = vector.broadcast %cst_217 : f32 to vector<8x32xf32>
    %466 = vector.extract_strided_slice %460 {offsets = [0, 0], sizes = [8, 8], strides = [1, 1]} : vector<32x8xf32> to vector<8x8xf32>
    %467 = tpu.transpose %466, [1, 0] : vector<8x8xf32> -> vector<8x8xf32>
    %468 = vector.extract_strided_slice %462 {offsets = [0, 0], sizes = [8, 8], strides = [1, 1]} : vector<32x8xf32> to vector<8x8xf32>
    %469 = vector.extract_strided_slice %464 {offsets = [0, 0], sizes = [8, 8], strides = [1, 1]} : vector<32x8xf32> to vector<8x8xf32>
    %cst_218 = arith.constant dense<0.000000e+00> : vector<8x8xf32>
    %470 = tpu.matmul %467, %468, %cst_218 {dimension_numbers = #tpu.dot_dimension_numbers<[1], [0], [0], [1], [0, 0, 1, 1], [], []>} : vector<8x8xf32>, vector<8x8xf32>, vector<8x8xf32> -> vector<8x8xf32>
    %471 = arith.addf %470, %22 : vector<8x8xf32>
    %cst_219 = arith.constant dense<0xFF800000> : vector<8xf32>
    %472 = vector.multi_reduction <maximumf>, %471, %cst_219 [1] : vector<8x8xf32> to vector<8xf32>
    %473 = vector.shape_cast %472 : vector<8xf32> to vector<8x1xf32>
    %474 = vector.broadcast %473 : vector<8x1xf32> to vector<8x8xf32>
    %475 = arith.subf %471, %474 : vector<8x8xf32>
    %476 = math.exp %475 : vector<8x8xf32>
    %cst_220 = arith.constant dense<0.000000e+00> : vector<8xf32>
    %477 = vector.multi_reduction <add>, %476, %cst_220 [1] : vector<8x8xf32> to vector<8xf32>
    %478 = vector.shape_cast %477 : vector<8xf32> to vector<8x1xf32>
    %479 = tpu.reciprocal %478 : vector<8x1xf32> -> vector<8x1xf32>
    %480 = vector.broadcast %479 : vector<8x1xf32> to vector<8x8xf32>
    %481 = arith.mulf %476, %480 : vector<8x8xf32>
    %cst_221 = arith.constant dense<0.000000e+00> : vector<8x8xf32>
    %482 = tpu.matmul %481, %469, %cst_221 {dimension_numbers = #tpu.dot_dimension_numbers<[1], [1], [0], [0], [0, 0, 1, 0], [], []>} : vector<8x8xf32>, vector<8x8xf32>, vector<8x8xf32> -> vector<8x8xf32>
    %483 = arith.truncf %482 : vector<8x8xf32> to vector<8x8xbf16>
    %c1_222 = arith.constant 1 : index
    %c0_223 = arith.constant 0 : index
    %c0_224 = arith.constant 0 : index
    %c0_225 = arith.constant 0 : index
    %484 = vector.load %arg6[%c1_222, %c0_223, %c0_224, %c0_225] : memref<2x4x8x32xbf16, #tpu.memory_space<vmem>>, vector<1x1x8x32xbf16>
    %485 = vector.shape_cast %484 : vector<1x1x8x32xbf16> to vector<8x32xbf16>
    %cst_226 = arith.constant dense<0.000000e+00> : vector<8x32xf32>
    %486 = tpu.matmul %483, %485, %cst_226 {dimension_numbers = #tpu.dot_dimension_numbers<[1], [0], [0], [1], [0, 0, 1, 1], [], []>} : vector<8x8xbf16>, vector<8x32xbf16>, vector<8x32xf32> -> vector<8x32xf32>
    %487 = arith.addf %465, %486 : vector<8x32xf32>
    %488 = vector.extract_strided_slice %460 {offsets = [8, 0], sizes = [8, 8], strides = [1, 1]} : vector<32x8xf32> to vector<8x8xf32>
    %489 = tpu.transpose %488, [1, 0] : vector<8x8xf32> -> vector<8x8xf32>
    %490 = vector.extract_strided_slice %462 {offsets = [8, 0], sizes = [8, 8], strides = [1, 1]} : vector<32x8xf32> to vector<8x8xf32>
    %491 = vector.extract_strided_slice %464 {offsets = [8, 0], sizes = [8, 8], strides = [1, 1]} : vector<32x8xf32> to vector<8x8xf32>
    %cst_227 = arith.constant dense<0.000000e+00> : vector<8x8xf32>
    %492 = tpu.matmul %489, %490, %cst_227 {dimension_numbers = #tpu.dot_dimension_numbers<[1], [0], [0], [1], [0, 0, 1, 1], [], []>} : vector<8x8xf32>, vector<8x8xf32>, vector<8x8xf32> -> vector<8x8xf32>
    %493 = arith.addf %492, %22 : vector<8x8xf32>
    %cst_228 = arith.constant dense<0xFF800000> : vector<8xf32>
    %494 = vector.multi_reduction <maximumf>, %493, %cst_228 [1] : vector<8x8xf32> to vector<8xf32>
    %495 = vector.shape_cast %494 : vector<8xf32> to vector<8x1xf32>
    %496 = vector.broadcast %495 : vector<8x1xf32> to vector<8x8xf32>
    %497 = arith.subf %493, %496 : vector<8x8xf32>
    %498 = math.exp %497 : vector<8x8xf32>
    %cst_229 = arith.constant dense<0.000000e+00> : vector<8xf32>
    %499 = vector.multi_reduction <add>, %498, %cst_229 [1] : vector<8x8xf32> to vector<8xf32>
    %500 = vector.shape_cast %499 : vector<8xf32> to vector<8x1xf32>
    %501 = tpu.reciprocal %500 : vector<8x1xf32> -> vector<8x1xf32>
    %502 = vector.broadcast %501 : vector<8x1xf32> to vector<8x8xf32>
    %503 = arith.mulf %498, %502 : vector<8x8xf32>
    %cst_230 = arith.constant dense<0.000000e+00> : vector<8x8xf32>
    %504 = tpu.matmul %503, %491, %cst_230 {dimension_numbers = #tpu.dot_dimension_numbers<[1], [1], [0], [0], [0, 0, 1, 0], [], []>} : vector<8x8xf32>, vector<8x8xf32>, vector<8x8xf32> -> vector<8x8xf32>
    %505 = arith.truncf %504 : vector<8x8xf32> to vector<8x8xbf16>
    %c1_231 = arith.constant 1 : index
    %c1_232 = arith.constant 1 : index
    %c0_233 = arith.constant 0 : index
    %c0_234 = arith.constant 0 : index
    %506 = vector.load %arg6[%c1_231, %c1_232, %c0_233, %c0_234] : memref<2x4x8x32xbf16, #tpu.memory_space<vmem>>, vector<1x1x8x32xbf16>
    %507 = vector.shape_cast %506 : vector<1x1x8x32xbf16> to vector<8x32xbf16>
    %cst_235 = arith.constant dense<0.000000e+00> : vector<8x32xf32>
    %508 = tpu.matmul %505, %507, %cst_235 {dimension_numbers = #tpu.dot_dimension_numbers<[1], [0], [0], [1], [0, 0, 1, 1], [], []>} : vector<8x8xbf16>, vector<8x32xbf16>, vector<8x32xf32> -> vector<8x32xf32>
    %509 = arith.addf %487, %508 : vector<8x32xf32>
    %510 = vector.extract_strided_slice %460 {offsets = [16, 0], sizes = [8, 8], strides = [1, 1]} : vector<32x8xf32> to vector<8x8xf32>
    %511 = tpu.transpose %510, [1, 0] : vector<8x8xf32> -> vector<8x8xf32>
    %512 = vector.extract_strided_slice %462 {offsets = [16, 0], sizes = [8, 8], strides = [1, 1]} : vector<32x8xf32> to vector<8x8xf32>
    %513 = vector.extract_strided_slice %464 {offsets = [16, 0], sizes = [8, 8], strides = [1, 1]} : vector<32x8xf32> to vector<8x8xf32>
    %cst_236 = arith.constant dense<0.000000e+00> : vector<8x8xf32>
    %514 = tpu.matmul %511, %512, %cst_236 {dimension_numbers = #tpu.dot_dimension_numbers<[1], [0], [0], [1], [0, 0, 1, 1], [], []>} : vector<8x8xf32>, vector<8x8xf32>, vector<8x8xf32> -> vector<8x8xf32>
    %515 = arith.addf %514, %22 : vector<8x8xf32>
    %cst_237 = arith.constant dense<0xFF800000> : vector<8xf32>
    %516 = vector.multi_reduction <maximumf>, %515, %cst_237 [1] : vector<8x8xf32> to vector<8xf32>
    %517 = vector.shape_cast %516 : vector<8xf32> to vector<8x1xf32>
    %518 = vector.broadcast %517 : vector<8x1xf32> to vector<8x8xf32>
    %519 = arith.subf %515, %518 : vector<8x8xf32>
    %520 = math.exp %519 : vector<8x8xf32>
    %cst_238 = arith.constant dense<0.000000e+00> : vector<8xf32>
    %521 = vector.multi_reduction <add>, %520, %cst_238 [1] : vector<8x8xf32> to vector<8xf32>
    %522 = vector.shape_cast %521 : vector<8xf32> to vector<8x1xf32>
    %523 = tpu.reciprocal %522 : vector<8x1xf32> -> vector<8x1xf32>
    %524 = vector.broadcast %523 : vector<8x1xf32> to vector<8x8xf32>
    %525 = arith.mulf %520, %524 : vector<8x8xf32>
    %cst_239 = arith.constant dense<0.000000e+00> : vector<8x8xf32>
    %526 = tpu.matmul %525, %513, %cst_239 {dimension_numbers = #tpu.dot_dimension_numbers<[1], [1], [0], [0], [0, 0, 1, 0], [], []>} : vector<8x8xf32>, vector<8x8xf32>, vector<8x8xf32> -> vector<8x8xf32>
    %527 = arith.truncf %526 : vector<8x8xf32> to vector<8x8xbf16>
    %c1_240 = arith.constant 1 : index
    %c2_241 = arith.constant 2 : index
    %c0_242 = arith.constant 0 : index
    %c0_243 = arith.constant 0 : index
    %528 = vector.load %arg6[%c1_240, %c2_241, %c0_242, %c0_243] : memref<2x4x8x32xbf16, #tpu.memory_space<vmem>>, vector<1x1x8x32xbf16>
    %529 = vector.shape_cast %528 : vector<1x1x8x32xbf16> to vector<8x32xbf16>
    %cst_244 = arith.constant dense<0.000000e+00> : vector<8x32xf32>
    %530 = tpu.matmul %527, %529, %cst_244 {dimension_numbers = #tpu.dot_dimension_numbers<[1], [0], [0], [1], [0, 0, 1, 1], [], []>} : vector<8x8xbf16>, vector<8x32xbf16>, vector<8x32xf32> -> vector<8x32xf32>
    %531 = arith.addf %509, %530 : vector<8x32xf32>
    %532 = vector.extract_strided_slice %460 {offsets = [24, 0], sizes = [8, 8], strides = [1, 1]} : vector<32x8xf32> to vector<8x8xf32>
    %533 = tpu.transpose %532, [1, 0] : vector<8x8xf32> -> vector<8x8xf32>
    %534 = vector.extract_strided_slice %462 {offsets = [24, 0], sizes = [8, 8], strides = [1, 1]} : vector<32x8xf32> to vector<8x8xf32>
    %535 = vector.extract_strided_slice %464 {offsets = [24, 0], sizes = [8, 8], strides = [1, 1]} : vector<32x8xf32> to vector<8x8xf32>
    %cst_245 = arith.constant dense<0.000000e+00> : vector<8x8xf32>
    %536 = tpu.matmul %533, %534, %cst_245 {dimension_numbers = #tpu.dot_dimension_numbers<[1], [0], [0], [1], [0, 0, 1, 1], [], []>} : vector<8x8xf32>, vector<8x8xf32>, vector<8x8xf32> -> vector<8x8xf32>
    %537 = arith.addf %536, %22 : vector<8x8xf32>
    %cst_246 = arith.constant dense<0xFF800000> : vector<8xf32>
    %538 = vector.multi_reduction <maximumf>, %537, %cst_246 [1] : vector<8x8xf32> to vector<8xf32>
    %539 = vector.shape_cast %538 : vector<8xf32> to vector<8x1xf32>
    %540 = vector.broadcast %539 : vector<8x1xf32> to vector<8x8xf32>
    %541 = arith.subf %537, %540 : vector<8x8xf32>
    %542 = math.exp %541 : vector<8x8xf32>
    %cst_247 = arith.constant dense<0.000000e+00> : vector<8xf32>
    %543 = vector.multi_reduction <add>, %542, %cst_247 [1] : vector<8x8xf32> to vector<8xf32>
    %544 = vector.shape_cast %543 : vector<8xf32> to vector<8x1xf32>
    %545 = tpu.reciprocal %544 : vector<8x1xf32> -> vector<8x1xf32>
    %546 = vector.broadcast %545 : vector<8x1xf32> to vector<8x8xf32>
    %547 = arith.mulf %542, %546 : vector<8x8xf32>
    %cst_248 = arith.constant dense<0.000000e+00> : vector<8x8xf32>
    %548 = tpu.matmul %547, %535, %cst_248 {dimension_numbers = #tpu.dot_dimension_numbers<[1], [1], [0], [0], [0, 0, 1, 0], [], []>} : vector<8x8xf32>, vector<8x8xf32>, vector<8x8xf32> -> vector<8x8xf32>
    %549 = arith.truncf %548 : vector<8x8xf32> to vector<8x8xbf16>
    %c1_249 = arith.constant 1 : index
    %c3_250 = arith.constant 3 : index
    %c0_251 = arith.constant 0 : index
    %c0_252 = arith.constant 0 : index
    %550 = vector.load %arg6[%c1_249, %c3_250, %c0_251, %c0_252] : memref<2x4x8x32xbf16, #tpu.memory_space<vmem>>, vector<1x1x8x32xbf16>
    %551 = vector.shape_cast %550 : vector<1x1x8x32xbf16> to vector<8x32xbf16>
    %cst_253 = arith.constant dense<0.000000e+00> : vector<8x32xf32>
    %552 = tpu.matmul %549, %551, %cst_253 {dimension_numbers = #tpu.dot_dimension_numbers<[1], [0], [0], [1], [0, 0, 1, 1], [], []>} : vector<8x8xbf16>, vector<8x32xbf16>, vector<8x32xf32> -> vector<8x32xf32>
    %553 = arith.addf %531, %552 : vector<8x32xf32>
    %554 = tpu.concatenate %458, %553 in 0 : vector<8x32xf32>, vector<8x32xf32> -> vector<16x32xf32>
    %555 = arith.addf %315, %554 : vector<16x32xf32>
    %c1_254 = arith.constant 1 : index
    %c0_255 = arith.constant 0 : index
    %c0_256 = arith.constant 0 : index
    %556 = vector.load %arg7[%c1_254, %c0_255, %c0_256] : memref<2x1x32xf32, #tpu.memory_space<vmem>>, vector<1x1x32xf32>
    %557 = vector.shape_cast %556 : vector<1x1x32xf32> to vector<1x32xf32>
    %558 = vector.broadcast %557 : vector<1x32xf32> to vector<16x32xf32>
    %559 = arith.addf %555, %558 : vector<16x32xf32>
    %c1_257 = arith.constant 1 : index
    %c0_258 = arith.constant 0 : index
    %c0_259 = arith.constant 0 : index
    %560 = vector.load %arg8[%c1_257, %c0_258, %c0_259] : memref<2x1x32xf32, #tpu.memory_space<vmem>>, vector<1x1x32xf32>
    %561 = vector.shape_cast %560 : vector<1x1x32xf32> to vector<1x32xf32>
    %c1_260 = arith.constant 1 : index
    %c0_261 = arith.constant 0 : index
    %c0_262 = arith.constant 0 : index
    %562 = vector.load %arg9[%c1_260, %c0_261, %c0_262] : memref<2x1x32xf32, #tpu.memory_space<vmem>>, vector<1x1x32xf32>
    %563 = vector.shape_cast %562 : vector<1x1x32xf32> to vector<1x32xf32>
    %cst_263 = arith.constant dense<0.000000e+00> : vector<16xf32>
    %564 = vector.multi_reduction <add>, %559, %cst_263 [1] : vector<16x32xf32> to vector<16xf32>
    %565 = vector.shape_cast %564 : vector<16xf32> to vector<16x1xf32>
    %cst_264 = arith.constant 3.200000e+01 : f32
    %566 = vector.broadcast %cst_264 : f32 to vector<16x1xf32>
    %567 = arith.divf %565, %566 : vector<16x1xf32>
    %568 = vector.broadcast %567 : vector<16x1xf32> to vector<16x32xf32>
    %569 = arith.subf %559, %568 : vector<16x32xf32>
    %570 = arith.mulf %569, %569 : vector<16x32xf32>
    %cst_265 = arith.constant dense<0.000000e+00> : vector<16xf32>
    %571 = vector.multi_reduction <add>, %570, %cst_265 [1] : vector<16x32xf32> to vector<16xf32>
    %572 = vector.shape_cast %571 : vector<16xf32> to vector<16x1xf32>
    %cst_266 = arith.constant 3.200000e+01 : f32
    %573 = vector.broadcast %cst_266 : f32 to vector<16x1xf32>
    %574 = arith.divf %572, %573 : vector<16x1xf32>
    %575 = vector.broadcast %567 : vector<16x1xf32> to vector<16x32xf32>
    %576 = arith.subf %559, %575 : vector<16x32xf32>
    %cst_267 = arith.constant 9.99999974E-6 : f32
    %577 = vector.broadcast %cst_267 : f32 to vector<16x1xf32>
    %578 = arith.addf %574, %577 : vector<16x1xf32>
    %579 = math.rsqrt %578 : vector<16x1xf32>
    %580 = vector.broadcast %579 : vector<16x1xf32> to vector<16x32xf32>
    %581 = arith.mulf %576, %580 : vector<16x32xf32>
    %582 = vector.broadcast %561 : vector<1x32xf32> to vector<16x32xf32>
    %583 = arith.mulf %581, %582 : vector<16x32xf32>
    %584 = vector.broadcast %563 : vector<1x32xf32> to vector<16x32xf32>
    %585 = arith.addf %583, %584 : vector<16x32xf32>
    %586 = arith.truncf %585 : vector<16x32xf32> to vector<16x32xbf16>
    %c1_268 = arith.constant 1 : index
    %c0_269 = arith.constant 0 : index
    %c0_270 = arith.constant 0 : index
    %587 = vector.load %arg10[%c1_268, %c0_269, %c0_270] : memref<2x32x128xbf16, #tpu.memory_space<vmem>>, vector<1x32x128xbf16>
    %588 = vector.shape_cast %587 : vector<1x32x128xbf16> to vector<32x128xbf16>
    %cst_271 = arith.constant dense<0.000000e+00> : vector<16x128xf32>
    %589 = tpu.matmul %586, %588, %cst_271 {dimension_numbers = #tpu.dot_dimension_numbers<[1], [0], [0], [1], [0, 0, 1, 1], [], []>} : vector<16x32xbf16>, vector<32x128xbf16>, vector<16x128xf32> -> vector<16x128xf32>
    %c1_272 = arith.constant 1 : index
    %c0_273 = arith.constant 0 : index
    %c0_274 = arith.constant 0 : index
    %590 = vector.load %arg11[%c1_272, %c0_273, %c0_274] : memref<2x1x128xf32, #tpu.memory_space<vmem>>, vector<1x1x128xf32>
    %591 = vector.shape_cast %590 : vector<1x1x128xf32> to vector<1x128xf32>
    %592 = vector.broadcast %591 : vector<1x128xf32> to vector<16x128xf32>
    %593 = arith.addf %589, %592 : vector<16x128xf32>
    %594 = arith.negf %593 : vector<16x128xf32>
    %595 = math.exp %594 : vector<16x128xf32>
    %cst_275 = arith.constant 1.000000e+00 : f32
    %596 = vector.broadcast %cst_275 : f32 to vector<16x128xf32>
    %597 = arith.addf %596, %595 : vector<16x128xf32>
    %598 = arith.divf %596, %597 : vector<16x128xf32>
    %599 = arith.mulf %593, %598 : vector<16x128xf32>
    %600 = arith.truncf %599 : vector<16x128xf32> to vector<16x128xbf16>
    %c1_276 = arith.constant 1 : index
    %c0_277 = arith.constant 0 : index
    %c0_278 = arith.constant 0 : index
    %601 = vector.load %arg12[%c1_276, %c0_277, %c0_278] : memref<2x128x32xbf16, #tpu.memory_space<vmem>>, vector<1x128x32xbf16>
    %602 = vector.shape_cast %601 : vector<1x128x32xbf16> to vector<128x32xbf16>
    %cst_279 = arith.constant dense<0.000000e+00> : vector<16x32xf32>
    %603 = tpu.matmul %600, %602, %cst_279 {dimension_numbers = #tpu.dot_dimension_numbers<[1], [0], [0], [1], [0, 0, 1, 1], [], []>} : vector<16x128xbf16>, vector<128x32xbf16>, vector<16x32xf32> -> vector<16x32xf32>
    %c1_280 = arith.constant 1 : index
    %c0_281 = arith.constant 0 : index
    %c0_282 = arith.constant 0 : index
    %604 = vector.load %arg13[%c1_280, %c0_281, %c0_282] : memref<2x1x32xf32, #tpu.memory_space<vmem>>, vector<1x1x32xf32>
    %605 = vector.shape_cast %604 : vector<1x1x32xf32> to vector<1x32xf32>
    %606 = vector.broadcast %605 : vector<1x32xf32> to vector<16x32xf32>
    %607 = arith.addf %603, %606 : vector<16x32xf32>
    %608 = arith.addf %559, %607 : vector<16x32xf32>
    %c0_283 = arith.constant 0 : index
    %c0_284 = arith.constant 0 : index
    %609 = vector.load %arg14[%c0_283, %c0_284] : memref<1x32xf32, #tpu.memory_space<vmem>>, vector<1x32xf32>
    %c0_285 = arith.constant 0 : index
    %c0_286 = arith.constant 0 : index
    %610 = vector.load %arg15[%c0_285, %c0_286] : memref<1x32xf32, #tpu.memory_space<vmem>>, vector<1x32xf32>
    %cst_287 = arith.constant dense<0.000000e+00> : vector<16xf32>
    %611 = vector.multi_reduction <add>, %608, %cst_287 [1] : vector<16x32xf32> to vector<16xf32>
    %612 = vector.shape_cast %611 : vector<16xf32> to vector<16x1xf32>
    %cst_288 = arith.constant 3.200000e+01 : f32
    %613 = vector.broadcast %cst_288 : f32 to vector<16x1xf32>
    %614 = arith.divf %612, %613 : vector<16x1xf32>
    %615 = vector.broadcast %614 : vector<16x1xf32> to vector<16x32xf32>
    %616 = arith.subf %608, %615 : vector<16x32xf32>
    %617 = arith.mulf %616, %616 : vector<16x32xf32>
    %cst_289 = arith.constant dense<0.000000e+00> : vector<16xf32>
    %618 = vector.multi_reduction <add>, %617, %cst_289 [1] : vector<16x32xf32> to vector<16xf32>
    %619 = vector.shape_cast %618 : vector<16xf32> to vector<16x1xf32>
    %cst_290 = arith.constant 3.200000e+01 : f32
    %620 = vector.broadcast %cst_290 : f32 to vector<16x1xf32>
    %621 = arith.divf %619, %620 : vector<16x1xf32>
    %622 = vector.broadcast %614 : vector<16x1xf32> to vector<16x32xf32>
    %623 = arith.subf %608, %622 : vector<16x32xf32>
    %cst_291 = arith.constant 9.99999974E-6 : f32
    %624 = vector.broadcast %cst_291 : f32 to vector<16x1xf32>
    %625 = arith.addf %621, %624 : vector<16x1xf32>
    %626 = math.rsqrt %625 : vector<16x1xf32>
    %627 = vector.broadcast %626 : vector<16x1xf32> to vector<16x32xf32>
    %628 = arith.mulf %623, %627 : vector<16x32xf32>
    %629 = vector.broadcast %609 : vector<1x32xf32> to vector<16x32xf32>
    %630 = arith.mulf %628, %629 : vector<16x32xf32>
    %631 = vector.broadcast %610 : vector<1x32xf32> to vector<16x32xf32>
    %632 = arith.addf %630, %631 : vector<16x32xf32>
    %633 = arith.truncf %632 : vector<16x32xf32> to vector<16x32xbf16>
    %c0_292 = arith.constant 0 : index
    %c0_293 = arith.constant 0 : index
    %634 = vector.load %arg16[%c0_292, %c0_293] : memref<32x128xbf16, #tpu.memory_space<vmem>>, vector<32x128xbf16>
    %cst_294 = arith.constant dense<0.000000e+00> : vector<16x128xf32>
    %635 = tpu.matmul %633, %634, %cst_294 {dimension_numbers = #tpu.dot_dimension_numbers<[1], [0], [0], [1], [0, 0, 1, 1], [], []>} : vector<16x32xbf16>, vector<32x128xbf16>, vector<16x128xf32> -> vector<16x128xf32>
    %c0_295 = arith.constant 0 : index
    %c0_296 = arith.constant 0 : index
    %636 = vector.load %arg17[%c0_295, %c0_296] : memref<16x128xf32, #tpu.memory_space<vmem>>, vector<16x128xf32>
    tpu.vector_store %arg17[%c0_295, %c0_296], %635 {strides = array<i32>} : memref<16x128xf32, #tpu.memory_space<vmem>>, vector<16x128xf32>,
    %637 = tpu.concatenate %63, %70, %356, %363 in 1 : vector<16x32xf32>, vector<16x32xf32>, vector<16x32xf32>, vector<16x32xf32> -> vector<16x128xf32>
    %c0_297 = arith.constant 0 : index
    %c0_298 = arith.constant 0 : index
    %638 = vector.load %arg18[%c0_297, %c0_298] : memref<16x128xf32, #tpu.memory_space<vmem>>, vector<16x128xf32>
    tpu.vector_store %arg18[%c0_297, %c0_298], %637 {strides = array<i32>} : memref<16x128xf32, #tpu.memory_space<vmem>>, vector<16x128xf32>,
    return
  }
}

</mosaic_0001>

<bundles_post_ra>
// kernel: transformer_forward.1
= control target key start
LH: loop header
LB: loop body
LE: loop exit
PB: predicated region body
PF: predicated region fallthrough
CT: control target
= control target key end

     0   :  { %s7000_s0 = inlined_call_operand.vmem [shape: s32[2,8], index: 0, kind: input, shape index: {}]   ;;  %s7001_s1 = inlined_call_operand.vmem [shape: f32[16,32], index: 1, kind: input, shape index: {}]   ;;  %s7002_s2 = inlined_call_operand.vmem [shape: f32[2,1,32], index: 2, kind: input, shape index: {}]   ;;  %s7003_s3 = inlined_call_operand.vmem [shape: f32[2,1,32], index: 3, kind: input, shape index: {}]   ;;  %s7004_s4 = inlined_call_operand.vmem [shape: bf16[2,3,32,32], index: 4, kind: input, shape index: {}]   ;;  %s7005_s5 = inlined_call_operand.vmem [shape: f32[2,3,1,32], index: 5, kind: input, shape index: {}]   ;;  %s7006_s6 = inlined_call_operand.vmem [shape: bf16[2,4,8,32], index: 6, kind: input, shape index: {}]   ;;  %s7007_s7 = inlined_call_operand.vmem [shape: f32[2,1,32], index: 7, kind: input, shape index: {}]   ;;  %s7008_s8 = inlined_call_operand.vmem [shape: f32[2,1,32], index: 8, kind: input, shape index: {}]   ;;  %s7009_s9 = inlined_call_operand.vmem [shape: f32[2,1,32], index: 9, kind: input, shape index: {}]   ;;  %s7010_s10 = inlined_call_operand.vmem [shape: bf16[2,32,128], index: 10, kind: input, shape index: {}]   ;;  %s7011_s11 = inlined_call_operand.vmem [shape: f32[2,1,128], index: 11, kind: input, shape index: {}]   ;;  %s7012_s12 = inlined_call_operand.vmem [shape: bf16[2,128,32], index: 12, kind: input, shape index: {}]   ;;  %s7013_s13 = inlined_call_operand.vmem [shape: f32[2,1,32], index: 13, kind: input, shape index: {}]   ;;  %s7014_s14 = inlined_call_operand.vmem [shape: f32[1,32], index: 14, kind: input, shape index: {}]   ;;  %s7015_s15 = inlined_call_operand.vmem [shape: f32[1,32], index: 15, kind: input, shape index: {}]   ;;  %s7016_s16 = inlined_call_operand.vmem [shape: bf16[32,128], index: 16, kind: input, shape index: {}]   ;;  %s7017_s17 = inlined_call_operand.hbm [shape: f32[16,128], index: 17, kind: output, shape index: {0}]   ;;  %s7018_s18 = inlined_call_operand.vmem [shape: f32[16,128], index: 18, kind: output, shape index: {1}]  }
   0x1   :  { %7021 = sst [smem:[#allocation5_spill]] %s7000_s0 }
   0x2   :  { %7022 = sst [smem:[#allocation6_spill]] %s7001_s1 }
   0x3   :  { %7023 = sst [smem:[#allocation7_spill]] %s7002_s2 }
   0x4   :  { %s7024_s29 = sld [smem:[#allocation6_spill]]  ;;  %vm87_vm0 = vcmask 261120  }
   0xa   :  { %v6232_v0 = vld [vmem:[%s7024_s29] sm:$0xff]  ;;  %v61_v1 = vld [vmem:[%s7024_s29 + $0x8] sm:$0xff] }
   0xb   :  { %v88_v2 = vsel %vm87_vm0, %v6232_v0, 0.0  ;;  %v91_v3 = vsel %vm87_vm0, %v61_v1, 0.0 }
   0xc   :  { %89 = vadd.xlane.f32.xlu0 %v88_v2 }
  0x10   :  { %92 = vadd.xlane.f32.xlu0 %v91_v3 }
  0x11   :  { %24 = vsyncpa [#allocation3], 0  ;;  %v5964_v14 = vld [vmem:[%s7004_s4] sm:$0xff]   ;;  %v6123_v15 = vmov 0.0   ;;  %vm6124_vm1 = vmmov 0   ;;  %v5965_v16 = vld [vmem:[%s7004_s4 + $0x8] sm:$0xff]   ;;  %v66_v3 = vlaneseq }
  0x12   :  { %5585 = vmatprep.subr.bf16.mxu0 %v6123_v15  ;;  %5589 = vmatprep.mubr.msk.bf16.mxu0 %vm6124_vm1, %v6123_v15  ;;  %s7025_s23 = sld [smem:[#allocation7_spill]]  ;;  %v5253_v29 = vld [vmem:[%s7003_s3] ss:$0 sm:$0xff]  ;;  %v5966_v33 = vld [vmem:[%s7004_s4 + $0x10] sm:$0xff]   ;;  %v5967_v35 = vld [vmem:[%s7004_s4 + $0x18] sm:$0xff]   ;;  %vm395_vm2 = vcmask 64512  }
  0x13   :  { %5586 = vmatpush3.bf16.msra.mxu0 %v5964_v14  ;;  %5609 = vmatprep.subr.mxu1 %v6123_v15  ;;  %v5968_v36 = vld [vmem:[%s7004_s4 + $0x20] sm:$0xff]   ;;  %v5969_v37 = vld [vmem:[%s7004_s4 + $0x28] sm:$0xff]   ;;  %s6125_s25 = smov 120   ;;  %s7026_s0 = sld [smem:[#allocation5_spill]]  ;;  %vm761_vm5 = vcmask 1043456   ;;  %vm5222_vm6 = vcmask 523264  }
  0x14   :  { %5587 = vmatprep.subr.bf16.mxu0 %v6123_v15  ;;  %5611 = vmatprep.mubr.msk.f32.mxu1 %vm6124_vm1, %v6123_v15  ;;  %v5254_v38 = vld [vmem:[%s7005_s5] ss:$0 sm:$0xff]  ;;  %v5263_v45 = vld [vmem:[%s7005_s5 + $0x1] ss:$0 sm:$0xff]  ;;  %v5272_v54 = vld [vmem:[%s7005_s5 + $0x2] ss:$0 sm:$0xff] }
  0x15   :  { %s6126_s19 = smov 112   ;;  %s6127_s21 = smov 104   ;;  %vm5225_vm7 = vcmask 785408  }
  0x16   :  { %s6130_s1 = smov 96  }
  0x17   :  { %5588 = vmatpush3.bf16.msra.mxu0 %v5965_v16 }
  0x18   :  { %5593 = vmatprep.subr.bf16.mxu0 %v6123_v15  ;;  %v5252_v25 = vld [vmem:[%s7025_s23] ss:$0 sm:$0xff] }
  0x99   :  { %v90_v4 = vpop.xlane.xlu0 %89 }
  0x9a   :  { %v95_v5 = vmul.f32 0.03125, %v90_v4  ;;  %v62_v4 = vld [vmem:[%s7026_s0] sm:$0x3]  ;;  %s6129_s0 = smov 64  }
  0x9b   :  { %vm63_vm3 = vcmp.eq.s32.totalorder %v62_v4, 0 }
  0x9c   :  { %v97_v6 = vsub.f32 %v6232_v0, %v95_v5  ;;  %v6327_v5 = vshrl.u32 %v66_v3, 7 }
  0x9d   :  { %v93_v7 = vpop.xlane.xlu0 %92 }
  0x9e   :  { %v96_v8 = vmul.f32 0.03125, %v93_v7  ;;  %v99_v9 = vmul.f32 %v97_v6, %v97_v6  ;;  %v75_v7 = vsub.s32 0, %v6327_v5 }
  0xa0   :  { %v98_v10 = vsub.f32 %v61_v1, %v96_v8  ;;  %v101_v11 = vsel %vm87_vm0, %v99_v9, 0.0  ;;  %v6331_v8 = vsel %vm63_vm3, 1.0, %v6123_v15 }
  0xa1   :  { %102 = vadd.xlane.f32.xlu1 %v101_v11  ;;  %v76_v9 = vrot.slane %v6331_v8, %v75_v7 }
  0xa2   :  { %v100_v12 = vmul.f32 %v98_v10, %v98_v10 }
  0xa4   :  { %v104_v13 = vsel %vm87_vm0, %v100_v12, 0.0 }
  0xa5   :  { %105 = vadd.xlane.f32.xlu1 %v104_v13 }
 0x12e   :  { %v103_v17 = vpop.xlane.xlu1 %102 }
 0x12f   :  { %v107_v18 = vmul.f32 0.03125, %v103_v17 }
 0x131   :  { %v109_v19 = vadd.f32 1e-05, %v107_v18 }
 0x132   :  { %v106_v20 = vpop.xlane.xlu1 %105 }
 0x133   :  { %5998 = vrsqrt.f32 %v109_v19  ;;  %v108_v21 = vmul.f32 0.03125, %v106_v20 }
 0x135   :  { %v110_v22 = vadd.f32 1e-05, %v108_v21 }
 0x137   :  { %6000 = vrsqrt.f32 %v110_v22 }
 0x13d   :  { %v5999_v23 = vpop.eup %5998 }
 0x13e   :  { %v113_v24 = vmul.f32 %v5999_v23, %v97_v6  ;;  %v69_v6 = vand.u32 127, %v66_v3 }
 0x140   :  { %v121_v28 = vmul.f32 %v5252_v25, %v113_v24  ;;  %vm70_vm4 = vcmp.gt.s32.totalorder %v69_v6, %v6327_v5 }
 0x141   :  { %v6001_v26 = vpop.eup %6000 }
 0x142   :  { %v114_v27 = vmul.f32 %v6001_v26, %v98_v10  ;;  %v129_v31 = vadd.f32 %v5253_v29, %v121_v28  ;;  %v6336_v10 = vsel %vm70_vm4, 1.0, %v6123_v15 }
 0x143   :  { %v77_v11 = vmax.f32 %v76_v9, %v6336_v10 }
 0x144   :  { %v122_v30 = vmul.f32 %v5252_v25, %v114_v27 }
 0x145   :  { %v6339_v12 = vmul.f32 -10000.0, %v77_v11 }
 0x146   :  { %v130_v32 = vadd.f32 %v5253_v29, %v122_v30 }
 0x148   :  { %v131_v34 = vpack.c.bf16 %v130_v32, %v129_v31  ;;  %v5282_v32 = vld [vmem:[%s7006_s6 + $0x4] sm:$0xf] }
 0x14a   :  { %5590 = vmatmul.mubr.msk.bf16.vlgmr.msra.gmra.mrb[0].mxu0 %vm87_vm0, %v131_v34 }
 0x14b   :  { %5594 = vmatpush3.bf16.msra.mxu0 %v5966_v33  ;;  %5597 = vmatprep.mubr.msk.bf16.mxu0 %vm6124_vm1, %v6123_v15  ;;  %v6355_v33 = vsel %vm761_vm5, %v5282_v32, 0 }
 0x14c   :  { %5595 = vmatprep.subr.bf16.mxu0 %v6123_v15 }
 0x14f   :  { %5596 = vmatpush3.bf16.msra.mxu0 %v5967_v35 }
 0x150   :  { %5601 = vmatprep.subr.bf16.mxu0 %v6123_v15 }
 0x152   :  { %5598 = vmatmul.mubr.msk.bf16.vlgmr.msra.gmra.mrb[4].mxu0 %vm87_vm0, %v131_v34 }
 0x153   :  { %5602 = vmatpush3.bf16.msra.mxu0 %v5968_v36  ;;  %5605 = vmatprep.mubr.msk.bf16.mxu0 %vm6124_vm1, %v6123_v15 }
 0x154   :  { %5603 = vmatprep.subr.bf16.mxu0 %v6123_v15 }
 0x157   :  { %5604 = vmatpush3.bf16.msra.mxu0 %v5969_v37 }
 0x158   :  { %5619 = vmatprep.subr.mxu0 %v6123_v15 }
 0x15a   :  { %5606 = vmatmul.mubr.msk.bf16.vlgmr.msra.gmra.mrb[8].mxu0 %vm87_vm0, %v131_v34 }
 0x15b   :  { %5621 = vmatprep.mubr.msk.f32.mxu0 %vm6124_vm1, %v6123_v15 }
 0x21d   :  { %v192_v39 = vpop.f32.mrb[0].mxu0 }
 0x21e   :  { %v193_v40 = vadd.f32 %v5254_v38, %v192_v39  ;;  %v5591_v41 = vpop.f32.mrb[1].mxu0 }
 0x21f   :  { %v195_v42 = vpop.f32.mrb[2].mxu0  ;;  %v557_v41 = vld [vmem:[%s7006_s6] sm:$0xf] }
 0x220   :  { %v6291_v43 = vadd.f32 %v5254_v38, %v195_v42  ;;  %331 = vxpose.xlu0.b32.start.end [1/1] (short) (narrow) %v193_v40, 32  ;;  %v5592_v44 = vpop.f32.mrb[3].mxu0  ;;  %v6372_v42 = vsel %vm761_vm5, %v557_v41, 0 }
 0x225   :  { %v258_v46 = vpop.f32.mrb[4].mxu0 }
 0x226   :  { %v6296_v47 = vadd.f32 %v5263_v45, %v258_v46  ;;  %v5599_v48 = vpop.f32.mrb[5].mxu0 }
 0x227   :  { %v261_v49 = vpop.f32.mrb[6].mxu0 }
 0x228   :  { %v6298_v50 = vadd.f32 %v5263_v45, %v261_v49  ;;  %590 = vrot.lane.b32.xlu1 %v6296_v47, %s6125_s25  ;;  %v5600_v51 = vpop.f32.mrb[7].mxu0  ;;  %5610 = vmatpush3.xpose.msk.msra.mxu1 %vm395_vm2, %v6296_v47 }
 0x229   :  { %5614 = vmatprep.subr.mxu1 %v6123_v15 }
 0x22d   :  { %v324_v52 = vpop.f32.mrb[8].mxu0 }
 0x22e   :  { %v5607_v53 = vpop.f32.mrb[9].mxu0  ;;  %v6314_v63 = vadd.f32 %v5272_v54, %v324_v52 }
 0x22f   :  { %v327_v55 = vpop.f32.mrb[10].mxu0 }
 0x230   :  { %v6308_v56 = vadd.f32 %v5272_v54, %v327_v55  ;;  %v5608_v57 = vpop.f32.mrb[11].mxu0 }
 0x29a   :  { %v591_v58 = vpop.permute.xlu1 %590 }
 0x29b   :  { %5620 = vmatpush3.xpose.msk.msra.mxu0 %vm395_vm2, %v591_v58 }
 0x29c   :  { %5629 = vmatprep.subr.bf16.mxu0 %v6123_v15 }
 0x2a0   :  { %v347_v59 = vpop.trf.xlu0 }
 0x2a1   :  { %363 = vxpose.xlu1.b32.start.end [1/1] (short) (narrow) %v347_v59, 8 }
 0x2a4   :  { %v348_v60 = vpop.trf.xlu0 }
 0x2a5   :  { %558 = vxpose.xlu0.b32.start.end [1/1] (short) (narrow) %v348_v60, 8 }
 0x2a8   :  { %v349_v61 = vpop.trf.xlu0 }
 0x2ac   :  { %v6312_v62 = vpop.trf.xlu0 }
 0x321   :  { %v379_v1 = vpop.trf.xlu1 }
 0x322   :  { %5612 = vmatmul.mubr.msk.f32.vlgmr.msra.gmra.mrb[0].mxu1 %vm395_vm2, %v379_v1 }
 0x323   :  { %5615 = vmatpush3.msra.mxu1 %v6314_v63  ;;  %5616 = vmatprep.mubr.msk.f32.mxu1 %vm6124_vm1, %v6123_v15 }
 0x324   :  { %5624 = vmatprep.subr.mxu1 %v6123_v15 }
 0x325   :  { %v574_v2 = vpop.trf.xlu0 }
 0x326   :  { %5622 = vmatmul.mubr.msk.f32.vlgmr.msra.gmra.mrb[12].mxu0 %vm395_vm2, %v574_v2 }
 0x327   :  { %5631 = vmatprep.mubr.msk.bf16.mxu0 %vm6124_vm1, %v6123_v15  ;;  %5630 = vmatpush3.bf16.msra.mxu0 %v6355_v33 }
 0x328   :  { %5641 = vmatprep.subr.mxu0 %v6123_v15 }
 0x3f5   :  { %v468_v13 = vpop.f32.mrb[0].mxu1 }
 0x3f6   :  { %v469_v14 = vadd.f32 %v468_v13, %v6339_v12  ;;  %v5613_v16 = vpop.f32.mrb[1].mxu1 }
 0x3f8   :  { %v472_v17 = vsel %vm395_vm2, %v469_v14, -inf }
 0x3f9   :  { %473 = vmax.xlane.f32.xlu0 %v472_v17  ;;  %v663_v18 = vpop.f32.mrb[12].mxu0 }
 0x3fa   :  { %v664_v19 = vadd.f32 %v663_v18, %v6339_v12  ;;  %v5623_v20 = vpop.f32.mrb[13].mxu0 }
 0x3fc   :  { %v667_v21 = vsel %vm395_vm2, %v664_v19, -inf }
 0x3fd   :  { %668 = vmax.xlane.f32.xlu1 %v667_v21 }
 0x40f   :  { %679 = vrot.lane.b32.xlu0 %v6314_v63, %s6125_s25 }
 0x486   :  { %v474_v22 = vpop.xlane.xlu0 %473 }
 0x487   :  { %v475_v23 = vsub.f32 %v469_v14, %v474_v22 }
 0x489   :  { %v476_v24 = vmul.f32 1.442695, %v475_v23 }
 0x48a   :  { %v669_v25 = vpop.xlane.xlu1 %668  ;;  %v680_v38 = vpop.permute.xlu0 %679 }
 0x48b   :  { %6002 = vpow2.f32 %v476_v24  ;;  %v670_v26 = vsub.f32 %v664_v19, %v669_v25 }
 0x48d   :  { %v671_v27 = vmul.f32 1.442695, %v670_v26 }
 0x48f   :  { %6004 = vpow2.f32 %v671_v27 }
 0x495   :  { %v6003_v28 = vpop.eup %6002 }
 0x496   :  { %v478_v29 = vsel %vm395_vm2, %v6003_v28, 0.0 }
 0x497   :  { %479 = vadd.xlane.f32.xlu1 %v478_v29 }
 0x499   :  { %v6005_v30 = vpop.eup %6004 }
 0x49a   :  { %v673_v31 = vsel %vm395_vm2, %v6005_v30, 0.0 }
 0x49b   :  { %674 = vadd.xlane.f32.xlu1 %v673_v31 }
 0x4ac   :  { %883 = vrot.lane.b32.xlu1 %v6296_v47, %s6126_s19 }
 0x4d5   :  { %851 = vxpose.xlu1.b32.start.end [1/1] (short) (narrow) %v349_v61, 8 }
 0x4f3   :  { %1129 = vrot.lane.b32.xlu1 %v6296_v47, %s6127_s21 }
 0x524   :  { %v480_v34 = vpop.xlane.xlu1 %479 }
 0x525   :  { %6006 = vrcp.f32 %v480_v34 }
 0x528   :  { %v675_v35 = vpop.xlane.xlu1 %674 }
 0x529   :  { %6008 = vrcp.f32 %v675_v35 }
 0x52c   :  { %v884_v52 = vpop.permute.xlu1 %883 }
 0x52f   :  { %v6007_v36 = vpop.eup %6006 }
 0x530   :  { %v482_v37 = vmul.f32 %v6007_v36, %v6003_v28 }
 0x532   :  { %5617 = vmatmul.mubr.msk.f32.vlgmr.msra.gmra.mrb[2].mxu1 %vm395_vm2, %v482_v37 }
 0x533   :  { %v6009_v39 = vpop.eup %6008  ;;  %5625 = vmatpush3.msra.mxu1 %v680_v38  ;;  %5626 = vmatprep.mubr.msk.f32.mxu1 %vm6124_vm1, %v6123_v15 }
 0x534   :  { %v677_v40 = vmul.f32 %v6009_v39, %v6005_v30  ;;  %5635 = vmatprep.subr.bf16.mxu1 %v6123_v15 }
 0x536   :  { %5627 = vmatmul.mubr.msk.f32.vlgmr.msra.gmra.mrb[4].mxu1 %vm395_vm2, %v677_v40 }
 0x537   :  { %5637 = vmatprep.mubr.msk.bf16.mxu1 %vm6124_vm1, %v6123_v15  ;;  %5636 = vmatpush3.bf16.msra.mxu1 %v6372_v42 }
 0x538   :  { %5646 = vmatprep.subr.mxu1 %v6123_v15 }
 0x555   :  { %v867_v53 = vpop.trf.xlu1 }
 0x565   :  { %v1130_v21 = vpop.permute.xlu1 %1129 }
 0x605   :  { %v552_v44 = vpop.f32.mrb[2].mxu1 }
 0x606   :  { %v556_v45 = vpack.c.bf16 %v552_v44, %v552_v44  ;;  %v5618_v46 = vpop.f32.mrb[3].mxu1 }
 0x607   :  { %v5293_v46 = vld [vmem:[%s7006_s6 + $0xc] sm:$0xf] }
 0x608   :  { %5638 = vmatmul.mubr.msk.bf16.vlgmr.msra.gmra.mrb[8].mxu1 %vm395_vm2, %v556_v45 }
 0x609   :  { %v751_v48 = vpop.f32.mrb[4].mxu1  ;;  %5648 = vmatprep.mubr.msk.f32.mxu1 %vm6124_vm1, %v6123_v15 }
 0x60a   :  { %v755_v49 = vpack.c.bf16 %v751_v48, %v751_v48  ;;  %v5628_v51 = vpop.f32.mrb[5].mxu1  ;;  %v6426_v48 = vsel %vm761_vm5, %v5293_v46, 0 }
 0x60c   :  { %5632 = vmatmul.mubr.msk.bf16.vlgmr.msra.gmra.mrb[16].mxu0 %vm395_vm2, %v755_v49 }
 0x60d   :  { %5642 = vmatpush3.xpose.msk.msra.mxu0 %vm395_vm2, %v884_v52  ;;  %5643 = vmatprep.mubr.msk.f32.mxu0 %vm6124_vm1, %v6123_v15 }
 0x60e   :  { %5651 = vmatprep.subr.bf16.mxu0 %v6123_v15 }
 0x614   :  { %5644 = vmatmul.mubr.msk.f32.vlgmr.msra.gmra.mrb[14].mxu0 %vm395_vm2, %v867_v53 }
 0x615   :  { %5653 = vmatprep.mubr.msk.bf16.mxu0 %vm6124_vm1, %v6123_v15 }
 0x6db   :  { %v845_v54 = vpop.f32.mrb[8].mxu1 }
 0x6dc   :  { %v5639_v55 = vpop.f32.mrb[9].mxu1 }
 0x6dd   :  { %v848_v57 = vpop.f32.mrb[10].mxu1 }
 0x6de   :  { %v5640_v58 = vpop.f32.mrb[11].mxu1 }
 0x6df   :  { %v799_v59 = vpop.f32.mrb[16].mxu0 }
 0x6e0   :  { %v846_v60 = vadd.f32 %v845_v54, %v799_v59  ;;  %v5633_v61 = vpop.f32.mrb[17].mxu0 }
 0x6e1   :  { %v802_v1 = vpop.f32.mrb[18].mxu0 }
 0x6e2   :  { %v5634_v2 = vpop.f32.mrb[19].mxu0  ;;  %v81_v1 = vsub.s32 1, %v6327_v5 }
 0x6e4   :  { %v82_v2 = vrot.slane %v6331_v8, %v81_v1 }
 0x6e7   :  { %v956_v3 = vpop.f32.mrb[14].mxu0 }
 0x6e8   :  { %v957_v4 = vadd.f32 %v956_v3, %v6339_v12  ;;  %v5645_v6 = vpop.f32.mrb[15].mxu0  ;;  %v83_v3 = vmax.f32 %v82_v2, %v6336_v10  ;;  %v6504_v2 = vld [vmem:[%s7007_s7] ss:$0 sm:$0xff] }
 0x6ea   :  { %v960_v7 = vsel %vm395_vm2, %v957_v4, -inf }
 0x6eb   :  { %961 = vmax.xlane.f32.xlu0 %v960_v7 }
 0x778   :  { %v962_v9 = vpop.xlane.xlu0 %961 }
 0x779   :  { %v963_v11 = vsub.f32 %v957_v4, %v962_v9  ;;  %v6456_v4 = vmul.f32 -10000.0, %v83_v3 }
 0x77b   :  { %v964_v13 = vmul.f32 1.442695, %v963_v11 }
 0x77d   :  { %6010 = vpow2.f32 %v964_v13 }
 0x787   :  { %v6011_v14 = vpop.eup %6010 }
 0x788   :  { %v966_v16 = vsel %vm395_vm2, %v6011_v14, 0.0 }
 0x789   :  { %967 = vadd.xlane.f32.xlu0 %v966_v16 }
 0x79f   :  { %971 = vrot.lane.b32.xlu0 %v6314_v63, %s6126_s19 }
 0x7bd   :  { %1097 = vxpose.xlu0.b32.start.end [1/1] (short) (narrow) %v6312_v62, 8  ;;  %v5288_v62 = vld [vmem:[%s7006_s6 + $0x8] sm:$0xf] }
 0x7be   :  { %v6406_v23 = vsel %vm761_vm5, %v5288_v62, 0 }
 0x7bf   :  { %5652 = vmatpush3.bf16.msra.mxu0 %v6406_v23 }
 0x7c0   :  { %5667 = vmatprep.subr.bf16.mxu0 %v6123_v15 }
 0x816   :  { %v968_v17 = vpop.xlane.xlu0 %967 }
 0x817   :  { %6012 = vrcp.f32 %v968_v17 }
 0x81a   :  { %v972_v18 = vpop.permute.xlu0 %971 }
 0x81b   :  { %5647 = vmatpush3.msra.mxu1 %v972_v18 }
 0x81c   :  { %5657 = vmatprep.subr.mxu1 %v6123_v15 }
 0x821   :  { %v6013_v19 = vpop.eup %6012 }
 0x822   :  { %v970_v20 = vmul.f32 %v6013_v19, %v6011_v14 }
 0x824   :  { %5649 = vmatmul.mubr.msk.f32.vlgmr.msra.gmra.mrb[6].mxu1 %vm395_vm2, %v970_v20 }
 0x825   :  { %5658 = vmatpush3.xpose.msk.msra.mxu1 %vm395_vm2, %v1130_v21  ;;  %5659 = vmatprep.mubr.msk.f32.mxu1 %vm6124_vm1, %v6123_v15 }
 0x826   :  { %5662 = vmatprep.subr.mxu1 %v6123_v15 }
 0x83d   :  { %v1113_v22 = vpop.trf.xlu0 }
 0x83e   :  { %5660 = vmatmul.mubr.msk.f32.vlgmr.msra.gmra.mrb[12].mxu1 %vm395_vm2, %v1113_v22 }
 0x83f   :  { %5664 = vmatprep.mubr.msk.f32.mxu1 %vm6124_vm1, %v6123_v15 }
 0x8f7   :  { %v1043_v24 = vpop.f32.mrb[6].mxu1 }
 0x8f8   :  { %v1047_v25 = vpack.c.bf16 %v1043_v24, %v1043_v24  ;;  %v5650_v26 = vpop.f32.mrb[7].mxu1 }
 0x8fa   :  { %5654 = vmatmul.mubr.msk.bf16.vlgmr.msra.gmra.mrb[20].mxu0 %vm395_vm2, %v1047_v25 }
 0x8fb   :  { %5669 = vmatprep.mubr.msk.bf16.mxu0 %vm6124_vm1, %v6123_v15  ;;  %5668 = vmatpush3.bf16.msra.mxu0 %v6426_v48 }
 0x8fc   :  { %5683 = vmatprep.subr.mxu0 %v6123_v15 }
 0x911   :  { %v1202_v27 = vpop.f32.mrb[12].mxu1 }
 0x912   :  { %v1203_v28 = vadd.f32 %v1202_v27, %v6339_v12  ;;  %v5661_v29 = vpop.f32.mrb[13].mxu1 }
 0x914   :  { %v1206_v30 = vsel %vm395_vm2, %v1203_v28, -inf }
 0x915   :  { %1207 = vmax.xlane.f32.xlu1 %v1206_v30 }
 0x926   :  { %1217 = vrot.lane.b32.xlu1 %v6314_v63, %s6127_s21 }
 0x94f   :  { %1343 = vxpose.xlu1.b32.start.end [1/1] (short) (narrow) %v6291_v43, 32 }
 0x9a2   :  { %v1208_v31 = vpop.xlane.xlu1 %1207 }
 0x9a3   :  { %v1209_v32 = vsub.f32 %v1203_v28, %v1208_v31 }
 0x9a5   :  { %v1210_v34 = vmul.f32 1.442695, %v1209_v32 }
 0x9a6   :  { %v1218_v35 = vpop.permute.xlu1 %1217 }
 0x9a7   :  { %6014 = vpow2.f32 %v1210_v34  ;;  %5663 = vmatpush3.msra.mxu1 %v1218_v35 }
 0x9a8   :  { %5673 = vmatprep.subr.mxu1 %v6123_v15 }
 0x9b1   :  { %v6015_v36 = vpop.eup %6014 }
 0x9b2   :  { %v1212_v37 = vsel %vm395_vm2, %v6015_v36, 0.0 }
 0x9b3   :  { %1213 = vadd.xlane.f32.xlu0 %v1212_v37 }
 0x9c9   :  { %1600 = vrot.lane.b32.xlu0 %v6298_v50, %s6125_s25 }
 0x9cd   :  { %v1090_v38 = vpop.f32.mrb[20].mxu0 }
 0x9ce   :  { %v1096_v39 = vadd.f32 %v1090_v38, %v846_v60  ;;  %v5655_v40 = vpop.f32.mrb[21].mxu0 }
 0x9cf   :  { %v1093_v41 = vpop.f32.mrb[22].mxu0  ;;  %v1359_v44 = vpop.trf.xlu1 }
 0x9d0   :  { %v5656_v43 = vpop.f32.mrb[23].mxu0 }
 0x9d3   :  { %v1360_v45 = vpop.trf.xlu1 }
 0x9d4   :  { %1568 = vxpose.xlu1.b32.start.end [1/1] (short) (narrow) %v1360_v45, 8 }
 0x9d7   :  { %v1361_v55 = vpop.trf.xlu1 }
 0x9db   :  { %v6441_v60 = vpop.trf.xlu1 }
 0x9e7   :  { %1375 = vxpose.xlu0.b32.start.end [1/1] (short) (narrow) %v1359_v44, 8 }
 0xa40   :  { %v1214_v49 = vpop.xlane.xlu0 %1213 }
 0xa41   :  { %6016 = vrcp.f32 %v1214_v49 }
 0xa44   :  { %v1601_v53 = vpop.permute.xlu0 %1600 }
 0xa4b   :  { %v6017_v51 = vpop.eup %6016 }
 0xa4c   :  { %v1216_v52 = vmul.f32 %v6017_v51, %v6015_v36 }
 0xa4e   :  { %5665 = vmatmul.mubr.msk.f32.vlgmr.msra.gmra.mrb[14].mxu1 %vm395_vm2, %v1216_v52 }
 0xa4f   :  { %5674 = vmatpush3.xpose.msk.msra.mxu1 %vm395_vm2, %v6298_v50  ;;  %5675 = vmatprep.mubr.msk.f32.mxu1 %vm6124_vm1, %v6123_v15 }
 0xa50   :  { %5678 = vmatprep.subr.mxu1 %v6123_v15 }
 0xa54   :  { %v1584_v61 = vpop.trf.xlu1 }
 0xa67   :  { %v1391_v54 = vpop.trf.xlu0 }
 0xa68   :  { %5676 = vmatmul.mubr.msk.f32.vlgmr.msra.gmra.mrb[16].mxu1 %vm395_vm2, %v1391_v54 }
 0xa69   :  { %5679 = vmatpush3.msra.mxu1 %v6308_v56  ;;  %5680 = vmatprep.mubr.msk.f32.mxu1 %vm6124_vm1, %v6123_v15 }
 0xa6a   :  { %5688 = vmatprep.subr.mxu1 %v6123_v15 }
 0xb21   :  { %v1289_v57 = vpop.f32.mrb[14].mxu1 }
 0xb22   :  { %v1293_v58 = vpack.c.bf16 %v1289_v57, %v1289_v57  ;;  %v5666_v59 = vpop.f32.mrb[15].mxu1 }
 0xb24   :  { %5670 = vmatmul.mubr.msk.bf16.vlgmr.msra.gmra.mrb[24].mxu0 %vm395_vm2, %v1293_v58 }
 0xb25   :  { %5684 = vmatpush3.xpose.msk.msra.mxu0 %vm395_vm2, %v1601_v53  ;;  %5685 = vmatprep.mubr.msk.f32.mxu0 %vm6124_vm1, %v6123_v15 }
 0xb26   :  { %5693 = vmatprep.subr.bf16.mxu0 %v6123_v15 }
 0xb2c   :  { %5686 = vmatmul.mubr.msk.f32.vlgmr.msra.gmra.mrb[28].mxu0 %vm395_vm2, %v1584_v61 }
 0xb2d   :  { %5694 = vmatpush3.bf16.msra.mxu0 %v6355_v33  ;;  %5695 = vmatprep.mubr.msk.bf16.mxu0 %vm6124_vm1, %v6123_v15 }
 0xb2e   :  { %5705 = vmatprep.subr.mxu0 %v6123_v15 }
 0xb3b   :  { %v1479_v6 = vpop.f32.mrb[16].mxu1 }
 0xb3c   :  { %v1480_v7 = vadd.f32 %v1479_v6, %v6456_v4  ;;  %v5677_v9 = vpop.f32.mrb[17].mxu1 }
 0xb3e   :  { %v1483_v11 = vsel %vm395_vm2, %v1480_v7, -inf }
 0xb3f   :  { %1484 = vmax.xlane.f32.xlu1 %v1483_v11 }
 0xbcc   :  { %v1485_v5 = vpop.xlane.xlu1 %1484 }
 0xbcd   :  { %v1486_v33 = vsub.f32 %v1480_v7, %v1485_v5 }
 0xbcf   :  { %v1487_v13 = vmul.f32 1.442695, %v1486_v33 }
 0xbd1   :  { %6018 = vpow2.f32 %v1487_v13 }
 0xbdb   :  { %v6019_v14 = vpop.eup %6018 }
 0xbdc   :  { %v1489_v16 = vsel %vm395_vm2, %v6019_v14, 0.0 }
 0xbdd   :  { %1490 = vadd.xlane.f32.xlu1 %v1489_v16 }
 0xbf7   :  { %v1336_v8 = vpop.f32.mrb[24].mxu0 }
 0xbf8   :  { %v6461_v17 = vadd.f32 %v1336_v8, %v1096_v39  ;;  %v5671_v10 = vpop.f32.mrb[25].mxu0 }
 0xbf9   :  { %v1339_v18 = vpop.f32.mrb[26].mxu0 }
 0xbfa   :  { %v5672_v19 = vpop.f32.mrb[27].mxu0  ;;  %v2334_v1 = vadd.f32 %v6461_v17, %v6232_v0 }
 0xbfc   :  { %v6507_v3 = vadd.f32 %v6504_v2, %v2334_v1 }
 0xbfe   :  { %v2347_v6 = vsel %vm87_vm0, %v6507_v3, 0.0 }
 0xbff   :  { %v1673_v20 = vpop.f32.mrb[28].mxu0 }
 0xc00   :  { %v1674_v21 = vadd.f32 %v1673_v20, %v6456_v4  ;;  %v5687_v22 = vpop.f32.mrb[29].mxu0 }
 0xc02   :  { %v1677_v62 = vsel %vm395_vm2, %v1674_v21, -inf }
 0xc03   :  { %1678 = vmax.xlane.f32.xlu0 %v1677_v62 }
 0xc19   :  { %1884 = vrot.lane.b32.xlu0 %v6298_v50, %s6126_s19 }
 0xc6a   :  { %v1491_v24 = vpop.xlane.xlu1 %1490 }
 0xc6b   :  { %6020 = vrcp.f32 %v1491_v24 }
 0xc75   :  { %v6021_v25 = vpop.eup %6020 }
 0xc76   :  { %v1493_v26 = vmul.f32 %v6021_v25, %v6019_v14 }
 0xc78   :  { %5681 = vmatmul.mubr.msk.f32.vlgmr.msra.gmra.mrb[18].mxu1 %vm395_vm2, %v1493_v26 }
 0xc79   :  { %5690 = vmatprep.mubr.msk.f32.mxu1 %vm6124_vm1, %v6123_v15 }
 0xc90   :  { %v1679_v27 = vpop.xlane.xlu0 %1678 }
 0xc91   :  { %v1680_v28 = vsub.f32 %v1674_v21, %v1679_v27 }
 0xc93   :  { %v1681_v29 = vmul.f32 1.442695, %v1680_v28 }
 0xc94   :  { %v1885_v44 = vpop.permute.xlu0 %1884 }
 0xc95   :  { %6022 = vpow2.f32 %v1681_v29 }
 0xc9f   :  { %v6023_v30 = vpop.eup %6022 }
 0xca0   :  { %v1683_v31 = vsel %vm395_vm2, %v6023_v30, 0.0 }
 0xca1   :  { %1684 = vadd.xlane.f32.xlu1 %v1683_v31 }
 0xcb2   :  { %1689 = vrot.lane.b32.xlu1 %v6308_v56, %s6125_s25 }
 0xcdb   :  { %1852 = vxpose.xlu1.b32.start.end [1/1] (short) (narrow) %v1361_v55, 8 }
 0xd2e   :  { %v1685_v32 = vpop.xlane.xlu1 %1684 }
 0xd2f   :  { %6024 = vrcp.f32 %v1685_v32 }
 0xd32   :  { %v1690_v34 = vpop.permute.xlu1 %1689 }
 0xd33   :  { %5689 = vmatpush3.msra.mxu1 %v1690_v34 }
 0xd34   :  { %5699 = vmatprep.subr.bf16.mxu1 %v6123_v15 }
 0xd39   :  { %v6025_v35 = vpop.eup %6024 }
 0xd3a   :  { %v1687_v36 = vmul.f32 %v6025_v35, %v6023_v30 }
 0xd3c   :  { %5691 = vmatmul.mubr.msk.f32.vlgmr.msra.gmra.mrb[20].mxu1 %vm395_vm2, %v1687_v36 }
 0xd3d   :  { %5700 = vmatpush3.bf16.msra.mxu1 %v6372_v42  ;;  %5701 = vmatprep.mubr.msk.bf16.mxu1 %vm6124_vm1, %v6123_v15 }
 0xd3e   :  { %5710 = vmatprep.subr.mxu1 %v6123_v15 }
 0xd4b   :  { %v1563_v37 = vpop.f32.mrb[18].mxu1 }
 0xd4c   :  { %v1567_v38 = vpack.c.bf16 %v1563_v37, %v1563_v37  ;;  %v5682_v39 = vpop.f32.mrb[19].mxu1 }
 0xd4e   :  { %5702 = vmatmul.mubr.msk.bf16.vlgmr.msra.gmra.mrb[24].mxu1 %vm395_vm2, %v1567_v38 }
 0xd4f   :  { %5712 = vmatprep.mubr.msk.f32.mxu1 %vm6124_vm1, %v6123_v15 }
 0xd5b   :  { %v1868_v42 = vpop.trf.xlu1 }
 0xe0f   :  { %v1761_v40 = vpop.f32.mrb[20].mxu1 }
 0xe10   :  { %v1765_v41 = vpack.c.bf16 %v1761_v40, %v1761_v40  ;;  %v5692_v43 = vpop.f32.mrb[21].mxu1 }
 0xe12   :  { %5696 = vmatmul.mubr.msk.bf16.vlgmr.msra.gmra.mrb[32].mxu0 %vm395_vm2, %v1765_v41 }
 0xe13   :  { %5706 = vmatpush3.xpose.msk.msra.mxu0 %vm395_vm2, %v1885_v44  ;;  %5707 = vmatprep.mubr.msk.f32.mxu0 %vm6124_vm1, %v6123_v15 }
 0xe14   :  { %5715 = vmatprep.subr.bf16.mxu0 %v6123_v15 }
 0xe1a   :  { %5708 = vmatmul.mubr.msk.f32.vlgmr.msra.gmra.mrb[30].mxu0 %vm395_vm2, %v1868_v42 }
 0xe1b   :  { %5716 = vmatpush3.bf16.msra.mxu0 %v6406_v23  ;;  %5717 = vmatprep.mubr.msk.bf16.mxu0 %vm6124_vm1, %v6123_v15 }
 0xe1c   :  { %5731 = vmatprep.subr.bf16.mxu0 %v6123_v15 }
 0xe21   :  { %v1846_v45 = vpop.f32.mrb[24].mxu1 }
 0xe22   :  { %v5703_v46 = vpop.f32.mrb[25].mxu1 }
 0xe23   :  { %v1849_v49 = vpop.f32.mrb[26].mxu1 }
 0xe24   :  { %v5704_v51 = vpop.f32.mrb[27].mxu1  ;;  %v6098_v49 = vld [vmem:[%s7024_s29 + $0x8] sm:$0xff] }
 0xee5   :  { %v1803_v52 = vpop.f32.mrb[32].mxu0 }
 0xee6   :  { %v1847_v53 = vadd.f32 %v1846_v45, %v1803_v52  ;;  %v5697_v54 = vpop.f32.mrb[33].mxu0 }
 0xee7   :  { %v1806_v55 = vpop.f32.mrb[34].mxu0 }
 0xee8   :  { %v5698_v57 = vpop.f32.mrb[35].mxu0 }
 0xeed   :  { %v1957_v58 = vpop.f32.mrb[30].mxu0 }
 0xeee   :  { %v1958_v59 = vadd.f32 %v1957_v58, %v6456_v4  ;;  %v5709_v61 = vpop.f32.mrb[31].mxu0 }
 0xef0   :  { %v1961_v23 = vsel %vm395_vm2, %v1958_v59, -inf }
 0xef1   :  { %1962 = vmax.xlane.f32.xlu0 %v1961_v23 }
 0xf07   :  { %1972 = vrot.lane.b32.xlu0 %v6308_v56, %s6126_s19 }
 0xf0b   :  { %2125 = vrot.lane.b32.xlu0 %v6298_v50, %s6127_s21 }
 0xf29   :  { %2093 = vxpose.xlu0.b32.start.end [1/1] (short) (narrow) %v6441_v60, 8 }
 0xf56   :  { %2348 = vadd.xlane.f32.xlu0 %v2347_v6  ;;  %v5971_v6 = vld [vmem:[%s7010_s10 + $0x8] sm:$0xff]  }
 0xf7e   :  { %v1963_v7 = vpop.xlane.xlu0 %1962 }
 0xf7f   :  { %v1964_v9 = vsub.f32 %v1958_v59, %v1963_v7 }
 0xf81   :  { %v1965_v11 = vmul.f32 1.442695, %v1964_v9 }
 0xf82   :  { %v1973_v5 = vpop.permute.xlu0 %1972 }
 0xf83   :  { %6026 = vpow2.f32 %v1965_v11  ;;  %5711 = vmatpush3.msra.mxu1 %v1973_v5 }
 0xf84   :  { %5721 = vmatprep.subr.mxu1 %v6123_v15 }
 0xf86   :  { %v2126_v16 = vpop.permute.xlu0 %2125 }
 0xf8d   :  { %v6027_v0 = vpop.eup %6026 }
 0xf8e   :  { %v1967_v60 = vsel %vm395_vm2, %v6027_v0, 0.0 }
 0xf8f   :  { %1968 = vadd.xlane.f32.xlu1 %v1967_v60 }
 0xfa9   :  { %v2109_v8 = vpop.trf.xlu0 }
 0xfe3   :  { %v2349_v40 = vpop.xlane.xlu0 %2348 }
 0xfe4   :  { %v2353_v41 = vmul.f32 0.03125, %v2349_v40 }
 0xfe6   :  { %v2355_v46 = vsub.f32 %v6507_v3, %v2353_v41 }
 0xfe8   :  { %v2357_v55 = vmul.f32 %v2355_v46, %v2355_v46 }
 0xfea   :  { %v2359_v57 = vsel %vm87_vm0, %v2357_v55, 0.0 }
0x101c   :  { %v1969_v33 = vpop.xlane.xlu1 %1968 }
0x101d   :  { %6028 = vrcp.f32 %v1969_v33 }
0x1027   :  { %v6029_v13 = vpop.eup %6028 }
0x1028   :  { %v1971_v14 = vmul.f32 %v6029_v13, %v6027_v0 }
0x102a   :  { %5713 = vmatmul.mubr.msk.f32.vlgmr.msra.gmra.mrb[22].mxu1 %vm395_vm2, %v1971_v14  ;;  %v5312_v14 = vld [vmem:[%s7008_s8] ss:$0 sm:$0xff] }
0x102b   :  { %5722 = vmatpush3.xpose.msk.msra.mxu1 %vm395_vm2, %v2126_v16  ;;  %5723 = vmatprep.mubr.msk.f32.mxu1 %vm6124_vm1, %v6123_v15 }
0x102c   :  { %5726 = vmatprep.subr.mxu1 %v6123_v15 }
0x102e   :  { %5724 = vmatmul.mubr.msk.f32.vlgmr.msra.gmra.mrb[28].mxu1 %vm395_vm2, %v2109_v8 }
0x102f   :  { %5728 = vmatprep.mubr.msk.f32.mxu1 %vm6124_vm1, %v6123_v15 }
0x10fd   :  { %v2044_v17 = vpop.f32.mrb[22].mxu1 }
0x10fe   :  { %v2048_v10 = vpack.c.bf16 %v2044_v17, %v2044_v17  ;;  %v5714_v18 = vpop.f32.mrb[23].mxu1 }
0x1100   :  { %5718 = vmatmul.mubr.msk.bf16.vlgmr.msra.gmra.mrb[36].mxu0 %vm395_vm2, %v2048_v10  ;;  %v5313_v10 = vld [vmem:[%s7009_s9] ss:$0 sm:$0xff] }
0x1101   :  { %v2198_v19 = vpop.f32.mrb[28].mxu1  ;;  %5732 = vmatpush3.bf16.msra.mxu0 %v6426_v48  ;;  %5733 = vmatprep.mubr.msk.bf16.mxu0 %vm6124_vm1, %v6123_v15 }
0x1102   :  { %v2199_v20 = vadd.f32 %v2198_v19, %v6456_v4  ;;  %v5725_v21 = vpop.f32.mrb[29].mxu1  ;;  %5745 = vmatprep.subr.bf16.mxu0 %v6123_v15 }
0x1104   :  { %v2202_v22 = vsel %vm395_vm2, %v2199_v20, -inf }
0x1105   :  { %2203 = vmax.xlane.f32.xlu1 %v2202_v22  ;;  %v5972_v22 = vld [vmem:[%s7012_s12] sm:$0xff]  }
0x1192   :  { %v2204_v62 = vpop.xlane.xlu1 %2203 }
0x1193   :  { %v2205_v24 = vsub.f32 %v2199_v20, %v2204_v62  ;;  %v5973_v62 = vld [vmem:[%s7012_s12 + $0x8] sm:$0xff]  }
0x1195   :  { %v2206_v25 = vmul.f32 1.442695, %v2205_v24  ;;  %v5974_v24 = vld [vmem:[%s7012_s12 + $0x10] sm:$0xff]  }
0x1197   :  { %6030 = vpow2.f32 %v2206_v25  ;;  %v5975_v25 = vld [vmem:[%s7012_s12 + $0x18] sm:$0xff]  }
0x11a1   :  { %v6031_v26 = vpop.eup %6030 }
0x11a2   :  { %v2208_v27 = vsel %vm395_vm2, %v6031_v26, 0.0 }
0x11a3   :  { %2209 = vadd.xlane.f32.xlu1 %v2208_v27  ;;  %v5977_v27 = vld [vmem:[%s7012_s12 + $0x28] sm:$0xff]  }
0x11b4   :  { %2213 = vrot.lane.b32.xlu1 %v6308_v56, %s6127_s21 }
0x11d3   :  { %v2086_v48 = vpop.f32.mrb[36].mxu0 }
0x11d4   :  { %v2092_v28 = vadd.f32 %v2086_v48, %v1847_v53  ;;  %v5719_v29 = vpop.f32.mrb[37].mxu0  ;;  %v5978_v48 = vld [vmem:[%s7012_s12 + $0x30] sm:$0xff]  }
0x11d5   :  { %v2089_v30 = vpop.f32.mrb[38].mxu0  ;;  %v5314_v29 = vld [vmem:[%s7011_s11] ss:$0 sm:$0xff] }
0x11d6   :  { %v5720_v31 = vpop.f32.mrb[39].mxu0 }
0x1230   :  { %v2210_v32 = vpop.xlane.xlu1 %2209 }
0x1231   :  { %6032 = vrcp.f32 %v2210_v32 }
0x1234   :  { %v2214_v34 = vpop.permute.xlu1 %2213 }
0x1235   :  { %5727 = vmatpush3.msra.mxu1 %v2214_v34 }
0x1236   :  { %5737 = vmatprep.subr.bf16.mxu1 %v6123_v15 }
0x123b   :  { %v6033_v35 = vpop.eup %6032 }
0x123c   :  { %v2212_v36 = vmul.f32 %v6033_v35, %v6031_v26  ;;  %v5976_v26 = vld [vmem:[%s7012_s12 + $0x20] sm:$0xff]  }
0x123e   :  { %5729 = vmatmul.mubr.msk.f32.vlgmr.msra.gmra.mrb[30].mxu1 %vm395_vm2, %v2212_v36 }
0x123f   :  { %5741 = vmatprep.mubr.msk.bf16.mxu1 %vm6124_vm1, %v6123_v15 }
0x1311   :  { %v2285_v37 = vpop.f32.mrb[30].mxu1 }
0x1312   :  { %v2289_v38 = vpack.c.bf16 %v2285_v37, %v2285_v37  ;;  %v5730_v39 = vpop.f32.mrb[31].mxu1 }
0x1314   :  { %5734 = vmatmul.mubr.msk.bf16.vlgmr.msra.gmra.mrb[40].mxu0 %vm395_vm2, %v2289_v38 }
0x1315   :  { %5761 = vmatprep.mubr.msk.bf16.mxu0 %vm6124_vm1, %v6123_v15  ;;  %5746 = vmatpush3.bf16.msra.mxu0 %v5972_v22 }
0x1316   :  { %5747 = vmatprep.subr.bf16.mxu0 %v6123_v15 }
0x1319   :  { %5748 = vmatpush3.bf16.msra.mxu0 %v5973_v62 }
0x131a   :  { %5749 = vmatprep.subr.bf16.mxu0 %v6123_v15 }
0x131d   :  { %5750 = vmatpush3.bf16.msra.mxu0 %v5974_v24 }
0x131e   :  { %5751 = vmatprep.subr.bf16.mxu0 %v6123_v15 }
0x1321   :  { %5752 = vmatpush3.bf16.msra.mxu0 %v5975_v25 }
0x1322   :  { %5753 = vmatprep.subr.bf16.mxu0 %v6123_v15 }
0x1325   :  { %5754 = vmatpush3.bf16.msra.mxu0 %v5976_v26  ;;  %v5332_v26 = vld [vmem:[%s7003_s3 + $0x1] ss:$0 sm:$0xff] }
0x1326   :  { %5755 = vmatprep.subr.bf16.mxu0 %v6123_v15 }
0x1329   :  { %5756 = vmatpush3.bf16.msra.mxu0 %v5977_v27 }
0x132a   :  { %5757 = vmatprep.subr.bf16.mxu0 %v6123_v15 }
0x132d   :  { %5758 = vmatpush3.bf16.msra.mxu0 %v5978_v48 }
0x132e   :  { %5759 = vmatprep.subr.bf16.mxu0 %v6123_v15 }
0x13e7   :  { %v2327_v43 = vpop.f32.mrb[40].mxu0 }
0x13e8   :  { %v2333_v44 = vadd.f32 %v2327_v43, %v2092_v28  ;;  %v5735_v42 = vpop.f32.mrb[41].mxu0  ;;  %v5979_v28 = vld [vmem:[%s7012_s12 + $0x38] sm:$0xff]  }
0x13e9   :  { %v2330_v45 = vpop.f32.mrb[42].mxu0  ;;  %5760 = vmatpush3.bf16.msra.mxu0 %v5979_v28 }
0x13ea   :  { %v2335_v51 = vadd.f32 %v6098_v49, %v2333_v44  ;;  %v5736_v52 = vpop.f32.mrb[43].mxu0  ;;  %5794 = vmatprep.subr.mxu0 %v6123_v15 }
0x13ec   :  { %v6543_v53 = vadd.f32 %v6504_v2, %v2335_v51  ;;  %v5970_v2 = vld [vmem:[%s7010_s10] sm:$0xff]  }
0x13ed   :  { %5738 = vmatpush3.bf16.msra.mxu1 %v5970_v2  ;;  %v5320_v51 = vld [vmem:[%s7013_s13] ss:$0 sm:$0xff] }
0x13ee   :  { %v2350_v54 = vsel %vm87_vm0, %v6543_v53, 0.0  ;;  %5739 = vmatprep.subr.bf16.mxu1 %v6123_v15 }
0x13ef   :  { %2351 = vadd.xlane.f32.xlu1 %v2350_v54 }
0x13f1   :  { %5740 = vmatpush3.bf16.msra.mxu1 %v5971_v6 }
0x13f2   :  { %5765 = vmatprep.subr.bf16.mxu1 %v6123_v15 }
0x13f3   :  { %2360 = vadd.xlane.f32.xlu1 %v2359_v57 }
0x147c   :  { %v2352_v58 = vpop.xlane.xlu1 %2351 }
0x147d   :  { %v2354_v59 = vmul.f32 0.03125, %v2352_v58 }
0x147f   :  { %v2356_v61 = vsub.f32 %v6543_v53, %v2354_v59 }
0x1480   :  { %v2361_v7 = vpop.xlane.xlu1 %2360 }
0x1481   :  { %v2358_v23 = vmul.f32 %v2356_v61, %v2356_v61  ;;  %v2365_v9 = vmul.f32 0.03125, %v2361_v7 }
0x1483   :  { %v2362_v1 = vsel %vm87_vm0, %v2358_v23, 0.0  ;;  %v2367_v11 = vadd.f32 1e-05, %v2365_v9 }
0x1484   :  { %2363 = vadd.xlane.f32.xlu0 %v2362_v1 }
0x1485   :  { %6034 = vrsqrt.f32 %v2367_v11 }
0x148f   :  { %v6035_v33 = vpop.eup %6034 }
0x1490   :  { %v2371_v13 = vmul.f32 %v6035_v33, %v2355_v46 }
0x1492   :  { %v2379_v8 = vmul.f32 %v5312_v14, %v2371_v13  ;;  %v5980_v13 = vld [vmem:[%s7004_s4 + $0x30] sm:$0xff]  }
0x1494   :  { %v2387_v19 = vadd.f32 %v5313_v10, %v2379_v8 }
0x1511   :  { %v2364_v5 = vpop.xlane.xlu0 %2363 }
0x1512   :  { %v2366_v0 = vmul.f32 0.03125, %v2364_v5 }
0x1514   :  { %v2368_v60 = vadd.f32 1e-05, %v2366_v0 }
0x1516   :  { %6036 = vrsqrt.f32 %v2368_v60 }
0x1520   :  { %v6037_v16 = vpop.eup %6036 }
0x1521   :  { %v2372_v17 = vmul.f32 %v6037_v16, %v2356_v61 }
0x1523   :  { %v2380_v18 = vmul.f32 %v5312_v14, %v2372_v17  ;;  %v5981_v14 = vld [vmem:[%s7004_s4 + $0x38] sm:$0xff]  }
0x1525   :  { %v2388_v20 = vadd.f32 %v5313_v10, %v2380_v18 }
0x1527   :  { %v2389_v21 = vpack.c.bf16 %v2388_v20, %v2387_v19 }
0x1529   :  { %5742 = vmatmul.mubr.msk.bf16.vlgmr.msra.gmra.mrb[32].mxu1 %vm87_vm0, %v2389_v21  ;;  %v5331_v21 = vld [vmem:[%s7025_s23 + $0x1] ss:$0 sm:$0xff] }
0x152a   :  { %5769 = vmatprep.mubr.msk.bf16.mxu1 %vm6124_vm1, %v6123_v15  ;;  %5766 = vmatpush3.bf16.msra.mxu1 %v5980_v13 }
0x152b   :  { %5767 = vmatprep.subr.bf16.mxu1 %v6123_v15 }
0x152e   :  { %5768 = vmatpush3.bf16.msra.mxu1 %v5981_v14 }
0x152f   :  { %5773 = vmatprep.subr.bf16.mxu1 %v6123_v15 }
0x15fc   :  { %v2450_v30 = vpop.f32.mrb[32].mxu1 }
0x15fd   :  { %v2451_v31 = vadd.f32 %v5314_v29, %v2450_v30  ;;  %v5743_v32 = vpop.f32.mrb[33].mxu1 }
0x15fe   :  { %v2453_v34 = vpop.f32.mrb[34].mxu1  ;;  %v5984_v32 = vld [vmem:[%s7004_s4 + $0x50] sm:$0xff]  }
0x15ff   :  { %v5318_v35 = vmul.f32 -1.442695, %v2451_v31  ;;  %v2454_v36 = vadd.f32 %v5314_v29, %v2453_v34  ;;  %v5744_v37 = vpop.f32.mrb[35].mxu1  ;;  %v5982_v29 = vld [vmem:[%s7004_s4 + $0x40] sm:$0xff]   ;;  %v5985_v34 = vld [vmem:[%s7004_s4 + $0x58] sm:$0xff]  }
0x1601   :  { %6038 = vpow2.f32 %v5318_v35  ;;  %v5319_v38 = vmul.f32 -1.442695, %v2454_v36  ;;  %v5338_v35 = vld [vmem:[%s7005_s5 + $0x3] ss:$0 sm:$0xff] }
0x1603   :  { %6040 = vpow2.f32 %v5319_v38 }
0x160b   :  { %v6039_v39 = vpop.eup %6038 }
0x160c   :  { %v2463_v40 = vadd.f32 1.0, %v6039_v39 }
0x160d   :  { %v6041_v41 = vpop.eup %6040 }
0x160e   :  { %6042 = vrcp.f32 %v2463_v40  ;;  %v2464_v43 = vadd.f32 1.0, %v6041_v41 }
0x1610   :  { %6044 = vrcp.f32 %v2464_v43  ;;  %v5347_v43 = vld [vmem:[%s7005_s5 + $0x4] ss:$0 sm:$0xff] }
0x1618   :  { %v6043_v44 = vpop.eup %6042 }
0x1619   :  { %v2469_v45 = vmul.f32 %v6043_v44, %v2451_v31  ;;  %v5983_v31 = vld [vmem:[%s7004_s4 + $0x48] sm:$0xff]  }
0x161a   :  { %v6045_v42 = vpop.eup %6044 }
0x161b   :  { %v2470_v46 = vmul.f32 %v6045_v42, %v2454_v36 }
0x161d   :  { %v2471_v49 = vpack.c.bf16 %v2470_v46, %v2469_v45 }
0x161f   :  { %5762 = vmatmul.mubr.bf16.vlgmr.msra.gmra.mrb[44].mxu0 %v2471_v49 }
0x1620   :  { %5796 = vmatprep.mubr.msk.f32.mxu0 %vm6124_vm1, %v6123_v15 }
0x16f2   :  { %v2577_v52 = vpop.f32.mrb[44].mxu0 }
0x16f3   :  { %v2578_v54 = vadd.f32 %v5320_v51, %v2577_v52  ;;  %v5763_v55 = vpop.f32.mrb[45].mxu0  ;;  %v5356_v52 = vld [vmem:[%s7005_s5 + $0x5] ss:$0 sm:$0xff] }
0x16f4   :  { %v2580_v57 = vpop.f32.mrb[46].mxu0 }
0x16f5   :  { %v6608_v58 = vadd.f32 %v2578_v54, %v6507_v3  ;;  %v2581_v59 = vadd.f32 %v5320_v51, %v2580_v57  ;;  %v5764_v61 = vpop.f32.mrb[47].mxu0 }
0x16f7   :  { %v6611_v23 = vadd.f32 %v2581_v59, %v6543_v53  ;;  %v2590_v1 = vsel %vm87_vm0, %v6608_v58, 0.0 }
0x16f8   :  { %2591 = vadd.xlane.f32.xlu1 %v2590_v1 }
0x16f9   :  { %v2593_v2 = vsel %vm87_vm0, %v6611_v23, 0.0 }
0x16fa   :  { %2594 = vadd.xlane.f32.xlu0 %v2593_v2 }
0x1785   :  { %v2592_v6 = vpop.xlane.xlu1 %2591 }
0x1786   :  { %v2596_v7 = vmul.f32 0.03125, %v2592_v6 }
0x1787   :  { %v2595_v9 = vpop.xlane.xlu0 %2594 }
0x1788   :  { %v2598_v11 = vsub.f32 %v6608_v58, %v2596_v7  ;;  %v2597_v3 = vmul.f32 0.03125, %v2595_v9 }
0x178a   :  { %v2599_v5 = vsub.f32 %v6611_v23, %v2597_v3  ;;  %v2600_v0 = vmul.f32 %v2598_v11, %v2598_v11 }
0x178c   :  { %v2602_v53 = vsel %vm87_vm0, %v2600_v0, 0.0  ;;  %v2601_v60 = vmul.f32 %v2599_v5, %v2599_v5 }
0x178d   :  { %2603 = vadd.xlane.f32.xlu1 %v2602_v53 }
0x178e   :  { %v2605_v33 = vsel %vm87_vm0, %v2601_v60, 0.0 }
0x178f   :  { %2606 = vadd.xlane.f32.xlu0 %v2605_v33 }
0x181a   :  { %v2604_v16 = vpop.xlane.xlu1 %2603 }
0x181b   :  { %v2608_v8 = vmul.f32 0.03125, %v2604_v16 }
0x181c   :  { %v2607_v17 = vpop.xlane.xlu0 %2606 }
0x181d   :  { %v2610_v10 = vadd.f32 1e-05, %v2608_v8  ;;  %v2609_v18 = vmul.f32 0.03125, %v2607_v17 }
0x181f   :  { %6046 = vrsqrt.f32 %v2610_v10  ;;  %v2611_v19 = vadd.f32 1e-05, %v2609_v18 }
0x1821   :  { %6048 = vrsqrt.f32 %v2611_v19 }
0x1829   :  { %v6047_v20 = vpop.eup %6046 }
0x182a   :  { %v2614_v22 = vmul.f32 %v6047_v20, %v2598_v11 }
0x182b   :  { %v6049_v62 = vpop.eup %6048 }
0x182c   :  { %v2622_v24 = vmul.f32 %v5331_v21, %v2614_v22  ;;  %v2615_v25 = vmul.f32 %v6049_v62, %v2599_v5 }
0x182e   :  { %v2623_v27 = vmul.f32 %v5331_v21, %v2615_v25  ;;  %v2630_v48 = vadd.f32 %v5332_v26, %v2622_v24 }
0x1830   :  { %v2631_v28 = vadd.f32 %v5332_v26, %v2623_v27  ;;  %v5367_v26 = vld [vmem:[%s7006_s6 + $0x14] sm:$0xf] }
0x1831   :  { %v6710_v27 = vsel %vm761_vm5, %v5367_v26, 0 }
0x1832   :  { %v2632_v30 = vpack.c.bf16 %v2631_v28, %v2630_v48 }
0x1834   :  { %5770 = vmatmul.mubr.msk.bf16.vlgmr.msra.gmra.mrb[36].mxu1 %vm87_vm0, %v2632_v30 }
0x1835   :  { %5774 = vmatpush3.bf16.msra.mxu1 %v5982_v29  ;;  %5777 = vmatprep.mubr.msk.bf16.mxu1 %vm6124_vm1, %v6123_v15 }
0x1836   :  { %5775 = vmatprep.subr.bf16.mxu1 %v6123_v15 }
0x1839   :  { %5776 = vmatpush3.bf16.msra.mxu1 %v5983_v31 }
0x183a   :  { %5781 = vmatprep.subr.bf16.mxu1 %v6123_v15 }
0x183c   :  { %5778 = vmatmul.mubr.msk.bf16.vlgmr.msra.gmra.mrb[40].mxu1 %vm87_vm0, %v2632_v30 }
0x183d   :  { %5782 = vmatpush3.bf16.msra.mxu1 %v5984_v32  ;;  %5785 = vmatprep.mubr.msk.bf16.mxu1 %vm6124_vm1, %v6123_v15 }
0x183e   :  { %5783 = vmatprep.subr.bf16.mxu1 %v6123_v15 }
0x1841   :  { %5784 = vmatpush3.bf16.msra.mxu1 %v5985_v34 }
0x1842   :  { %5789 = vmatprep.subr.mxu1 %v6123_v15 }
0x1844   :  { %5786 = vmatmul.mubr.msk.bf16.vlgmr.msra.gmra.mrb[44].mxu1 %vm87_vm0, %v2632_v30 }
0x1845   :  { %5791 = vmatprep.mubr.msk.f32.mxu1 %vm6124_vm1, %v6123_v15 }
0x1907   :  { %v2695_v36 = vpop.f32.mrb[36].mxu1 }
0x1908   :  { %v2696_v37 = vadd.f32 %v5338_v35, %v2695_v36  ;;  %v5771_v38 = vpop.f32.mrb[37].mxu1 }
0x1909   :  { %v2698_v39 = vpop.f32.mrb[38].mxu1 }
0x190a   :  { %v6663_v40 = vadd.f32 %v5338_v35, %v2698_v39  ;;  %2834 = vxpose.xlu1.b32.start.end [1/1] (short) (narrow) %v2696_v37, 32  ;;  %v5772_v41 = vpop.f32.mrb[39].mxu1  ;;  %v5363_v35 = vld [vmem:[%s7006_s6 + $0x10] sm:$0xf] }
0x190b   :  { %v6727_v36 = vsel %vm761_vm5, %v5363_v35, 0 }
0x190f   :  { %v2761_v44 = vpop.f32.mrb[40].mxu1 }
0x1910   :  { %v6668_v42 = vadd.f32 %v5347_v43, %v2761_v44  ;;  %v5779_v45 = vpop.f32.mrb[41].mxu1 }
0x1911   :  { %v2764_v46 = vpop.f32.mrb[42].mxu1 }
0x1912   :  { %v6670_v49 = vadd.f32 %v5347_v43, %v2764_v46  ;;  %3093 = vrot.lane.b32.xlu0 %v6668_v42, %s6125_s25  ;;  %v5780_v51 = vpop.f32.mrb[43].mxu1  ;;  %5790 = vmatpush3.xpose.msk.msra.mxu1 %vm395_vm2, %v6668_v42 }
0x1913   :  { %5799 = vmatprep.subr.mxu1 %v6123_v15 }
0x1917   :  { %v2827_v54 = vpop.f32.mrb[44].mxu1 }
0x1918   :  { %v6680_v55 = vadd.f32 %v5356_v52, %v2827_v54  ;;  %v5787_v57 = vpop.f32.mrb[45].mxu1 }
0x1919   :  { %v2830_v59 = vpop.f32.mrb[46].mxu1 }
0x191a   :  { %v6682_v61 = vadd.f32 %v5356_v52, %v2830_v59  ;;  %v5788_v1 = vpop.f32.mrb[47].mxu1  ;;  %5795 = vmatpush3.msra.mxu0 %v6680_v55 }
0x191b   :  { %5804 = vmatprep.subr.mxu0 %v6123_v15 }
0x1984   :  { %v3094_v9 = vpop.permute.xlu0 %3093 }
0x198a   :  { %v2850_v2 = vpop.trf.xlu1 }
0x198b   :  { %2866 = vxpose.xlu0.b32.start.end [1/1] (short) (narrow) %v2850_v2, 8 }
0x198e   :  { %v2851_v6 = vpop.trf.xlu1 }
0x198f   :  { %3061 = vxpose.xlu1.b32.start.end [1/1] (short) (narrow) %v2851_v6, 8 }
0x1992   :  { %v2852_v7 = vpop.trf.xlu1 }
0x1996   :  { %v6686_v11 = vpop.trf.xlu1 }
0x1a0b   :  { %v2882_v3 = vpop.trf.xlu0 }
0x1a0c   :  { %5792 = vmatmul.mubr.msk.f32.vlgmr.msra.gmra.mrb[48].mxu1 %vm395_vm2, %v2882_v3 }
0x1a0d   :  { %5800 = vmatpush3.xpose.msk.msra.mxu1 %vm395_vm2, %v3094_v9  ;;  %5801 = vmatprep.mubr.msk.f32.mxu1 %vm6124_vm1, %v6123_v15 }
0x1a0e   :  { %5809 = vmatprep.subr.bf16.mxu1 %v6123_v15 }
0x1a0f   :  { %v3077_v5 = vpop.trf.xlu1 }
0x1a10   :  { %5802 = vmatmul.mubr.msk.f32.vlgmr.msra.gmra.mrb[50].mxu1 %vm395_vm2, %v3077_v5 }
0x1a11   :  { %5811 = vmatprep.mubr.msk.bf16.mxu1 %vm6124_vm1, %v6123_v15  ;;  %5810 = vmatpush3.bf16.msra.mxu1 %v6710_v27 }
0x1a12   :  { %5821 = vmatprep.subr.mxu1 %v6123_v15 }
0x1adf   :  { %v2970_v0 = vpop.f32.mrb[48].mxu1 }
0x1ae0   :  { %v2971_v53 = vadd.f32 %v2970_v0, %v6339_v12  ;;  %v5793_v60 = vpop.f32.mrb[49].mxu1 }
0x1ae2   :  { %v2974_v33 = vsel %vm395_vm2, %v2971_v53, -inf }
0x1ae3   :  { %2975 = vmax.xlane.f32.xlu0 %v2974_v33  ;;  %v3166_v13 = vpop.f32.mrb[50].mxu1 }
0x1ae4   :  { %v3167_v14 = vadd.f32 %v3166_v13, %v6339_v12  ;;  %v5803_v16 = vpop.f32.mrb[51].mxu1 }
0x1ae6   :  { %v3170_v8 = vsel %vm395_vm2, %v3167_v14, -inf }
0x1ae7   :  { %3171 = vmax.xlane.f32.xlu1 %v3170_v8 }
0x1b70   :  { %v2976_v17 = vpop.xlane.xlu0 %2975 }
0x1b71   :  { %v2977_v10 = vsub.f32 %v2971_v53, %v2976_v17 }
0x1b73   :  { %v2978_v18 = vmul.f32 1.442695, %v2977_v10 }
0x1b74   :  { %v3172_v19 = vpop.xlane.xlu1 %3171 }
0x1b75   :  { %6050 = vpow2.f32 %v2978_v18  ;;  %v3173_v20 = vsub.f32 %v3167_v14, %v3172_v19 }
0x1b77   :  { %v3174_v21 = vmul.f32 1.442695, %v3173_v20 }
0x1b79   :  { %6052 = vpow2.f32 %v3174_v21 }
0x1b7f   :  { %v6051_v22 = vpop.eup %6050 }
0x1b80   :  { %v2980_v62 = vsel %vm395_vm2, %v6051_v22, 0.0 }
0x1b81   :  { %2981 = vadd.xlane.f32.xlu0 %v2980_v62 }
0x1b83   :  { %v6053_v24 = vpop.eup %6052 }
0x1b84   :  { %v3176_v25 = vsel %vm395_vm2, %v6053_v24, 0.0 }
0x1b85   :  { %3177 = vadd.xlane.f32.xlu1 %v3176_v25 }
0x1b96   :  { %3385 = vrot.lane.b32.xlu1 %v6668_v42, %s6126_s19 }
0x1b97   :  { %3182 = vrot.lane.b32.xlu0 %v6680_v55, %s6125_s25 }
0x1bbf   :  { %3353 = vxpose.xlu1.b32.start.end [1/1] (short) (narrow) %v2852_v7, 8 }
0x1bdd   :  { %3631 = vrot.lane.b32.xlu1 %v6668_v42, %s6127_s21 }
0x1c0e   :  { %v2982_v48 = vpop.xlane.xlu0 %2981 }
0x1c0f   :  { %6054 = vrcp.f32 %v2982_v48 }
0x1c12   :  { %v3178_v28 = vpop.xlane.xlu1 %3177  ;;  %v3183_v31 = vpop.permute.xlu0 %3182 }
0x1c13   :  { %6056 = vrcp.f32 %v3178_v28 }
0x1c16   :  { %v3386_v45 = vpop.permute.xlu1 %3385 }
0x1c19   :  { %v6055_v29 = vpop.eup %6054 }
0x1c1a   :  { %v2984_v30 = vmul.f32 %v6055_v29, %v6051_v22 }
0x1c1c   :  { %5797 = vmatmul.mubr.msk.f32.vlgmr.msra.gmra.mrb[48].mxu0 %vm395_vm2, %v2984_v30 }
0x1c1d   :  { %v6057_v32 = vpop.eup %6056  ;;  %5805 = vmatpush3.msra.mxu0 %v3183_v31  ;;  %5806 = vmatprep.mubr.msk.f32.mxu0 %vm6124_vm1, %v6123_v15 }
0x1c1e   :  { %v3180_v34 = vmul.f32 %v6057_v32, %v6053_v24  ;;  %5815 = vmatprep.subr.bf16.mxu0 %v6123_v15 }
0x1c20   :  { %5807 = vmatmul.mubr.msk.f32.vlgmr.msra.gmra.mrb[50].mxu0 %vm395_vm2, %v3180_v34 }
0x1c21   :  { %5817 = vmatprep.mubr.msk.bf16.mxu0 %vm6124_vm1, %v6123_v15  ;;  %5816 = vmatpush3.bf16.msra.mxu0 %v6727_v36 }
0x1c22   :  { %5826 = vmatprep.subr.mxu0 %v6123_v15 }
0x1c3f   :  { %v3369_v46 = vpop.trf.xlu1 }
0x1c4f   :  { %v3632_v18 = vpop.permute.xlu1 %3631 }
0x1cef   :  { %v3054_v37 = vpop.f32.mrb[48].mxu0 }
0x1cf0   :  { %v3058_v38 = vpack.c.bf16 %v3054_v37, %v3054_v37  ;;  %v5798_v39 = vpop.f32.mrb[49].mxu0 }
0x1cf2   :  { %5818 = vmatmul.mubr.msk.bf16.vlgmr.msra.gmra.mrb[52].mxu0 %vm395_vm2, %v3058_v38 }
0x1cf3   :  { %v3254_v41 = vpop.f32.mrb[50].mxu0  ;;  %5828 = vmatprep.mubr.msk.f32.mxu0 %vm6124_vm1, %v6123_v15 }
0x1cf4   :  { %v3258_v43 = vpack.c.bf16 %v3254_v41, %v3254_v41  ;;  %v5808_v44 = vpop.f32.mrb[51].mxu0 }
0x1cf6   :  { %5812 = vmatmul.mubr.msk.bf16.vlgmr.msra.gmra.mrb[52].mxu1 %vm395_vm2, %v3258_v43  ;;  %v5378_v43 = vld [vmem:[%s7006_s6 + $0x1c] sm:$0xf] }
0x1cf7   :  { %5822 = vmatpush3.xpose.msk.msra.mxu1 %vm395_vm2, %v3386_v45  ;;  %5823 = vmatprep.mubr.msk.f32.mxu1 %vm6124_vm1, %v6123_v15  ;;  %v6781_v44 = vsel %vm761_vm5, %v5378_v43, 0 }
0x1cf8   :  { %5831 = vmatprep.subr.bf16.mxu1 %v6123_v15 }
0x1cfe   :  { %5824 = vmatmul.mubr.msk.f32.vlgmr.msra.gmra.mrb[56].mxu1 %vm395_vm2, %v3369_v46 }
0x1cff   :  { %5833 = vmatprep.mubr.msk.bf16.mxu1 %vm6124_vm1, %v6123_v15 }
0x1dc5   :  { %v3347_v51 = vpop.f32.mrb[52].mxu0 }
0x1dc6   :  { %v5819_v52 = vpop.f32.mrb[53].mxu0 }
0x1dc7   :  { %v3350_v54 = vpop.f32.mrb[54].mxu0 }
0x1dc8   :  { %v5820_v57 = vpop.f32.mrb[55].mxu0 }
0x1dc9   :  { %v3301_v59 = vpop.f32.mrb[52].mxu1 }
0x1dca   :  { %v3348_v1 = vadd.f32 %v3347_v51, %v3301_v59  ;;  %v5813_v2 = vpop.f32.mrb[53].mxu1 }
0x1dcb   :  { %v3304_v6 = vpop.f32.mrb[54].mxu1 }
0x1dcc   :  { %v5814_v7 = vpop.f32.mrb[55].mxu1 }
0x1dd1   :  { %v3458_v9 = vpop.f32.mrb[56].mxu1 }
0x1dd2   :  { %v3459_v3 = vadd.f32 %v3458_v9, %v6339_v12  ;;  %v5825_v5 = vpop.f32.mrb[57].mxu1 }
0x1dd4   :  { %v3462_v0 = vsel %vm395_vm2, %v3459_v3, -inf }
0x1dd5   :  { %3463 = vmax.xlane.f32.xlu0 %v3462_v0 }
0x1e62   :  { %v3464_v53 = vpop.xlane.xlu0 %3463 }
0x1e63   :  { %v3465_v60 = vsub.f32 %v3459_v3, %v3464_v53 }
0x1e65   :  { %v3466_v33 = vmul.f32 1.442695, %v3465_v60 }
0x1e67   :  { %6058 = vpow2.f32 %v3466_v33 }
0x1e71   :  { %v6059_v13 = vpop.eup %6058 }
0x1e72   :  { %v3468_v14 = vsel %vm395_vm2, %v6059_v13, 0.0 }
0x1e73   :  { %3469 = vadd.xlane.f32.xlu0 %v3468_v14 }
0x1e89   :  { %3473 = vrot.lane.b32.xlu0 %v6680_v55, %s6126_s19 }
0x1ea7   :  { %3599 = vxpose.xlu0.b32.start.end [1/1] (short) (narrow) %v6686_v11, 8  ;;  %v5373_v11 = vld [vmem:[%s7006_s6 + $0x18] sm:$0xf] }
0x1ea8   :  { %v6761_v20 = vsel %vm761_vm5, %v5373_v11, 0 }
0x1ea9   :  { %5832 = vmatpush3.bf16.msra.mxu1 %v6761_v20 }
0x1eaa   :  { %5847 = vmatprep.subr.bf16.mxu1 %v6123_v15 }
0x1f00   :  { %v3470_v16 = vpop.xlane.xlu0 %3469 }
0x1f01   :  { %6060 = vrcp.f32 %v3470_v16 }
0x1f04   :  { %v3474_v8 = vpop.permute.xlu0 %3473 }
0x1f05   :  { %5827 = vmatpush3.msra.mxu0 %v3474_v8 }
0x1f06   :  { %5837 = vmatprep.subr.mxu0 %v6123_v15 }
0x1f0b   :  { %v6061_v17 = vpop.eup %6060 }
0x1f0c   :  { %v3472_v10 = vmul.f32 %v6061_v17, %v6059_v13 }
0x1f0e   :  { %5829 = vmatmul.mubr.msk.f32.vlgmr.msra.gmra.mrb[56].mxu0 %vm395_vm2, %v3472_v10 }
0x1f0f   :  { %5838 = vmatpush3.xpose.msk.msra.mxu0 %vm395_vm2, %v3632_v18  ;;  %5839 = vmatprep.mubr.msk.f32.mxu0 %vm6124_vm1, %v6123_v15 }
0x1f10   :  { %5842 = vmatprep.subr.mxu0 %v6123_v15 }
0x1f27   :  { %v3615_v19 = vpop.trf.xlu0 }
0x1f28   :  { %5840 = vmatmul.mubr.msk.f32.vlgmr.msra.gmra.mrb[58].mxu0 %vm395_vm2, %v3615_v19 }
0x1f29   :  { %5844 = vmatprep.mubr.msk.f32.mxu0 %vm6124_vm1, %v6123_v15 }
0x1fe1   :  { %v3545_v21 = vpop.f32.mrb[56].mxu0 }
0x1fe2   :  { %v3549_v22 = vpack.c.bf16 %v3545_v21, %v3545_v21  ;;  %v5830_v62 = vpop.f32.mrb[57].mxu0 }
0x1fe4   :  { %5834 = vmatmul.mubr.msk.bf16.vlgmr.msra.gmra.mrb[60].mxu1 %vm395_vm2, %v3549_v22 }
0x1fe5   :  { %5849 = vmatprep.mubr.msk.bf16.mxu1 %vm6124_vm1, %v6123_v15  ;;  %5848 = vmatpush3.bf16.msra.mxu1 %v6781_v44 }
0x1fe6   :  { %5863 = vmatprep.subr.mxu1 %v6123_v15 }
0x1ffb   :  { %v3704_v24 = vpop.f32.mrb[58].mxu0 }
0x1ffc   :  { %v3705_v25 = vadd.f32 %v3704_v24, %v6339_v12  ;;  %v5841_v26 = vpop.f32.mrb[59].mxu0 }
0x1ffe   :  { %v3708_v48 = vsel %vm395_vm2, %v3705_v25, -inf }
0x1fff   :  { %3709 = vmax.xlane.f32.xlu1 %v3708_v48 }
0x2010   :  { %3719 = vrot.lane.b32.xlu1 %v6680_v55, %s6127_s21 }
0x2039   :  { %3845 = vxpose.xlu1.b32.start.end [1/1] (short) (narrow) %v6663_v40, 32 }
0x208c   :  { %v3710_v28 = vpop.xlane.xlu1 %3709 }
0x208d   :  { %v3711_v29 = vsub.f32 %v3705_v25, %v3710_v28 }
0x208f   :  { %v3712_v30 = vmul.f32 1.442695, %v3711_v29 }
0x2090   :  { %v3720_v31 = vpop.permute.xlu1 %3719 }
0x2091   :  { %6062 = vpow2.f32 %v3712_v30  ;;  %5843 = vmatpush3.msra.mxu0 %v3720_v31 }
0x2092   :  { %5853 = vmatprep.subr.mxu0 %v6123_v15 }
0x209b   :  { %v6063_v32 = vpop.eup %6062 }
0x209c   :  { %v3714_v12 = vsel %vm395_vm2, %v6063_v32, 0.0 }
0x209d   :  { %3715 = vadd.xlane.f32.xlu0 %v3714_v12 }
0x20b3   :  { %4102 = vrot.lane.b32.xlu0 %v6670_v49, %s6125_s25 }
0x20b7   :  { %v3592_v34 = vpop.f32.mrb[60].mxu1 }
0x20b8   :  { %v3598_v35 = vadd.f32 %v3592_v34, %v3348_v1  ;;  %v5835_v37 = vpop.f32.mrb[61].mxu1 }
0x20b9   :  { %v3595_v38 = vpop.f32.mrb[62].mxu1  ;;  %v3861_v39 = vpop.trf.xlu1 }
0x20ba   :  { %v5836_v40 = vpop.f32.mrb[63].mxu1 }
0x20bd   :  { %v3862_v41 = vpop.trf.xlu1 }
0x20be   :  { %4070 = vxpose.xlu1.b32.start.end [1/1] (short) (narrow) %v3862_v41, 8 }
0x20c1   :  { %v3863_v57 = vpop.trf.xlu1 }
0x20c5   :  { %v6796_v6 = vpop.trf.xlu1 }
0x20d1   :  { %3877 = vxpose.xlu0.b32.start.end [1/1] (short) (narrow) %v3861_v39, 8 }
0x212a   :  { %v3716_v45 = vpop.xlane.xlu0 %3715 }
0x212b   :  { %6064 = vrcp.f32 %v3716_v45 }
0x212e   :  { %v4103_v52 = vpop.permute.xlu0 %4102 }
0x2135   :  { %v6065_v46 = vpop.eup %6064 }
0x2136   :  { %v3718_v51 = vmul.f32 %v6065_v46, %v6063_v32 }
0x2138   :  { %5845 = vmatmul.mubr.msk.f32.vlgmr.msra.gmra.mrb[60].mxu0 %vm395_vm2, %v3718_v51 }
0x2139   :  { %5854 = vmatpush3.xpose.msk.msra.mxu0 %vm395_vm2, %v6670_v49  ;;  %5855 = vmatprep.mubr.msk.f32.mxu0 %vm6124_vm1, %v6123_v15 }
0x213a   :  { %5858 = vmatprep.subr.mxu0 %v6123_v15 }
0x213e   :  { %v4086_v7 = vpop.trf.xlu1 }
0x2151   :  { %v3893_v54 = vpop.trf.xlu0 }
0x2152   :  { %5856 = vmatmul.mubr.msk.f32.vlgmr.msra.gmra.mrb[62].mxu0 %vm395_vm2, %v3893_v54 }
0x2153   :  { %5859 = vmatpush3.msra.mxu0 %v6682_v61  ;;  %5860 = vmatprep.mubr.msk.f32.mxu0 %vm6124_vm1, %v6123_v15 }
0x2154   :  { %5868 = vmatprep.subr.mxu0 %v6123_v15 }
0x220b   :  { %v3791_v59 = vpop.f32.mrb[60].mxu0 }
0x220c   :  { %v3795_v1 = vpack.c.bf16 %v3791_v59, %v3791_v59  ;;  %v5846_v2 = vpop.f32.mrb[61].mxu0 }
0x220e   :  { %5850 = vmatmul.mubr.msk.bf16.vlgmr.msra.gmra.mrb[64].mxu1 %vm395_vm2, %v3795_v1 }
0x220f   :  { %5864 = vmatpush3.xpose.msk.msra.mxu1 %vm395_vm2, %v4103_v52  ;;  %5865 = vmatprep.mubr.msk.f32.mxu1 %vm6124_vm1, %v6123_v15 }
0x2210   :  { %5873 = vmatprep.subr.bf16.mxu1 %v6123_v15 }
0x2216   :  { %5866 = vmatmul.mubr.msk.f32.vlgmr.msra.gmra.mrb[58].mxu1 %vm395_vm2, %v4086_v7 }
0x2217   :  { %5874 = vmatpush3.bf16.msra.mxu1 %v6710_v27  ;;  %5875 = vmatprep.mubr.msk.bf16.mxu1 %vm6124_vm1, %v6123_v15 }
0x2218   :  { %5885 = vmatprep.subr.mxu1 %v6123_v15 }
0x2225   :  { %v3981_v9 = vpop.f32.mrb[62].mxu0 }
0x2226   :  { %v3982_v3 = vadd.f32 %v3981_v9, %v6456_v4  ;;  %v5857_v5 = vpop.f32.mrb[63].mxu0 }
0x2227   :  { %v6854_v5 = vld [vmem:[%s7007_s7 + $0x1] ss:$0 sm:$0xff] }
0x2228   :  { %v3985_v0 = vsel %vm395_vm2, %v3982_v3, -inf }
0x2229   :  { %3986 = vmax.xlane.f32.xlu1 %v3985_v0 }
0x22b6   :  { %v3987_v53 = vpop.xlane.xlu1 %3986 }
0x22b7   :  { %v3988_v60 = vsub.f32 %v3982_v3, %v3987_v53 }
0x22b9   :  { %v3989_v33 = vmul.f32 1.442695, %v3988_v60 }
0x22bb   :  { %6066 = vpow2.f32 %v3989_v33 }
0x22c5   :  { %v6067_v13 = vpop.eup %6066 }
0x22c6   :  { %v3991_v14 = vsel %vm395_vm2, %v6067_v13, 0.0 }
0x22c7   :  { %3992 = vadd.xlane.f32.xlu1 %v3991_v14 }
0x22e1   :  { %v3838_v27 = vpop.f32.mrb[64].mxu1 }
0x22e2   :  { %v6811_v16 = vadd.f32 %v3838_v27, %v3598_v35  ;;  %v5851_v8 = vpop.f32.mrb[65].mxu1 }
0x22e3   :  { %v3841_v17 = vpop.f32.mrb[66].mxu1 }
0x22e4   :  { %v5852_v10 = vpop.f32.mrb[67].mxu1  ;;  %v4836_v3 = vadd.f32 %v6811_v16, %v6608_v58 }
0x22e6   :  { %v6857_v0 = vadd.f32 %v6854_v5, %v4836_v3 }
0x22e8   :  { %v4852_v53 = vsel %vm87_vm0, %v6857_v0, 0.0 }
0x22e9   :  { %v4175_v18 = vpop.f32.mrb[58].mxu1 }
0x22ea   :  { %v4176_v19 = vadd.f32 %v4175_v18, %v6456_v4  ;;  %v5867_v11 = vpop.f32.mrb[59].mxu1 }
0x22ec   :  { %v4179_v21 = vsel %vm395_vm2, %v4176_v19, -inf }
0x22ed   :  { %4180 = vmax.xlane.f32.xlu0 %v4179_v21 }
0x2303   :  { %4386 = vrot.lane.b32.xlu0 %v6670_v49, %s6126_s19 }
0x2354   :  { %v3993_v22 = vpop.xlane.xlu1 %3992 }
0x2355   :  { %6068 = vrcp.f32 %v3993_v22 }
0x235f   :  { %v6069_v62 = vpop.eup %6068 }
0x2360   :  { %v3995_v24 = vmul.f32 %v6069_v62, %v6067_v13 }
0x2362   :  { %5861 = vmatmul.mubr.msk.f32.vlgmr.msra.gmra.mrb[64].mxu0 %vm395_vm2, %v3995_v24 }
0x2363   :  { %5870 = vmatprep.mubr.msk.f32.mxu0 %vm6124_vm1, %v6123_v15 }
0x237a   :  { %v4181_v25 = vpop.xlane.xlu0 %4180 }
0x237b   :  { %v4182_v26 = vsub.f32 %v4176_v19, %v4181_v25 }
0x237d   :  { %v4183_v48 = vmul.f32 1.442695, %v4182_v26 }
0x237e   :  { %v4387_v41 = vpop.permute.xlu0 %4386 }
0x237f   :  { %6070 = vpow2.f32 %v4183_v48 }
0x2389   :  { %v6071_v28 = vpop.eup %6070 }
0x238a   :  { %v4185_v29 = vsel %vm395_vm2, %v6071_v28, 0.0 }
0x238b   :  { %4186 = vadd.xlane.f32.xlu1 %v4185_v29 }
0x239c   :  { %4191 = vrot.lane.b32.xlu1 %v6682_v61, %s6125_s25 }
0x23c5   :  { %4354 = vxpose.xlu1.b32.start.end [1/1] (short) (narrow) %v3863_v57, 8 }
0x2418   :  { %v4187_v30 = vpop.xlane.xlu1 %4186 }
0x2419   :  { %6072 = vrcp.f32 %v4187_v30 }
0x241c   :  { %v4192_v31 = vpop.permute.xlu1 %4191 }
0x241d   :  { %5869 = vmatpush3.msra.mxu0 %v4192_v31 }
0x241e   :  { %5879 = vmatprep.subr.bf16.mxu0 %v6123_v15 }
0x2423   :  { %v6073_v32 = vpop.eup %6072 }
0x2424   :  { %v4189_v12 = vmul.f32 %v6073_v32, %v6071_v28 }
0x2426   :  { %5871 = vmatmul.mubr.msk.f32.vlgmr.msra.gmra.mrb[66].mxu0 %vm395_vm2, %v4189_v12 }
0x2427   :  { %5880 = vmatpush3.bf16.msra.mxu0 %v6727_v36  ;;  %5881 = vmatprep.mubr.msk.bf16.mxu0 %vm6124_vm1, %v6123_v15 }
0x2428   :  { %5890 = vmatprep.subr.mxu0 %v6123_v15 }
0x2435   :  { %v4065_v34 = vpop.f32.mrb[64].mxu0 }
0x2436   :  { %v4069_v35 = vpack.c.bf16 %v4065_v34, %v4065_v34  ;;  %v5862_v37 = vpop.f32.mrb[65].mxu0 }
0x2438   :  { %5882 = vmatmul.mubr.msk.bf16.vlgmr.msra.gmra.mrb[68].mxu0 %vm395_vm2, %v4069_v35 }
0x2439   :  { %5892 = vmatprep.mubr.msk.f32.mxu0 %vm6124_vm1, %v6123_v15 }
0x2445   :  { %v4370_v36 = vpop.trf.xlu1 }
0x24f9   :  { %v4263_v38 = vpop.f32.mrb[66].mxu0 }
0x24fa   :  { %v4267_v40 = vpack.c.bf16 %v4263_v38, %v4263_v38  ;;  %v5872_v39 = vpop.f32.mrb[67].mxu0 }
0x24fc   :  { %5876 = vmatmul.mubr.msk.bf16.vlgmr.msra.gmra.mrb[68].mxu1 %vm395_vm2, %v4267_v40 }
0x24fd   :  { %5886 = vmatpush3.xpose.msk.msra.mxu1 %vm395_vm2, %v4387_v41  ;;  %5887 = vmatprep.mubr.msk.f32.mxu1 %vm6124_vm1, %v6123_v15 }
0x24fe   :  { %5895 = vmatprep.subr.bf16.mxu1 %v6123_v15 }
0x2504   :  { %5888 = vmatmul.mubr.msk.f32.vlgmr.msra.gmra.mrb[72].mxu1 %vm395_vm2, %v4370_v36 }
0x2505   :  { %5896 = vmatpush3.bf16.msra.mxu1 %v6761_v20  ;;  %5897 = vmatprep.mubr.msk.bf16.mxu1 %vm6124_vm1, %v6123_v15 }
0x2506   :  { %5911 = vmatprep.subr.bf16.mxu1 %v6123_v15 }
0x250b   :  { %v4348_v43 = vpop.f32.mrb[68].mxu0 }
0x250c   :  { %v5883_v45 = vpop.f32.mrb[69].mxu0 }
0x250d   :  { %v4351_v46 = vpop.f32.mrb[70].mxu0 }
0x250e   :  { %v5884_v51 = vpop.f32.mrb[71].mxu0 }
0x25cf   :  { %v4305_v52 = vpop.f32.mrb[68].mxu1 }
0x25d0   :  { %v4349_v54 = vadd.f32 %v4348_v43, %v4305_v52  ;;  %v5877_v57 = vpop.f32.mrb[69].mxu1 }
0x25d1   :  { %v4308_v59 = vpop.f32.mrb[70].mxu1 }
0x25d2   :  { %v5878_v1 = vpop.f32.mrb[71].mxu1 }
0x25d7   :  { %v4459_v2 = vpop.f32.mrb[72].mxu1 }
0x25d8   :  { %v4460_v7 = vadd.f32 %v4459_v2, %v6456_v4  ;;  %v5889_v9 = vpop.f32.mrb[73].mxu1 }
0x25da   :  { %v4463_v20 = vsel %vm395_vm2, %v4460_v7, -inf }
0x25db   :  { %4464 = vmax.xlane.f32.xlu0 %v4463_v20 }
0x25f1   :  { %4474 = vrot.lane.b32.xlu0 %v6682_v61, %s6126_s19 }
0x25f5   :  { %4627 = vrot.lane.b32.xlu0 %v6670_v49, %s6127_s21 }
0x2613   :  { %4595 = vxpose.xlu0.b32.start.end [1/1] (short) (narrow) %v6796_v6, 8 }
0x2640   :  { %4853 = vadd.xlane.f32.xlu0 %v4852_v53 }
0x2668   :  { %v4465_v60 = vpop.xlane.xlu0 %4464 }
0x2669   :  { %v4466_v33 = vsub.f32 %v4460_v7, %v4465_v60 }
0x266b   :  { %v4467_v13 = vmul.f32 1.442695, %v4466_v33 }
0x266c   :  { %v4475_v14 = vpop.permute.xlu0 %4474 }
0x266d   :  { %6074 = vpow2.f32 %v4467_v13  ;;  %5891 = vmatpush3.msra.mxu0 %v4475_v14 }
0x266e   :  { %5901 = vmatprep.subr.mxu0 %v6123_v15 }
0x2670   :  { %v4628_v17 = vpop.permute.xlu0 %4627 }
0x2677   :  { %v6075_v58 = vpop.eup %6074 }
0x2678   :  { %v4469_v6 = vsel %vm395_vm2, %v6075_v58, 0.0 }
0x2679   :  { %4470 = vadd.xlane.f32.xlu1 %v4469_v6 }
0x2693   :  { %v4611_v10 = vpop.trf.xlu0 }
0x26cd   :  { %v4854_v41 = vpop.xlane.xlu0 %4853 }
0x26ce   :  { %v4858_v36 = vmul.f32 0.03125, %v4854_v41 }
0x26d0   :  { %v4860_v52 = vsub.f32 %v6857_v0, %v4858_v36 }
0x26d2   :  { %v4862_v2 = vmul.f32 %v4860_v52, %v4860_v52 }
0x26d4   :  { %v4864_v7 = vsel %vm87_vm0, %v4862_v2, 0.0 }
0x2706   :  { %v4471_v27 = vpop.xlane.xlu1 %4470 }
0x2707   :  { %6076 = vrcp.f32 %v4471_v27 }
0x2711   :  { %v6077_v16 = vpop.eup %6076 }
0x2712   :  { %v4473_v8 = vmul.f32 %v6077_v16, %v6075_v58 }
0x2714   :  { %5893 = vmatmul.mubr.msk.f32.vlgmr.msra.gmra.mrb[72].mxu0 %vm395_vm2, %v4473_v8 }
0x2715   :  { %5902 = vmatpush3.xpose.msk.msra.mxu0 %vm395_vm2, %v4628_v17  ;;  %5903 = vmatprep.mubr.msk.f32.mxu0 %vm6124_vm1, %v6123_v15  ;;  %v5400_v17 = vld [vmem:[%s7008_s8 + $0x1] ss:$0 sm:$0xff] }
0x2716   :  { %5906 = vmatprep.subr.mxu0 %v6123_v15 }
0x2718   :  { %5904 = vmatmul.mubr.msk.f32.vlgmr.msra.gmra.mrb[74].mxu0 %vm395_vm2, %v4611_v10 }
0x2719   :  { %5908 = vmatprep.mubr.msk.f32.mxu0 %vm6124_vm1, %v6123_v15 }
0x27e7   :  { %v4546_v18 = vpop.f32.mrb[72].mxu0 }
0x27e8   :  { %v4550_v19 = vpack.c.bf16 %v4546_v18, %v4546_v18  ;;  %v5894_v11 = vpop.f32.mrb[73].mxu0 }
0x27e9   :  { %v5401_v11 = vld [vmem:[%s7009_s9 + $0x1] ss:$0 sm:$0xff] }
0x27ea   :  { %5898 = vmatmul.mubr.msk.bf16.vlgmr.msra.gmra.mrb[76].mxu1 %vm395_vm2, %v4550_v19 }
0x27eb   :  { %v4700_v21 = vpop.f32.mrb[74].mxu0  ;;  %5912 = vmatpush3.bf16.msra.mxu1 %v6781_v44  ;;  %5913 = vmatprep.mubr.msk.bf16.mxu1 %vm6124_vm1, %v6123_v15 }
0x27ec   :  { %v4701_v22 = vadd.f32 %v4700_v21, %v6456_v4  ;;  %v5905_v62 = vpop.f32.mrb[75].mxu0  ;;  %5925 = vmatprep.subr.bf16.mxu1 %v6123_v15 }
0x27ee   :  { %v4704_v24 = vsel %vm395_vm2, %v4701_v22, -inf }
0x27ef   :  { %4705 = vmax.xlane.f32.xlu1 %v4704_v24 }
0x287c   :  { %v4706_v25 = vpop.xlane.xlu1 %4705 }
0x287d   :  { %v4707_v26 = vsub.f32 %v4701_v22, %v4706_v25  ;;  %v5988_v25 = vld [vmem:[%s7012_s12 + $0x40] sm:$0xff]  }
0x287f   :  { %v4708_v48 = vmul.f32 1.442695, %v4707_v26  ;;  %v5989_v26 = vld [vmem:[%s7012_s12 + $0x48] sm:$0xff]  }
0x2881   :  { %6078 = vpow2.f32 %v4708_v48  ;;  %v5990_v48 = vld [vmem:[%s7012_s12 + $0x50] sm:$0xff]  }
0x288b   :  { %v6079_v28 = vpop.eup %6078 }
0x288c   :  { %v4710_v29 = vsel %vm395_vm2, %v6079_v28, 0.0 }
0x288d   :  { %4711 = vadd.xlane.f32.xlu1 %v4710_v29  ;;  %v5992_v29 = vld [vmem:[%s7012_s12 + $0x60] sm:$0xff]  }
0x289e   :  { %4715 = vrot.lane.b32.xlu1 %v6682_v61, %s6127_s21 }
0x28bd   :  { %v4588_v44 = vpop.f32.mrb[76].mxu1 }
0x28be   :  { %v4594_v30 = vadd.f32 %v4588_v44, %v4349_v54  ;;  %v5899_v4 = vpop.f32.mrb[77].mxu1  ;;  %v5993_v44 = vld [vmem:[%s7012_s12 + $0x68] sm:$0xff]  }
0x28bf   :  { %v4591_v31 = vpop.f32.mrb[78].mxu1  ;;  %v5995_v4 = vld [vmem:[%s7012_s12 + $0x78] sm:$0xff]  }
0x28c0   :  { %v5900_v32 = vpop.f32.mrb[79].mxu1  ;;  %v5407_v31 = vld [vmem:[%s7011_s11 + $0x1] ss:$0 sm:$0xff] }
0x291a   :  { %v4712_v12 = vpop.xlane.xlu1 %4711 }
0x291b   :  { %6080 = vrcp.f32 %v4712_v12 }
0x291e   :  { %v4716_v34 = vpop.permute.xlu1 %4715 }
0x291f   :  { %5907 = vmatpush3.msra.mxu0 %v4716_v34 }
0x2920   :  { %5917 = vmatprep.subr.bf16.mxu0 %v6123_v15 }
0x2925   :  { %v6081_v35 = vpop.eup %6080 }
0x2926   :  { %v4714_v37 = vmul.f32 %v6081_v35, %v6079_v28  ;;  %v5991_v28 = vld [vmem:[%s7012_s12 + $0x58] sm:$0xff]  }
0x2928   :  { %5909 = vmatmul.mubr.msk.f32.vlgmr.msra.gmra.mrb[76].mxu0 %vm395_vm2, %v4714_v37 }
0x2929   :  { %5921 = vmatprep.mubr.msk.bf16.mxu0 %vm6124_vm1, %v6123_v15 }
0x29fb   :  { %v4787_v38 = vpop.f32.mrb[76].mxu0 }
0x29fc   :  { %v4791_v40 = vpack.c.bf16 %v4787_v38, %v4787_v38  ;;  %v5910_v39 = vpop.f32.mrb[77].mxu0 }
0x29fe   :  { %5914 = vmatmul.mubr.msk.bf16.vlgmr.msra.gmra.mrb[80].mxu1 %vm395_vm2, %v4791_v40 }
0x29ff   :  { %5941 = vmatprep.mubr.msk.bf16.mxu1 %vm6124_vm1, %v6123_v15  ;;  %5926 = vmatpush3.bf16.msra.mxu1 %v5988_v25 }
0x2a00   :  { %5927 = vmatprep.subr.bf16.mxu1 %v6123_v15 }
0x2a03   :  { %5928 = vmatpush3.bf16.msra.mxu1 %v5989_v26 }
0x2a04   :  { %5929 = vmatprep.subr.bf16.mxu1 %v6123_v15 }
0x2a07   :  { %5930 = vmatpush3.bf16.msra.mxu1 %v5990_v48  ;;  %v5439_v48 = vld [vmem:[%s7014_s14] ss:$0 sm:$0xff]  ;;  %s6131_s14 = smov [#allocation2]  }
0x2a08   :  { %5931 = vmatprep.subr.bf16.mxu1 %v6123_v15  ;;  %s5235_s23 = sshll.u32 %s6131_s14, 4  ;;  %s5236_s23 = int_to_ptr.vmem [resolvable:$true] %s5235_s23 }
0x2a09   :  { %p6104_p1 = scmp.lt.s32.totalorder %s5236_s23, %s5236_s23 }
0x2a0b   :  { %5932 = vmatpush3.bf16.msra.mxu1 %v5991_v28 }
0x2a0c   :  { %5933 = vmatprep.subr.bf16.mxu1 %v6123_v15 }
0x2a0f   :  { %5934 = vmatpush3.bf16.msra.mxu1 %v5992_v29 }
0x2a10   :  { %5935 = vmatprep.subr.bf16.mxu1 %v6123_v15 }
0x2a13   :  { %5936 = vmatpush3.bf16.msra.mxu1 %v5993_v44 }
0x2a14   :  { %5937 = vmatprep.subr.bf16.mxu1 %v6123_v15 }
0x2ad1   :  { %v4829_v43 = vpop.f32.mrb[80].mxu1 }
0x2ad2   :  { %v4835_v45 = vadd.f32 %v4829_v43, %v4594_v30  ;;  %v5915_v46 = vpop.f32.mrb[81].mxu1  ;;  %v5994_v30 = vld [vmem:[%s7012_s12 + $0x70] sm:$0xff]  }
0x2ad3   :  { %v4832_v51 = vpop.f32.mrb[82].mxu1  ;;  %5938 = vmatpush3.bf16.msra.mxu1 %v5994_v30 }
0x2ad4   :  { %v4837_v54 = vadd.f32 %v4835_v45, %v6611_v23  ;;  %v5916_v57 = vpop.f32.mrb[83].mxu1  ;;  %v5986_v23 = vld [vmem:[%s7010_s10 + $0x10] sm:$0xff]   ;;  %5939 = vmatprep.subr.bf16.mxu1 %v6123_v15 }
0x2ad5   :  { %5918 = vmatpush3.bf16.msra.mxu0 %v5986_v23 }
0x2ad6   :  { %v6891_v59 = vadd.f32 %v6854_v5, %v4837_v54  ;;  %v5987_v5 = vld [vmem:[%s7010_s10 + $0x18] sm:$0xff]   ;;  %5919 = vmatprep.subr.bf16.mxu0 %v6123_v15 }
0x2ad7   :  { %5940 = vmatpush3.bf16.msra.mxu1 %v5995_v4 }
0x2ad8   :  { %v4855_v1 = vsel %vm87_vm0, %v6891_v59, 0.0 }
0x2ad9   :  { %4856 = vadd.xlane.f32.xlu1 %v4855_v1  ;;  %5920 = vmatpush3.bf16.msra.mxu0 %v5987_v5  ;;  %v5430_v1 = vld [vmem:[%s7013_s13 + $0x1] ss:$0 sm:$0xff]  ;;  %s6128_s13 = smov 32  }
0x2ada   :  { %5945 = vmatprep.subr.bf16.mxu0 %v6123_v15 }
0x2add   :  { %4865 = vadd.xlane.f32.xlu1 %v4864_v7 }
0x2b66   :  { %v4857_v9 = vpop.xlane.xlu1 %4856 }
0x2b67   :  { %v4859_v20 = vmul.f32 0.03125, %v4857_v9 }
0x2b69   :  { %v4861_v3 = vsub.f32 %v6891_v59, %v4859_v20 }
0x2b6a   :  { %v4866_v33 = vpop.xlane.xlu1 %4865 }
0x2b6b   :  { %v4863_v53 = vmul.f32 %v4861_v3, %v4861_v3  ;;  %v4870_v13 = vmul.f32 0.03125, %v4866_v33 }
0x2b6d   :  { %v4867_v60 = vsel %vm87_vm0, %v4863_v53, 0.0  ;;  %v4872_v14 = vadd.f32 1e-05, %v4870_v13 }
0x2b6e   :  { %4868 = vadd.xlane.f32.xlu0 %v4867_v60 }
0x2b6f   :  { %6082 = vrsqrt.f32 %v4872_v14 }
0x2b79   :  { %v6083_v16 = vpop.eup %6082 }
0x2b7a   :  { %v4876_v8 = vmul.f32 %v6083_v16, %v4860_v52 }
0x2b7c   :  { %v4884_v18 = vmul.f32 %v5400_v17, %v4876_v8 }
0x2b7e   :  { %v4892_v22 = vadd.f32 %v5401_v11, %v4884_v18 }
0x2bfb   :  { %v4869_v58 = vpop.xlane.xlu0 %4868 }
0x2bfc   :  { %v4871_v6 = vmul.f32 0.03125, %v4869_v58 }
0x2bfe   :  { %v4873_v27 = vadd.f32 1e-05, %v4871_v6 }
0x2c00   :  { %6084 = vrsqrt.f32 %v4873_v27 }
0x2c0a   :  { %v6085_v10 = vpop.eup %6084 }
0x2c0b   :  { %v4877_v19 = vmul.f32 %v6085_v10, %v4861_v3 }
0x2c0d   :  { %v4885_v21 = vmul.f32 %v5400_v17, %v4877_v19 }
0x2c0f   :  { %v4893_v62 = vadd.f32 %v5401_v11, %v4885_v21 }
0x2c11   :  { %v4894_v24 = vpack.c.bf16 %v4893_v62, %v4892_v22 }
0x2c13   :  { %5922 = vmatmul.mubr.msk.bf16.vlgmr.msra.gmra.mrb[80].mxu0 %vm87_vm0, %v4894_v24 }
0x2c14   :  { %5949 = vmatprep.mubr.msk.bf16.mxu0 %vm6124_vm1, %v6123_v15 }
0x2ce6   :  { %v4957_v32 = vpop.f32.mrb[80].mxu0 }
0x2ce7   :  { %v4958_v12 = vadd.f32 %v5407_v31, %v4957_v32  ;;  %v5923_v34 = vpop.f32.mrb[81].mxu0 }
0x2ce8   :  { %v4960_v35 = vpop.f32.mrb[82].mxu0 }
0x2ce9   :  { %v5411_v37 = vmul.f32 -1.442695, %v4958_v12  ;;  %v4961_v38 = vadd.f32 %v5407_v31, %v4960_v35  ;;  %v5924_v40 = vpop.f32.mrb[83].mxu0 }
0x2ceb   :  { %6086 = vpow2.f32 %v5411_v37  ;;  %v5412_v39 = vmul.f32 -1.442695, %v4961_v38 }
0x2ced   :  { %6088 = vpow2.f32 %v5412_v39 }
0x2cf5   :  { %v6087_v41 = vpop.eup %6086 }
0x2cf6   :  { %v4970_v36 = vadd.f32 1.0, %v6087_v41 }
0x2cf7   :  { %v6089_v43 = vpop.eup %6088 }
0x2cf8   :  { %6090 = vrcp.f32 %v4970_v36  ;;  %v4971_v45 = vadd.f32 1.0, %v6089_v43 }
0x2cfa   :  { %6092 = vrcp.f32 %v4971_v45 }
0x2d02   :  { %v6091_v46 = vpop.eup %6090 }
0x2d03   :  { %v4976_v52 = vmul.f32 %v6091_v46, %v4958_v12  ;;  %v5440_v12 = vld [vmem:[%s7015_s15] ss:$0 sm:$0xff] }
0x2d04   :  { %v6093_v51 = vpop.eup %6092 }
0x2d05   :  { %v4977_v54 = vmul.f32 %v6093_v51, %v4961_v38 }
0x2d07   :  { %v4978_v57 = vpack.c.bf16 %v4977_v54, %v4976_v52 }
0x2d09   :  { %5942 = vmatmul.mubr.bf16.vlgmr.msra.gmra.mrb[84].mxu1 %v4978_v57 }
0x2ddc   :  { %v5086_v2 = vpop.f32.mrb[84].mxu1 }
0x2ddd   :  { %v5087_v7 = vadd.f32 %v5430_v1, %v5086_v2  ;;  %v5943_v9 = vpop.f32.mrb[85].mxu1 }
0x2dde   :  { %v5089_v20 = vpop.f32.mrb[86].mxu1 }
0x2ddf   :  { %v5093_v3 = vadd.f32 %v5087_v7, %v6857_v0  ;;  %v5090_v53 = vadd.f32 %v5430_v1, %v5089_v20  ;;  %v5944_v60 = vpop.f32.mrb[87].mxu1 }
0x2de1   :  { %v5097_v23 = vsel %vm87_vm0, %v5093_v3, 0.0  ;;  %v5094_v5 = vadd.f32 %v5090_v53, %v6891_v59  ;;  %v5996_v59 = vld [vmem:[%s7016_s16] sm:$0xff]  }
0x2de2   :  { %5098 = vadd.xlane.f32.xlu1 %v5097_v23  ;;  %5946 = vmatpush3.bf16.msra.mxu0 %v5996_v59 }
0x2de3   :  { %v5100_v33 = vsel %vm87_vm0, %v5094_v5, 0.0  ;;  %5947 = vmatprep.subr.bf16.mxu0 %v6123_v15 }
0x2de4   :  { %5101 = vadd.xlane.f32.xlu0 %v5100_v33 }
0x2e6f   :  { %v5099_v13 = vpop.xlane.xlu1 %5098 }
0x2e70   :  { %v5103_v14 = vmul.f32 0.03125, %v5099_v13 }
0x2e71   :  { %v5102_v58 = vpop.xlane.xlu0 %5101 }
0x2e72   :  { %v5105_v6 = vsub.f32 %v5093_v3, %v5103_v14  ;;  %v5104_v27 = vmul.f32 0.03125, %v5102_v58 }
0x2e74   :  { %v5106_v16 = vsub.f32 %v5094_v5, %v5104_v27  ;;  %v5107_v8 = vmul.f32 %v5105_v6, %v5105_v6 }
0x2e76   :  { %v5109_v17 = vsel %vm87_vm0, %v5107_v8, 0.0  ;;  %v5108_v0 = vmul.f32 %v5106_v16, %v5106_v16 }
0x2e77   :  { %5110 = vadd.xlane.f32.xlu1 %v5109_v17 }
0x2e78   :  { %v5112_v10 = vsel %vm87_vm0, %v5108_v0, 0.0 }
0x2e79   :  { %5113 = vadd.xlane.f32.xlu0 %v5112_v10 }
0x2e88   :  { %5202 = vrot.lane.b32.xlu1 %v6314_v63, %s6128_s13  ;;  %v5997_v63 = vld [vmem:[%s7016_s16 + $0x8] sm:$0xff]  }
0x2e89   :  { %5948 = vmatpush3.bf16.msra.mxu0 %v5997_v63 }
0x2e8c   :  { %5208 = vrot.lane.b32.xlu1 %v6668_v42, %s6129_s0 }
0x2e8f   :  { %5204 = vrot.lane.b32.xlu0 %v6308_v56, %s6128_s13 }
0x2e90   :  { %5210 = vrot.lane.b32.xlu1 %v6670_v49, %s6129_s0 }
0x2e93   :  { %5214 = vrot.lane.b32.xlu0 %v6680_v55, %s6130_s1 }
0x2e94   :  { %5216 = vrot.lane.b32.xlu1 %v6682_v61, %s6130_s1 }
0x2f04   :  { %v5111_v56 = vpop.xlane.xlu1 %5110 }
0x2f05   :  { %v5115_v42 = vmul.f32 0.03125, %v5111_v56 }
0x2f06   :  { %v5114_v49 = vpop.xlane.xlu0 %5113 }
0x2f07   :  { %v5117_v18 = vadd.f32 1e-05, %v5115_v42  ;;  %v5116_v19 = vmul.f32 0.03125, %v5114_v49 }
0x2f08   :  { %v5203_v55 = vpop.permute.xlu1 %5202 }
0x2f09   :  { %6094 = vrsqrt.f32 %v5117_v18  ;;  %v5118_v61 = vadd.f32 1e-05, %v5116_v19  ;;  %v5220_v21 = vsel %vm87_vm0, %v6296_v47, %v5203_v55 }
0x2f0a   :  { %v5205_v11 = vpop.permute.xlu0 %5204 }
0x2f0b   :  { %6096 = vrsqrt.f32 %v5118_v61  ;;  %v5221_v28 = vsel %vm87_vm0, %v6298_v50, %v5205_v11 }
0x2f0c   :  { %v5209_v22 = vpop.permute.xlu1 %5208 }
0x2f0d   :  { %v5223_v62 = vsel %vm5222_vm6, %v5220_v21, %v5209_v22 }
0x2f0e   :  { %v5215_v24 = vpop.permute.xlu0 %5214 }
0x2f0f   :  { %v5226_v15 = vsel %vm5225_vm7, %v5223_v62, %v5215_v24 }
0x2f10   :  { %5228 = vst [vmem:[%s7018_s18] sm:$0xff] %v5226_v15  ;;  %v5211_v25 = vpop.permute.xlu1 %5210 }
0x2f11   :  { %v5224_v47 = vsel %vm5222_vm6, %v5221_v28, %v5211_v25 }
0x2f13   :  { %v6095_v26 = vpop.eup %6094 }
0x2f14   :  { %v5121_v29 = vmul.f32 %v6095_v26, %v5105_v6  ;;  %v5217_v44 = vpop.permute.xlu1 %5216 }
0x2f15   :  { %v6097_v30 = vpop.eup %6096  ;;  %v5227_v4 = vsel %vm5225_vm7, %v5224_v47, %v5217_v44 }
0x2f16   :  { %v5129_v31 = vmul.f32 %v5439_v48, %v5121_v29  ;;  %v5122_v32 = vmul.f32 %v6097_v30, %v5106_v16  ;;  %5229 = vst [vmem:[%s7018_s18 + $0x8] sm:$0xff] %v5227_v4  ;;  %s6099_s18 = scalar_lea.vmem %s5236_s23, 256 }
0x2f17   :  { %p6100_p0 = scmp.ne.s32.totalorder %s5236_s23, %s6099_s18  ;;  %p6105_p2 = scmp.lt.s32.totalorder %s6099_s18, %s6099_s18 }
0x2f18   :  { %v5130_v34 = vmul.f32 %v5439_v48, %v5122_v32  ;;  %v5137_v35 = vadd.f32 %v5440_v12, %v5129_v31 }
0x2f19   :  { %p6106_p3 = por %p6105_p2, %p6104_p1 }
0x2f1a   :  { %v5138_v37 = vadd.f32 %v5440_v12, %v5130_v34 }
0x2f1b   :  { %p6107_p4 = pnand %p6106_p3, %p6100_p0 }
0x2f1c   :  { %v5139_v38 = vpack.c.bf16 %v5138_v37, %v5137_v35 }
0x2f1e   :  { %5950 = vmatmul.mubr.msk.bf16.vlgmr.msra.gmra.mrb[84].mxu0 %vm87_vm0, %v5139_v38 }
0x2ff1   :  { %v5193_v50 = vpop.f32.mrb[84].mxu0 }
0x2ff2   :  { %5200 = vst [vmem:[#allocation2] sm:$0xff] %v5193_v50  ;;  %v5951_v40 = vpop.f32.mrb[85].mxu0 }
0x2ff3   :  { %v5196_v39 = vpop.f32.mrb[86].mxu0 }
0x2ff4   :  { %5201 = vst [vmem:[#allocation2 + $0x8] sm:$0xff] %v5196_v39  ;;  %v5952_v41 = vpop.f32.mrb[87].mxu0 }
0x2ff5   :  { %6110 = shalt.err (!%p6107_p4)
}
0x2ff6   :  { %s6111_s3 = scalar_lea.hbm %s7017_s17, 256 }
0x2ff7   :  { %p6112_p5 = scmp.ne.s32.totalorder %s7017_s17, %s6111_s3  ;;  %p6115_p6 = scmp.lt.u32.totalorder %s6111_s3, %s7017_s17 }
0x2ff9   :  { %p6117_p7 = pnand %p6115_p6, %p6112_p5 }
0x2ffb   :  { %6120 = shalt.err (!%p6117_p7)
}
0x2ffc   :  { %s6132_s7 = smov 128   ;;  %s6133_s19 = smov 8  }
0x2ffd   :  { %5241 = dma.vmem_to_hbm [thread:$0]  %s5236_s23, 256, %s7017_s17, [#allocation3], %s6132_s7, %s6132_s7, %s6133_s19  }
0x2ffe   :  { %6121 = dma.done.wait [#allocation3], 256  }
0x2fff   :  { %6122 = vsyncadd [#allocation3], 4294967040 }
0x3000   :  { %5249 = vsyncpa [#allocation3], 1 }

</bundles_post_ra>
